<compile_context>
chip_gen: v6e
topology: v6e:2x2x1
jax: 0.10.0
libtpu: 0.0.40
codegen_flags: <defaults>
</compile_context>

<pallas_src>
import functools

import jax
import jax.numpy as jnp
from jax import lax
from jax.experimental import pallas as pl
from jax.experimental.pallas import tpu as pltpu

_LANE = 128     # lane (minor-dim) tile
_SUBLANE = 8    # sublane (second-minor) tile


def _round_up(x, m):
    return (x + m - 1) // m * m


def _convblock_kernel(x_ref, w_ref, b_ref, o_ref, *, kh, kw, stride, th, wo):
    """Fused conv (sum over taps) + BN bias + ReLU6 for one tile of output rows.

    x_ref: (s, s, Hq, Wq, Cin)  bf16 phase-decomposed padded image (whole image)
    w_ref: (kh*kw, Cin, Coutp)  bf16 conv weights with BN scale folded in
    b_ref: (1, Coutp)           f32 BN bias
    o_ref: (th, Wo_pad, Coutp)  f32 output tile (th output rows, NHWC)
    """
    r = pl.program_id(1)
    row0 = r * th
    cin = x_ref.shape[-1]
    coutp = o_ref.shape[-1]

    acc = jnp.zeros((th * wo, coutp), dtype=jnp.float32)
    for dy in range(kh):
        py, qy = dy % stride, dy // stride
        for dx in range(kw):
            px, qx = dx % stride, dx // stride
            # Unit-stride window of the phase plane covering this tap for all
            # th*wo output pixels of the tile.
            slab = x_ref[py, px, pl.ds(row0 + qy, th), pl.ds(qx, wo), :]
            acc = acc + jnp.dot(slab.reshape(th * wo, cin),
                                w_ref[dy * kw + dx],
                                preferred_element_type=jnp.float32)
    y = jnp.clip(acc + b_ref[...], 0.0, 6.0)          # BN bias + ReLU6 (f32)
    o_ref[...] = y.reshape(th, wo, coutp).astype(o_ref.dtype)


def conv_block_forward(x_nchw, weight, gamma, beta, running_mean, running_var,
                       *, stride=1, padding=0, eps=1e-5, groups=1,
                       target_rows=1024):
    """ConvBlock forward: relu6(bn(conv(x))), BN in eval mode.

    x_nchw: (N, Cin, H, W)   weight: (Cout, Cin, kh, kw)
    """
    assert groups == 1, "only groups=1 supported"  # TODO(synk): grouped conv (g>1)
    N, Cin, H, W = x_nchw.shape
    Cout, Cin_w, kh, kw = weight.shape
    assert Cin == Cin_w
    s, p = int(stride), int(padding)

    Ho = (H + 2 * p - kh) // s + 1
    Wo = (W + 2 * p - kw) // s + 1

    # ---- tiling choices ----
    coutp = _round_up(Cout, _LANE)                 # lane-dense output channels
    wo_pad = _round_up(Wo, _SUBLANE)               # keeps in-kernel reshapes free
    th = max(1, min(Ho, target_rows // wo_pad))    # output rows per grid step
    ho_pad = _round_up(Ho, th)
    n_row_blocks = ho_pad // th

    # Phase-plane extents (unit-stride tap windows inside the kernel).
    hq = max(ho_pad + (kh - 1) // s, -(-(H + p) // s))
    wq = max(wo_pad + (kw - 1) // s, -(-(W + p) // s))
    hin, win = hq * s, wq * s

    # ---- host glue (pure data movement, O(input)) ----
    x = jnp.transpose(x_nchw, (0, 2, 3, 1)).astype(jnp.bfloat16)   # NHWC, bf16
    xp = jnp.pad(x, ((0, 0), (p, hin - H - p), (p, win - W - p), (0, 0)))
    if s == 1:
        x_ph = xp.reshape(N, 1, 1, hq, wq, Cin)
    else:
        x_ph = jnp.transpose(xp.reshape(N, hq, s, wq, s, Cin),
                             (0, 2, 4, 1, 3, 5))   # (N, s, s, Hq, Wq, Cin)

    # Fold BN (eval) into per-channel scale/bias; fold scale into the weights.
    inv_std = lax.rsqrt(running_var.astype(jnp.float32) + eps)
    scale = gamma.astype(jnp.float32) * inv_std
    bias = beta.astype(jnp.float32) - running_mean.astype(jnp.float32) * scale

    w = jnp.transpose(weight.astype(jnp.float32), (2, 3, 1, 0))    # (kh,kw,Cin,Cout)
    w = w * scale[None, None, None, :]
    w = jnp.pad(w, ((0, 0), (0, 0), (0, 0), (0, coutp - Cout)))
    w = w.reshape(kh * kw, Cin, coutp).astype(jnp.bfloat16)
    b = jnp.pad(bias, (0, coutp - Cout)).reshape(1, coutp)

    # TODO(synk): for very large Cin/Cout (beyond MobileNetV2 sizes) add K / Cout
    # grid axes with a VMEM accumulator so the resident weight + tiles fit v7x's
    # 64 MiB VMEM.
    kern = functools.partial(_convblock_kernel, kh=kh, kw=kw, stride=s,
                             th=th, wo=wo_pad)
    out = pl.pallas_call(
        kern,
        out_shape=jax.ShapeDtypeStruct((N, ho_pad, wo_pad, coutp), jnp.float32),
        grid_spec=pltpu.PrefetchScalarGridSpec(
            num_scalar_prefetch=0,
            grid=(N, n_row_blocks),
            in_specs=[
                # Whole phase-decomposed image per batch element (fetched once
                # per image; block index constant over the row axis).
                pl.BlockSpec((None, s, s, hq, wq, Cin),
                             lambda n, r: (n, 0, 0, 0, 0, 0)),
                # Resident folded weights and bias.
                pl.BlockSpec((kh * kw, Cin, coutp), lambda n, r: (0, 0, 0)),
                pl.BlockSpec((1, coutp), lambda n, r: (0, 0)),
            ],
            out_specs=pl.BlockSpec((None, th, wo_pad, coutp),
                                   lambda n, r: (n, r, 0, 0)),
        ),
        compiler_params=pltpu.CompilerParams(
            dimension_semantics=("parallel", "parallel"),
            vmem_limit_bytes=64 * 1024 * 1024),
    )(x_ph, w, b)

    out = out[:, :Ho, :Wo, :Cout]                  # drop row/col/channel padding
    # TODO(synk): skip this NHWC->NCHW transpose (one extra HBM pass) if the
    # consumer accepts NHWC.
    return jnp.transpose(out, (0, 3, 1, 2))


def _reference(x_nchw, weight, gamma, beta, running_mean, running_var,
               *, stride=1, padding=0, eps=1e-5):
    y = lax.conv_general_dilated(
        x_nchw.astype(jnp.float32), weight.astype(jnp.float32),
        window_strides=(stride, stride),
        padding=[(padding, padding), (padding, padding)],
        dimension_numbers=("NCHW", "OIHW", "NCHW"))
    inv_std = 1.0 / jnp.sqrt(running_var + eps)
    scale = (gamma * inv_std)[None, :, None, None]
    bias = (beta - running_mean * gamma * inv_std)[None, :, None, None]
    return jnp.clip(y * scale + bias, 0.0, 6.0)


if __name__ == "__main__":
    # ConvBlock(in_c=4, out_c=8, k=3, s=1, p=1)
    N, Cin, H, W = 2, 4, 16, 16
    Cout, kh, kw = 8, 3, 3
    stride, padding = 1, 1

    key = jax.random.PRNGKey(0)
    kx, kw_, kg, kb, km, kv = jax.random.split(key, 6)

    x = jax.random.normal(kx, (N, Cin, H, W), dtype=jnp.float32)
    weight = 0.1 * jax.random.normal(kw_, (Cout, Cin, kh, kw), dtype=jnp.float32)
    gamma = 1.0 + 0.1 * jax.random.normal(kg, (Cout,), dtype=jnp.float32)
    beta = 0.1 * jax.random.normal(kb, (Cout,), dtype=jnp.float32)
    running_mean = 0.1 * jax.random.normal(km, (Cout,), dtype=jnp.float32)
    running_var = jnp.abs(jax.random.normal(kv, (Cout,), dtype=jnp.float32)) + 0.5

    fwd = jax.jit(functools.partial(conv_block_forward,
                                    stride=stride, padding=padding))
    out = fwd(x, weight, gamma, beta, running_mean, running_var)
    out = jax.block_until_ready(out)

    ref = _reference(x, weight, gamma, beta, running_mean, running_var,
                     stride=stride, padding=padding)
    assert out.shape == (N, Cout, H, W), out.shape
    # bf16 MXU operands -> loosened tolerance vs. the f32 reference.
    assert jnp.allclose(out, ref, atol=2e-2, rtol=2e-2), float(
        jnp.max(jnp.abs(out - ref)))

    print("KERNEL_OK")
</pallas_src>

<mosaic_0001>
module attributes {stable_mosaic.version = 11 : i64} {
  func.func @_convblock_kernel(%arg0: i32, %arg1: i32, %arg2: memref<1x1x1x18x18x4xbf16, #tpu.memory_space<vmem>>, %arg3: memref<9x4x128xbf16, #tpu.memory_space<vmem>>, %arg4: memref<1x128xf32, #tpu.memory_space<vmem>>, %arg5: memref<1x16x16x128xf32, #tpu.memory_space<vmem>>) attributes {dimension_semantics = [#tpu.dimension_semantics<parallel>, #tpu.dimension_semantics<parallel>], iteration_bounds = array<i64: 2, 1>, scalar_prefetch = 0 : i64, scratch_operands = 0 : i64, tpu.core_type = #tpu.core_type<tc>, window_params = [{transform_indices = @transform_0, window_bounds = array<i64: 1, 1, 1, 18, 18, 4>}, {pipeline_mode = #tpu.pipeline_mode<synchronous>, transform_indices = @transform_1, window_bounds = array<i64: 9, 4, 128>}, {pipeline_mode = #tpu.pipeline_mode<synchronous>, transform_indices = @transform_2, window_bounds = array<i64: 1, 128>}, {transform_indices = @transform_3, window_bounds = array<i64: 1, 16, 16, 128>}]} {
    %c16_i32 = arith.constant 16 : i32
    %0 = arith.muli %arg1, %c16_i32 : i32
    %cst = arith.constant 0.000000e+00 : f32
    %1 = vector.broadcast %cst : f32 to vector<256x128xf32>
    %c0_i32 = arith.constant 0 : i32
    %2 = arith.addi %0, %c0_i32 : i32
    %c0 = arith.constant 0 : index
    %c0_0 = arith.constant 0 : index
    %c0_1 = arith.constant 0 : index
    %3 = arith.index_cast %2 : i32 to index
    %c0_2 = arith.constant 0 : index
    %c0_3 = arith.constant 0 : index
    %4 = vector.load %arg2[%c0, %c0_0, %c0_1, %3, %c0_2, %c0_3] : memref<1x1x1x18x18x4xbf16, #tpu.memory_space<vmem>>, vector<1x1x1x16x16x4xbf16>
    %5 = vector.shape_cast %4 : vector<1x1x1x16x16x4xbf16> to vector<16x16x4xbf16>
    %6 = vector.shape_cast %5 : vector<16x16x4xbf16> to vector<256x4xbf16>
    %c0_4 = arith.constant 0 : index
    %c0_5 = arith.constant 0 : index
    %c0_6 = arith.constant 0 : index
    %7 = vector.load %arg3[%c0_4, %c0_5, %c0_6] : memref<9x4x128xbf16, #tpu.memory_space<vmem>>, vector<1x4x128xbf16>
    %8 = vector.shape_cast %7 : vector<1x4x128xbf16> to vector<4x128xbf16>
    %cst_7 = arith.constant dense<0.000000e+00> : vector<256x128xf32>
    %9 = tpu.matmul %6, %8, %cst_7 {dimension_numbers = #tpu.dot_dimension_numbers<[1], [0], [0], [1], [0, 0, 1, 1], [], []>} : vector<256x4xbf16>, vector<4x128xbf16>, vector<256x128xf32> -> vector<256x128xf32>
    %10 = arith.addf %1, %9 : vector<256x128xf32>
    %c0_i32_8 = arith.constant 0 : i32
    %11 = arith.addi %0, %c0_i32_8 : i32
    %c0_9 = arith.constant 0 : index
    %c0_10 = arith.constant 0 : index
    %c0_11 = arith.constant 0 : index
    %12 = arith.index_cast %11 : i32 to index
    %c1 = arith.constant 1 : index
    %c0_12 = arith.constant 0 : index
    %13 = vector.load %arg2[%c0_9, %c0_10, %c0_11, %12, %c1, %c0_12] : memref<1x1x1x18x18x4xbf16, #tpu.memory_space<vmem>>, vector<1x1x1x16x16x4xbf16>
    %14 = vector.shape_cast %13 : vector<1x1x1x16x16x4xbf16> to vector<16x16x4xbf16>
    %15 = vector.shape_cast %14 : vector<16x16x4xbf16> to vector<256x4xbf16>
    %c1_13 = arith.constant 1 : index
    %c0_14 = arith.constant 0 : index
    %c0_15 = arith.constant 0 : index
    %16 = vector.load %arg3[%c1_13, %c0_14, %c0_15] : memref<9x4x128xbf16, #tpu.memory_space<vmem>>, vector<1x4x128xbf16>
    %17 = vector.shape_cast %16 : vector<1x4x128xbf16> to vector<4x128xbf16>
    %cst_16 = arith.constant dense<0.000000e+00> : vector<256x128xf32>
    %18 = tpu.matmul %15, %17, %cst_16 {dimension_numbers = #tpu.dot_dimension_numbers<[1], [0], [0], [1], [0, 0, 1, 1], [], []>} : vector<256x4xbf16>, vector<4x128xbf16>, vector<256x128xf32> -> vector<256x128xf32>
    %19 = arith.addf %10, %18 : vector<256x128xf32>
    %c0_i32_17 = arith.constant 0 : i32
    %20 = arith.addi %0, %c0_i32_17 : i32
    %c0_18 = arith.constant 0 : index
    %c0_19 = arith.constant 0 : index
    %c0_20 = arith.constant 0 : index
    %21 = arith.index_cast %20 : i32 to index
    %c2 = arith.constant 2 : index
    %c0_21 = arith.constant 0 : index
    %22 = vector.load %arg2[%c0_18, %c0_19, %c0_20, %21, %c2, %c0_21] : memref<1x1x1x18x18x4xbf16, #tpu.memory_space<vmem>>, vector<1x1x1x16x16x4xbf16>
    %23 = vector.shape_cast %22 : vector<1x1x1x16x16x4xbf16> to vector<16x16x4xbf16>
    %24 = vector.shape_cast %23 : vector<16x16x4xbf16> to vector<256x4xbf16>
    %c2_22 = arith.constant 2 : index
    %c0_23 = arith.constant 0 : index
    %c0_24 = arith.constant 0 : index
    %25 = vector.load %arg3[%c2_22, %c0_23, %c0_24] : memref<9x4x128xbf16, #tpu.memory_space<vmem>>, vector<1x4x128xbf16>
    %26 = vector.shape_cast %25 : vector<1x4x128xbf16> to vector<4x128xbf16>
    %cst_25 = arith.constant dense<0.000000e+00> : vector<256x128xf32>
    %27 = tpu.matmul %24, %26, %cst_25 {dimension_numbers = #tpu.dot_dimension_numbers<[1], [0], [0], [1], [0, 0, 1, 1], [], []>} : vector<256x4xbf16>, vector<4x128xbf16>, vector<256x128xf32> -> vector<256x128xf32>
    %28 = arith.addf %19, %27 : vector<256x128xf32>
    %c1_i32 = arith.constant 1 : i32
    %29 = arith.addi %0, %c1_i32 : i32
    %c0_26 = arith.constant 0 : index
    %c0_27 = arith.constant 0 : index
    %c0_28 = arith.constant 0 : index
    %30 = arith.index_cast %29 : i32 to index
    %c0_29 = arith.constant 0 : index
    %c0_30 = arith.constant 0 : index
    %31 = vector.load %arg2[%c0_26, %c0_27, %c0_28, %30, %c0_29, %c0_30] : memref<1x1x1x18x18x4xbf16, #tpu.memory_space<vmem>>, vector<1x1x1x16x16x4xbf16>
    %32 = vector.shape_cast %31 : vector<1x1x1x16x16x4xbf16> to vector<16x16x4xbf16>
    %33 = vector.shape_cast %32 : vector<16x16x4xbf16> to vector<256x4xbf16>
    %c3 = arith.constant 3 : index
    %c0_31 = arith.constant 0 : index
    %c0_32 = arith.constant 0 : index
    %34 = vector.load %arg3[%c3, %c0_31, %c0_32] : memref<9x4x128xbf16, #tpu.memory_space<vmem>>, vector<1x4x128xbf16>
    %35 = vector.shape_cast %34 : vector<1x4x128xbf16> to vector<4x128xbf16>
    %cst_33 = arith.constant dense<0.000000e+00> : vector<256x128xf32>
    %36 = tpu.matmul %33, %35, %cst_33 {dimension_numbers = #tpu.dot_dimension_numbers<[1], [0], [0], [1], [0, 0, 1, 1], [], []>} : vector<256x4xbf16>, vector<4x128xbf16>, vector<256x128xf32> -> vector<256x128xf32>
    %37 = arith.addf %28, %36 : vector<256x128xf32>
    %c1_i32_34 = arith.constant 1 : i32
    %38 = arith.addi %0, %c1_i32_34 : i32
    %c0_35 = arith.constant 0 : index
    %c0_36 = arith.constant 0 : index
    %c0_37 = arith.constant 0 : index
    %39 = arith.index_cast %38 : i32 to index
    %c1_38 = arith.constant 1 : index
    %c0_39 = arith.constant 0 : index
    %40 = vector.load %arg2[%c0_35, %c0_36, %c0_37, %39, %c1_38, %c0_39] : memref<1x1x1x18x18x4xbf16, #tpu.memory_space<vmem>>, vector<1x1x1x16x16x4xbf16>
    %41 = vector.shape_cast %40 : vector<1x1x1x16x16x4xbf16> to vector<16x16x4xbf16>
    %42 = vector.shape_cast %41 : vector<16x16x4xbf16> to vector<256x4xbf16>
    %c4 = arith.constant 4 : index
    %c0_40 = arith.constant 0 : index
    %c0_41 = arith.constant 0 : index
    %43 = vector.load %arg3[%c4, %c0_40, %c0_41] : memref<9x4x128xbf16, #tpu.memory_space<vmem>>, vector<1x4x128xbf16>
    %44 = vector.shape_cast %43 : vector<1x4x128xbf16> to vector<4x128xbf16>
    %cst_42 = arith.constant dense<0.000000e+00> : vector<256x128xf32>
    %45 = tpu.matmul %42, %44, %cst_42 {dimension_numbers = #tpu.dot_dimension_numbers<[1], [0], [0], [1], [0, 0, 1, 1], [], []>} : vector<256x4xbf16>, vector<4x128xbf16>, vector<256x128xf32> -> vector<256x128xf32>
    %46 = arith.addf %37, %45 : vector<256x128xf32>
    %c1_i32_43 = arith.constant 1 : i32
    %47 = arith.addi %0, %c1_i32_43 : i32
    %c0_44 = arith.constant 0 : index
    %c0_45 = arith.constant 0 : index
    %c0_46 = arith.constant 0 : index
    %48 = arith.index_cast %47 : i32 to index
    %c2_47 = arith.constant 2 : index
    %c0_48 = arith.constant 0 : index
    %49 = vector.load %arg2[%c0_44, %c0_45, %c0_46, %48, %c2_47, %c0_48] : memref<1x1x1x18x18x4xbf16, #tpu.memory_space<vmem>>, vector<1x1x1x16x16x4xbf16>
    %50 = vector.shape_cast %49 : vector<1x1x1x16x16x4xbf16> to vector<16x16x4xbf16>
    %51 = vector.shape_cast %50 : vector<16x16x4xbf16> to vector<256x4xbf16>
    %c5 = arith.constant 5 : index
    %c0_49 = arith.constant 0 : index
    %c0_50 = arith.constant 0 : index
    %52 = vector.load %arg3[%c5, %c0_49, %c0_50] : memref<9x4x128xbf16, #tpu.memory_space<vmem>>, vector<1x4x128xbf16>
    %53 = vector.shape_cast %52 : vector<1x4x128xbf16> to vector<4x128xbf16>
    %cst_51 = arith.constant dense<0.000000e+00> : vector<256x128xf32>
    %54 = tpu.matmul %51, %53, %cst_51 {dimension_numbers = #tpu.dot_dimension_numbers<[1], [0], [0], [1], [0, 0, 1, 1], [], []>} : vector<256x4xbf16>, vector<4x128xbf16>, vector<256x128xf32> -> vector<256x128xf32>
    %55 = arith.addf %46, %54 : vector<256x128xf32>
    %c2_i32 = arith.constant 2 : i32
    %56 = arith.addi %0, %c2_i32 : i32
    %c0_52 = arith.constant 0 : index
    %c0_53 = arith.constant 0 : index
    %c0_54 = arith.constant 0 : index
    %57 = arith.index_cast %56 : i32 to index
    %c0_55 = arith.constant 0 : index
    %c0_56 = arith.constant 0 : index
    %58 = vector.load %arg2[%c0_52, %c0_53, %c0_54, %57, %c0_55, %c0_56] : memref<1x1x1x18x18x4xbf16, #tpu.memory_space<vmem>>, vector<1x1x1x16x16x4xbf16>
    %59 = vector.shape_cast %58 : vector<1x1x1x16x16x4xbf16> to vector<16x16x4xbf16>
    %60 = vector.shape_cast %59 : vector<16x16x4xbf16> to vector<256x4xbf16>
    %c6 = arith.constant 6 : index
    %c0_57 = arith.constant 0 : index
    %c0_58 = arith.constant 0 : index
    %61 = vector.load %arg3[%c6, %c0_57, %c0_58] : memref<9x4x128xbf16, #tpu.memory_space<vmem>>, vector<1x4x128xbf16>
    %62 = vector.shape_cast %61 : vector<1x4x128xbf16> to vector<4x128xbf16>
    %cst_59 = arith.constant dense<0.000000e+00> : vector<256x128xf32>
    %63 = tpu.matmul %60, %62, %cst_59 {dimension_numbers = #tpu.dot_dimension_numbers<[1], [0], [0], [1], [0, 0, 1, 1], [], []>} : vector<256x4xbf16>, vector<4x128xbf16>, vector<256x128xf32> -> vector<256x128xf32>
    %64 = arith.addf %55, %63 : vector<256x128xf32>
    %c2_i32_60 = arith.constant 2 : i32
    %65 = arith.addi %0, %c2_i32_60 : i32
    %c0_61 = arith.constant 0 : index
    %c0_62 = arith.constant 0 : index
    %c0_63 = arith.constant 0 : index
    %66 = arith.index_cast %65 : i32 to index
    %c1_64 = arith.constant 1 : index
    %c0_65 = arith.constant 0 : index
    %67 = vector.load %arg2[%c0_61, %c0_62, %c0_63, %66, %c1_64, %c0_65] : memref<1x1x1x18x18x4xbf16, #tpu.memory_space<vmem>>, vector<1x1x1x16x16x4xbf16>
    %68 = vector.shape_cast %67 : vector<1x1x1x16x16x4xbf16> to vector<16x16x4xbf16>
    %69 = vector.shape_cast %68 : vector<16x16x4xbf16> to vector<256x4xbf16>
    %c7 = arith.constant 7 : index
    %c0_66 = arith.constant 0 : index
    %c0_67 = arith.constant 0 : index
    %70 = vector.load %arg3[%c7, %c0_66, %c0_67] : memref<9x4x128xbf16, #tpu.memory_space<vmem>>, vector<1x4x128xbf16>
    %71 = vector.shape_cast %70 : vector<1x4x128xbf16> to vector<4x128xbf16>
    %cst_68 = arith.constant dense<0.000000e+00> : vector<256x128xf32>
    %72 = tpu.matmul %69, %71, %cst_68 {dimension_numbers = #tpu.dot_dimension_numbers<[1], [0], [0], [1], [0, 0, 1, 1], [], []>} : vector<256x4xbf16>, vector<4x128xbf16>, vector<256x128xf32> -> vector<256x128xf32>
    %73 = arith.addf %64, %72 : vector<256x128xf32>
    %c2_i32_69 = arith.constant 2 : i32
    %74 = arith.addi %0, %c2_i32_69 : i32
    %c0_70 = arith.constant 0 : index
    %c0_71 = arith.constant 0 : index
    %c0_72 = arith.constant 0 : index
    %75 = arith.index_cast %74 : i32 to index
    %c2_73 = arith.constant 2 : index
    %c0_74 = arith.constant 0 : index
    %76 = vector.load %arg2[%c0_70, %c0_71, %c0_72, %75, %c2_73, %c0_74] : memref<1x1x1x18x18x4xbf16, #tpu.memory_space<vmem>>, vector<1x1x1x16x16x4xbf16>
    %77 = vector.shape_cast %76 : vector<1x1x1x16x16x4xbf16> to vector<16x16x4xbf16>
    %78 = vector.shape_cast %77 : vector<16x16x4xbf16> to vector<256x4xbf16>
    %c8 = arith.constant 8 : index
    %c0_75 = arith.constant 0 : index
    %c0_76 = arith.constant 0 : index
    %79 = vector.load %arg3[%c8, %c0_75, %c0_76] : memref<9x4x128xbf16, #tpu.memory_space<vmem>>, vector<1x4x128xbf16>
    %80 = vector.shape_cast %79 : vector<1x4x128xbf16> to vector<4x128xbf16>
    %cst_77 = arith.constant dense<0.000000e+00> : vector<256x128xf32>
    %81 = tpu.matmul %78, %80, %cst_77 {dimension_numbers = #tpu.dot_dimension_numbers<[1], [0], [0], [1], [0, 0, 1, 1], [], []>} : vector<256x4xbf16>, vector<4x128xbf16>, vector<256x128xf32> -> vector<256x128xf32>
    %82 = arith.addf %73, %81 : vector<256x128xf32>
    %c0_78 = arith.constant 0 : index
    %c0_79 = arith.constant 0 : index
    %83 = vector.load %arg4[%c0_78, %c0_79] : memref<1x128xf32, #tpu.memory_space<vmem>>, vector<1x128xf32>
    %84 = vector.broadcast %83 : vector<1x128xf32> to vector<256x128xf32>
    %85 = arith.addf %82, %84 : vector<256x128xf32>
    %cst_80 = arith.constant 0.000000e+00 : f32
    %cst_81 = arith.constant 6.000000e+00 : f32
    %86 = vector.broadcast %cst_80 : f32 to vector<256x128xf32>
    %87 = arith.maximumf %86, %85 : vector<256x128xf32>
    %88 = vector.broadcast %cst_81 : f32 to vector<256x128xf32>
    %89 = arith.minimumf %88, %87 : vector<256x128xf32>
    %90 = vector.shape_cast %89 : vector<256x128xf32> to vector<16x16x128xf32>
    %c0_82 = arith.constant 0 : index
    %c0_83 = arith.constant 0 : index
    %c0_84 = arith.constant 0 : index
    %c0_85 = arith.constant 0 : index
    %91 = vector.load %arg5[%c0_82, %c0_83, %c0_84, %c0_85] : memref<1x16x16x128xf32, #tpu.memory_space<vmem>>, vector<1x16x16x128xf32>
    %92 = vector.shape_cast %91 : vector<1x16x16x128xf32> to vector<16x16x128xf32>
    %93 = vector.shape_cast %90 : vector<16x16x128xf32> to vector<1x16x16x128xf32>
    tpu.vector_store %arg5[%c0_82, %c0_83, %c0_84, %c0_85], %93 {strides = array<i32>} : memref<1x16x16x128xf32, #tpu.memory_space<vmem>>, vector<1x16x16x128xf32>,
    return
  }
  func.func @transform_0(%arg0: i32, %arg1: i32) -> (i32, i32, i32, i32, i32, i32) {
    %c0_i32 = arith.constant 0 : i32
    %c0_i32_0 = arith.constant 0 : i32
    %c0_i32_1 = arith.constant 0 : i32
    %c0_i32_2 = arith.constant 0 : i32
    %c0_i32_3 = arith.constant 0 : i32
    %c0_i32_4 = arith.constant 0 : i32
    return %arg0, %c0_i32, %c0_i32_0, %c0_i32_1, %c0_i32_2, %c0_i32_3 : i32, i32, i32, i32, i32, i32
  }
  func.func @transform_1(%arg0: i32, %arg1: i32) -> (i32, i32, i32) {
    %c0_i32 = arith.constant 0 : i32
    %c0_i32_0 = arith.constant 0 : i32
    %c0_i32_1 = arith.constant 0 : i32
    %c0_i32_2 = arith.constant 0 : i32
    return %c0_i32, %c0_i32_0, %c0_i32_1 : i32, i32, i32
  }
  func.func @transform_2(%arg0: i32, %arg1: i32) -> (i32, i32) {
    %c0_i32 = arith.constant 0 : i32
    %c0_i32_0 = arith.constant 0 : i32
    %c0_i32_1 = arith.constant 0 : i32
    return %c0_i32, %c0_i32_0 : i32, i32
  }
  func.func @transform_3(%arg0: i32, %arg1: i32) -> (i32, i32, i32, i32) {
    %c0_i32 = arith.constant 0 : i32
    %c0_i32_0 = arith.constant 0 : i32
    %c0_i32_1 = arith.constant 0 : i32
    return %arg0, %arg1, %c0_i32, %c0_i32_0 : i32, i32, i32, i32
  }
}

</mosaic_0001>

<bundles_post_ra>
// kernel: conv_block_forward.1
= control target key start
LH: loop header
LB: loop body
LE: loop exit
PB: predicated region body
PF: predicated region fallthrough
CT: control target
= control target key end

     0   :  { %s6136_s12 = smov 0   ;;  %s6138_s13 = smov 0   ;;  %s8797_s0 = inlined_call_operand.vmem [shape: bf16[2,1,1,18,18,4], index: 0, kind: input, shape index: {}]   ;;  %s8798_s1 = inlined_call_operand.vmem [shape: bf16[9,4,128], index: 1, kind: input, shape index: {}]   ;;  %s8799_s2 = inlined_call_operand.vmem [shape: f32[1,128], index: 2, kind: input, shape index: {}]   ;;  %s8800_s3 = inlined_call_operand.vmem [shape: f32[2,16,16,128], index: 3, kind: output, shape index: {}]  }
   0x1   :  { %s6140_s14 = smov 0  }
   0x2 LB: > { %s25_s15 = sadd.s32 1, %s6110_s13  ;;  %p5002_p0 = scmp.ge.s32.totalorder %s6114_s14, 1  ;;  %s6114_s14 = sphi %s6140_s14, %s13_s14   ;;  %s6110_s13 = sphi %s6138_s13, %s9078_s13   ;;  %s6106_s12 = sphi %s6136_s12, %s9077_s12  }
   0x3   : > { %p27_p1 = scmp.ge.s32.totalorder %s25_s15, 2  ;;  %p151_p2 = scmp.lt.s32.totalorder %s6114_s14, 3 }
   0x5   : > { %s9080_s15 = smov (%p27_p1, %s25_s15), 0  ;;  %p152_p3 = pnand %p5002_p0, %p151_p2 }
   0x7   : > { %155 = sbr.rel (%p152_p3) target bundleno = 559 (0x22f), region = 32 }
   0xc   : > { %v5006_v0 = vld [vmem:[%s8798_s1 + $0x2] sm:$0x3]  ;;  %vm736_vm0 = vcmask 1041408   ;;  %p180_p4 = scmp.lt.s32.totalorder %s6106_s12, 1  ;;  %v233_v2 = vld [vmem:[%s8798_s1] sm:$0x3] }
   0xd   : > { %6008 = vmatprep.subr.msk.bf16.mxu1 %vm736_vm0, %v5006_v0  ;;  %6007 = vmatprep.subr.msk.bf16.mxu0 %vm736_vm0, %v5006_v0  ;;  %v738_v1 = vsel %vm736_vm0, %v5006_v0, 0  ;;  %v5087_v3 = vld [vmem:[%s8798_s1 + $0x4] sm:$0x3]  ;;  %vm250_vm1 = vsmask.f32 3328  ;;  %v6177_v4 = vsel %vm736_vm0, %v233_v2, 0 }
   0xe   : > { %6006 = vmatpush3.bf16.msra.mxu1 %v738_v1  ;;  %5700 = vmatpush3.bf16.msra.mxu0 %v738_v1  ;;  %s9082_s12 = smov (!%p180_p4, %s6106_s12), 1  ;;  %vm251_vm2 = vsmask.f32 7440  ;;  %vm687_vm3 = vcmask 31744   ;;  %v6203_v16 = vsel %vm736_vm0, %v5087_v3, 0  ;;  %vm1241_vm5 = vcmask 1042432  }
   0xf   : > { %6009 = vmatprep.subr.msk.bf16.mxu1 %vm736_vm0, %v233_v2  ;;  %6010 = vmatprep.subr.msk.bf16.mxu0 %vm736_vm0, %v5087_v3  ;;  %s6017_s22 = smul.u32 216, %s9082_s12  ;;  %vm6218_vm4 = vmor %vm250_vm1, %vm251_vm2  ;;  %vm1242_vm6 = vcmask 1046532   ;;  %s5545_s17 = sshll.u32 %s9082_s12, 8 }
  0x10   : > { %vm6504_vm7 = vmor %vm1241_vm5, %vm1242_vm6  ;;  %s8650_s19 = scalar_lea.vmem %s8800_s3, %s5545_s17 }
  0x11   : > { %s6174_s25 = scalar_lea.vmem %s8797_s0, %s6017_s22 }
  0x12   : > { %v6180_v5 = vld [vmem:[%s6174_s25] sm:$0xf]  ;;  %v6183_v6 = vld [vmem:[%s6174_s25 + $0x4] sm:$0xf]  ;;  %v6186_v7 = vld [vmem:[%s6174_s25 + $0x8] sm:$0x1] }
  0x13   : > { %v254_v8 = vshrl.u32 %v6180_v5, 16  ;;  %v257_v9 = vshll.u32 %v6180_v5, 16  ;;  %v263_v10 = vshll.u32 %v6183_v6, 16  ;;  %v267_v11 = vshrl.u32 %v6183_v6, 16  ;;  %v6193_v12 = vld [vmem:[%s6174_s25 + $0x60] sm:$0xf] }
  0x14   : > { %v273_v13 = vshll.u32 %v6186_v7, 16  ;;  %v6197_v14 = vld [vmem:[%s6174_s25 + $0x64] sm:$0xf]  ;;  %v6200_v15 = vld [vmem:[%s6174_s25 + $0x68] sm:$0x1]  ;;  %v446_v22 = vshrl.u32 %v6193_v12, 16 }
  0x15   : > { %v256_v17 = vrot.slane %v254_v8, 4  ;;  %v259_v18 = vrot.slane %v257_v9, 5  ;;  %v265_v19 = vrot.slane %v263_v10, 5  ;;  %v269_v20 = vrot.slane %v267_v11, 4  ;;  %v6211_v29 = vld [vmem:[%s6174_s25 + $0xc] sm:$0xf] }
  0x16   : > { %v275_v21 = vrot.slane %v273_v13, 5  ;;  %v449_v23 = vshll.u32 %v6193_v12, 16  ;;  %v455_v24 = vshll.u32 %v6197_v14, 16  ;;  %v459_v27 = vshrl.u32 %v6197_v14, 16  ;;  %v6214_v30 = vld [vmem:[%s6174_s25 + $0x10] sm:$0xf] }
  0x17   : > { %v260_v25 = vor.u32 %v259_v18, %v256_v17  ;;  %v270_v26 = vor.u32 %v269_v20, %v265_v19  ;;  %v465_v28 = vshll.u32 %v6200_v15, 16  ;;  %v448_v33 = vrot.slane %v446_v22, 4  ;;  %v6224_v41 = vld [vmem:[%s6174_s25 + $0x14] sm:$0x1]  ;;  %v6235_v53 = vld [vmem:[%s6174_s25 + $0x6c] sm:$0xf] }
  0x18   : > { %v451_v34 = vrot.slane %v449_v23, 5  ;;  %v457_v35 = vrot.slane %v455_v24, 5  ;;  %v461_v38 = vrot.slane %v459_v27, 4  ;;  %v278_v42 = vshrl.u32 %v6211_v29, 16  ;;  %v6239_v58 = vld [vmem:[%s6174_s25 + $0x70] sm:$0xf] }
  0x19   : > { %v261_v36 = vrot.slane %v260_v25, 4  ;;  %v271_v37 = vrot.slane %v270_v26, 4  ;;  %v467_v39 = vrot.slane %v465_v28, 5  ;;  %v281_v43 = vshll.u32 %v6211_v29, 16  ;;  %v6247_v63 = vld [vmem:[%s6174_s25 + $0x74] sm:$0x1] }
  0x1a   : > { %v452_v40 = vor.u32 %v451_v34, %v448_v33  ;;  %v287_v44 = vshll.u32 %v6214_v30, 16  ;;  %v462_v47 = vor.u32 %v461_v38, %v457_v35  ;;  %v291_v48 = vshrl.u32 %v6214_v30, 16  ;;  %v6253_v8 = vld [vmem:[%s6174_s25 + $0x18] sm:$0xf]  ;;  %v6266_v25 = vld [vmem:[%s6174_s25 + $0x20] sm:$0x1] }
  0x1b   : > { %v266_v45 = vsel %vm6218_vm4, %v261_v36, %v265_v19  ;;  %v276_v46 = vsel %vm6218_vm4, %v271_v37, %v275_v21  ;;  %v280_v51 = vrot.slane %v278_v42, 4  ;;  %v283_v52 = vrot.slane %v281_v43, 5  ;;  %v6260_v21 = vld [vmem:[%s6174_s25 + $0x1c] sm:$0xf] }
  0x1c   : > { %v5007_v49 = vcombine.low %v266_v45, %v276_v46  ;;  %v453_v50 = vrot.slane %v452_v40, 4  ;;  %v463_v54 = vrot.slane %v462_v47, 4  ;;  %v289_v55 = vrot.slane %v287_v44, 5  ;;  %v6279_v40 = vld [vmem:[%s8798_s1 + $0x8] sm:$0x3] }
  0x1d   : > { %v293_v56 = vrot.slane %v291_v48, 4  ;;  %v297_v57 = vshll.u32 %v6224_v41, 16  ;;  %v284_v60 = vor.u32 %v283_v52, %v280_v51  ;;  %v470_v3 = vshrl.u32 %v6235_v53, 16  ;;  %v6284_v46 = vld [vmem:[%s6174_s25 + $0x7c] sm:$0xf] }
  0x1e   : > { %5701 = vmatprep.mubr.msk.bf16.mxu0 %vm687_vm3, %v5007_v49  ;;  %v458_v59 = vsel %vm6218_vm4, %v453_v50, %v457_v35  ;;  %v468_v0 = vsel %vm6218_vm4, %v463_v54, %v467_v39  ;;  %v473_v11 = vshll.u32 %v6235_v53, 16  ;;  %v479_v13 = vshll.u32 %v6239_v58, 16  ;;  %v6273_v35 = vld [vmem:[%s6174_s25 + $0x78] sm:$0xf] }
  0x1f   : > { %v294_v1 = vor.u32 %v293_v56, %v289_v55  ;;  %v299_v2 = vrot.slane %v297_v57, 5  ;;  %v5015_v9 = vcombine.low %v458_v59, %v468_v0  ;;  %v285_v10 = vrot.slane %v284_v60, 4  ;;  %v6291_v56 = vld [vmem:[%s6174_s25 + $0x80] sm:$0x1] }
  0x20   : > { %v472_v18 = vrot.slane %v470_v3, 4  ;;  %v483_v19 = vshrl.u32 %v6239_v58, 16  ;;  %v489_v20 = vshll.u32 %v6247_v63, 16  ;;  %v475_v23 = vrot.slane %v473_v11, 5  ;;  %8836 = vst [vmem:[#allocation2_spill] sm:$0xff] %v6291_v56 }
  0x21   : > { %v295_v17 = vrot.slane %v294_v1, 4  ;;  %5717 = vmatprep.mubr.msk.bf16.mxu1 %vm687_vm3, %v5015_v9  ;;  %v290_v22 = vsel %vm6218_vm4, %v285_v10, %v289_v55  ;;  %v481_v24 = vrot.slane %v479_v13, 5  ;;  %v302_v26 = vshrl.u32 %v6253_v8, 16  ;;  %v6297_v1 = vld [vmem:[%s6174_s25 + $0x24] sm:$0xf] }
  0x22   : > { %v485_v28 = vrot.slane %v483_v19, 4  ;;  %v491_v33 = vrot.slane %v489_v20, 5  ;;  %v305_v34 = vshll.u32 %v6253_v8, 16  ;;  %v476_v37 = vor.u32 %v475_v23, %v472_v18  ;;  %v6305_v10 = vld [vmem:[%s6174_s25 + $0x28] sm:$0xf] }
  0x23   : > { %v300_v27 = vsel %vm6218_vm4, %v295_v17, %v299_v2  ;;  %v304_v38 = vrot.slane %v302_v26, 4  ;;  %v311_v39 = vshll.u32 %v6260_v21, 16  ;;  %v315_v44 = vshrl.u32 %v6260_v21, 16  ;;  %v6311_v19 = vld [vmem:[%s8798_s1 + $0x6] sm:$0x3] }
  0x24   : > { %v5008_v36 = vcombine.low %v290_v22, %v300_v27  ;;  %v486_v42 = vor.u32 %v485_v28, %v481_v24  ;;  %v307_v43 = vrot.slane %v305_v34, 5  ;;  %v321_v45 = vshll.u32 %v6266_v25, 16 }
  0x25   : > { %v477_v47 = vrot.slane %v476_v37, 4  ;;  %v313_v48 = vrot.slane %v311_v39, 5  ;;  %v494_v49 = vshrl.u32 %v6273_v35, 16  ;;  %v497_v50 = vshll.u32 %v6273_v35, 16 }
  0x26   : > { %5702 = vmatmul.mubr.msk.bf16.vlgmr.msra.gmra.mxu0 %vm687_vm3, %v5008_v36  ;;  %v487_v51 = vrot.slane %v486_v42, 4  ;;  %v308_v52 = vor.u32 %v307_v43, %v304_v38  ;;  %v317_v54 = vrot.slane %v315_v44, 4  ;;  %v323_v55 = vrot.slane %v321_v45, 5  ;;  %v6323_v36 = vld [vmem:[%s6174_s25 + $0x84] sm:$0xf] }
  0x27   : > { %5768 = vmatpush3.bf16.msra.mxu0 %v6203_v16  ;;  %v482_v57 = vsel %vm6218_vm4, %v477_v47, %v481_v24  ;;  %v496_v59 = vrot.slane %v494_v49, 4  ;;  %v499_v60 = vrot.slane %v497_v50, 5  ;;  %v503_v0 = vshll.u32 %v6284_v46, 16  ;;  %v6316_v24 = vld [vmem:[%s6174_s25 + $0x2c] sm:$0x1] }
  0x28   : > { %6012 = vmatprep.subr.msk.bf16.mxu0 %vm736_vm0, %v6279_v40  ;;  %v492_v16 = vsel %vm6218_vm4, %v487_v51, %v491_v33  ;;  %v309_v2 = vrot.slane %v308_v52, 4  ;;  %v318_v3 = vor.u32 %v317_v54, %v313_v48  ;;  %v507_v9 = vshrl.u32 %v6284_v46, 16  ;;  %v6330_v43 = vld [vmem:[%s6174_s25 + $0x88] sm:$0xf]  ;;  %v6338_v51 = vld [vmem:[%s6174_s25 + $0x8c] sm:$0x1] }
  0x29   : > { %v5016_v11 = vcombine.low %v482_v57, %v492_v16  ;;  %v500_v13 = vor.u32 %v499_v60, %v496_v59  ;;  %v505_v17 = vrot.slane %v503_v0, 5  ;;  %v513_v18 = vshll.u32 %v6291_v56, 16  ;;  %8837 = vst [vmem:[#allocation3_spill] sm:$0xff] %v6338_v51  ;;  %v6346_v60 = vld [vmem:[%s6174_s25 + $0x30] sm:$0xf] }
  0x2a   : > { %v314_v20 = vsel %vm6218_vm4, %v309_v2, %v313_v48  ;;  %v319_v22 = vrot.slane %v318_v3, 4  ;;  %v509_v23 = vrot.slane %v507_v9, 4  ;;  %v326_v26 = vshrl.u32 %v6297_v1, 16  ;;  %v6351_v9 = vld [vmem:[%s6174_s25 + $0x34] sm:$0xf] }
  0x2b   : > { %5718 = vmatmul.mubr.msk.bf16.vlgmr.msra.gmra.mxu1 %vm687_vm3, %v5016_v11  ;;  %v501_v27 = vrot.slane %v500_v13, 4  ;;  %v515_v28 = vrot.slane %v513_v18, 5  ;;  %v329_v33 = vshll.u32 %v6297_v1, 16  ;;  %v335_v34 = vshll.u32 %v6305_v10, 16 }
  0x2c   : > { %5734 = vmatpush3.bf16.msra.mxu1 %v6177_v4  ;;  %v324_v37 = vsel %vm6218_vm4, %v319_v22, %v323_v55  ;;  %v510_v38 = vor.u32 %v509_v23, %v505_v17  ;;  %v328_v39 = vrot.slane %v326_v26, 4  ;;  %v339_v42 = vshrl.u32 %v6305_v10, 16 }
  0x2d   : > { %v5009_v44 = vcombine.low %v314_v20, %v324_v37  ;;  %v506_v45 = vsel %vm6218_vm4, %v501_v27, %v505_v17  ;;  %v331_v47 = vrot.slane %v329_v33, 5  ;;  %v337_v48 = vrot.slane %v335_v34, 5  ;;  %6011 = vmatprep.subr.msk.bf16.mxu1 %vm736_vm0, %v6311_v19  ;;  %v6359_v33 = vld [vmem:[%s6174_s25 + $0x38] sm:$0x1] }
  0x2e   : > { %v511_v4 = vrot.slane %v510_v38, 4  ;;  %v341_v49 = vrot.slane %v339_v42, 4  ;;  %v345_v50 = vshll.u32 %v6316_v24, 16  ;;  %v518_v52 = vshrl.u32 %v6323_v36, 16  ;;  %v6364_v38 = vld [vmem:[%s6174_s25 + $0x90] sm:$0xf] }
  0x2f   : > { %5705 = vmatprep.mubr.msk.bf16.mxu0 %vm687_vm3, %v5009_v44  ;;  %v332_v54 = vor.u32 %v331_v47, %v328_v39  ;;  %v521_v55 = vshll.u32 %v6323_v36, 16  ;;  %v527_v57 = vshll.u32 %v6330_v43, 16  ;;  %v531_v59 = vshrl.u32 %v6330_v43, 16  ;;  %8838 = vst [vmem:[#allocation4_spill] sm:$0xff] %v6364_v38  ;;  %v6369_v47 = vld [vmem:[%s6174_s25 + $0x94] sm:$0xf] }
  0x30   : > { %v516_v0 = vsel %vm6218_vm4, %v511_v4, %v515_v28  ;;  %v342_v16 = vor.u32 %v341_v49, %v337_v48  ;;  %v347_v2 = vrot.slane %v345_v50, 5  ;;  %v520_v3 = vrot.slane %v518_v52, 4  ;;  %8839 = vst [vmem:[#allocation5_spill] sm:$0xff] %v6369_v47 }
  0x31   : > { %v5017_v11 = vcombine.low %v506_v45, %v516_v0  ;;  %v333_v13 = vrot.slane %v332_v54, 4  ;;  %v523_v17 = vrot.slane %v521_v55, 5  ;;  %v529_v18 = vrot.slane %v527_v57, 5 }
  0x32   : > { %v343_v20 = vrot.slane %v342_v16, 4  ;;  %v533_v22 = vrot.slane %v531_v59, 4  ;;  %v537_v23 = vshll.u32 %v6338_v51, 16  ;;  %v350_v26 = vshrl.u32 %v6346_v60, 16  ;;  %v6378_v16 = vld [vmem:[%s6174_s25 + $0x98] sm:$0x1] }
  0x33   : > { %5721 = vmatprep.mubr.msk.bf16.mxu1 %vm687_vm3, %v5017_v11  ;;  %v338_v27 = vsel %vm6218_vm4, %v333_v13, %v337_v48  ;;  %v524_v28 = vor.u32 %v523_v17, %v520_v3  ;;  %v353_v34 = vshll.u32 %v6346_v60, 16  ;;  %v359_v37 = vshll.u32 %v6351_v9, 16  ;;  %8840 = vst [vmem:[#allocation6_spill] sm:$0xff] %v6378_v16  ;;  %v6383_v11 = vld [vmem:[%s6174_s25 + $0x3c] sm:$0xf] }
  0x34   : > { %v348_v39 = vsel %vm6218_vm4, %v343_v20, %v347_v2  ;;  %v534_v42 = vor.u32 %v533_v22, %v529_v18  ;;  %v539_v44 = vrot.slane %v537_v23, 5  ;;  %v352_v45 = vrot.slane %v350_v26, 4  ;;  %v6388_v23 = vld [vmem:[%s6174_s25 + $0x40] sm:$0xf]  ;;  %v1194_v51 = vld [vmem:[%s6174_s25 + $0xc] sm:$0xe] }
  0x35   : > { %v5010_v48 = vcombine.low %v338_v27, %v348_v39  ;;  %v525_v4 = vrot.slane %v524_v28, 4  ;;  %v355_v49 = vrot.slane %v353_v34, 5  ;;  %v361_v50 = vrot.slane %v359_v37, 5 }
  0x36   : > { %v535_v52 = vrot.slane %v534_v42, 4  ;;  %v363_v54 = vshrl.u32 %v6351_v9, 16  ;;  %v369_v55 = vshll.u32 %v6359_v33, 16  ;;  %v542_v57 = vshrl.u32 %v6364_v38, 16 }
  0x37   : > { %5706 = vmatmul.mubr.msk.bf16.gmra.mxu0 %vm687_vm3, %v5010_v48  ;;  %v530_v59 = vsel %vm6218_vm4, %v525_v4, %v529_v18  ;;  %v356_v0 = vor.u32 %v355_v49, %v352_v45  ;;  %v545_v2 = vshll.u32 %v6364_v38, 16  ;;  %v551_v3 = vshll.u32 %v6369_v47, 16  ;;  %v6397_v48 = vld [vmem:[%s6174_s25 + $0x44] sm:$0x1] }
  0x38   : > { %v540_v13 = vsel %vm6218_vm4, %v535_v52, %v539_v44  ;;  %v365_v17 = vrot.slane %v363_v54, 4  ;;  %v371_v20 = vrot.slane %v369_v55, 5  ;;  %v544_v22 = vrot.slane %v542_v57, 4  ;;  %v6402_v52 = vld [vmem:[%s6174_s25 + $0x9c] sm:$0xf] }
  0x39   : > { %v5018_v18 = vcombine.low %v530_v59, %v540_v13  ;;  %v357_v26 = vrot.slane %v356_v0, 4  ;;  %v547_v27 = vrot.slane %v545_v2, 5  ;;  %v553_v28 = vrot.slane %v551_v3, 5  ;;  %8841 = vst [vmem:[#allocation7_spill] sm:$0xff] %v6402_v52  ;;  %v6406_v13 = vld [vmem:[%s6174_s25 + $0xa0] sm:$0xf] }
  0x3a   : > { %v366_v34 = vor.u32 %v365_v17, %v361_v50  ;;  %v555_v37 = vshrl.u32 %v6369_v47, 16  ;;  %v561_v39 = vshll.u32 %v6378_v16, 16  ;;  %v374_v42 = vshrl.u32 %v6383_v11, 16  ;;  %8842 = vst [vmem:[#allocation8_spill] sm:$0xff] %v6406_v13 }
  0x3b   : > { %5722 = vmatmul.mubr.msk.bf16.gmra.mxu1 %vm687_vm3, %v5018_v18  ;;  %v362_v44 = vsel %vm6218_vm4, %v357_v26, %v361_v50  ;;  %v548_v45 = vor.u32 %v547_v27, %v544_v22  ;;  %v377_v4 = vshll.u32 %v6383_v11, 16  ;;  %v383_v49 = vshll.u32 %v6388_v23, 16  ;;  %v6412_v26 = vld [vmem:[%s6174_s25 + $0xa4] sm:$0x1] }
  0x3c   : > { %v367_v54 = vrot.slane %v366_v34, 4  ;;  %v557_v55 = vrot.slane %v555_v37, 4  ;;  %v563_v57 = vrot.slane %v561_v39, 5  ;;  %v376_v59 = vrot.slane %v374_v42, 4  ;;  %8843 = vst [vmem:[#allocation9_spill] sm:$0xff] %v6412_v26 }
  0x3d   : > { %v549_v0 = vrot.slane %v548_v45, 4  ;;  %v379_v2 = vrot.slane %v377_v4, 5  ;;  %v385_v3 = vrot.slane %v383_v49, 5  ;;  %v387_v50 = vshrl.u32 %v6388_v23, 16  ;;  %v6416_v34 = vld [vmem:[%s6174_s25 + $0x48] sm:$0xf] }
  0x3e   : > { %v372_v17 = vsel %vm6218_vm4, %v367_v54, %v371_v20  ;;  %v558_v22 = vor.u32 %v557_v55, %v553_v28  ;;  %v393_v18 = vshll.u32 %v6397_v48, 16  ;;  %v566_v27 = vshrl.u32 %v6402_v52, 16 }
  0x3f   : > { %v5011_v37 = vcombine.low %v362_v44, %v372_v17  ;;  %v554_v39 = vsel %vm6218_vm4, %v549_v0, %v553_v28  ;;  %v380_v42 = vor.u32 %v379_v2, %v376_v59  ;;  %v389_v45 = vrot.slane %v387_v50, 4  ;;  %v6425_v17 = vld [vmem:[%s6174_s25 + $0x4c] sm:$0xf]  ;;  %v6431_v2 = vld [vmem:[%s6174_s25 + $0x50] sm:$0x1] }
  0x40   : > { %v559_v4 = vrot.slane %v558_v22, 4  ;;  %v395_v49 = vrot.slane %v393_v18, 5  ;;  %v568_v20 = vrot.slane %v566_v27, 4  ;;  %v569_v54 = vshll.u32 %v6402_v52, 16 }
  0x41   : > { %5709 = vmatprep.mubr.msk.bf16.mxu0 %vm687_vm3, %v5011_v37  ;;  %v381_v55 = vrot.slane %v380_v42, 4  ;;  %v390_v62 = vor.u32 %v389_v45, %v385_v3  ;;  %v575_v32 = vshll.u32 %v6406_v13, 16  ;;  %v579_v44 = vshrl.u32 %v6406_v13, 16  ;;  %v6437_v42 = vld [vmem:[%s6174_s25 + $0xa8] sm:$0xf] }
  0x42   : > { %v564_v28 = vsel %vm6218_vm4, %v559_v4, %v563_v57  ;;  %v571_v59 = vrot.slane %v569_v54, 5  ;;  %v585_v0 = vshll.u32 %v6412_v26, 16  ;;  %v398_v50 = vshrl.u32 %v6416_v34, 16  ;;  %8844 = vst [vmem:[#allocation10_spill] sm:$0xff] %v6437_v42 }
  0x43   : > { %v5019_v22 = vcombine.low %v554_v39, %v564_v28  ;;  %v386_v18 = vsel %vm6218_vm4, %v381_v55, %v385_v3  ;;  %v391_v27 = vrot.slane %v390_v62, 4  ;;  %v577_v37 = vrot.slane %v575_v32, 5 }
  0x44   : > { %v572_v45 = vor.u32 %v571_v59, %v568_v20  ;;  %v581_v61 = vrot.slane %v579_v44, 4  ;;  %v587_v57 = vrot.slane %v585_v0, 5  ;;  %v400_v4 = vrot.slane %v398_v50, 4  ;;  %v6447_v44 = vld [vmem:[%s6174_s25 + $0xac] sm:$0xf] }
  0x45   : > { %5725 = vmatprep.mubr.msk.bf16.mxu1 %vm687_vm3, %v5019_v22  ;;  %v396_v54 = vsel %vm6218_vm4, %v391_v27, %v395_v49  ;;  %v401_v39 = vshll.u32 %v6416_v34, 16  ;;  %v407_v28 = vshll.u32 %v6425_v17, 16  ;;  %v411_v62 = vshrl.u32 %v6425_v17, 16  ;;  %8845 = vst [vmem:[#allocation11_spill] sm:$0xff] %v6447_v44  ;;  %v6450_v22 = vld [vmem:[%s6174_s25 + $0xb0] sm:$0x1] }
  0x46   : > { %v5012_v3 = vcombine.low %v386_v18, %v396_v54  ;;  %v573_v32 = vrot.slane %v572_v45, 4  ;;  %v582_v55 = vor.u32 %v581_v61, %v577_v37  ;;  %v417_v20 = vshll.u32 %v6431_v2, 16  ;;  %8846 = vst [vmem:[#allocation12_spill] sm:$0xff] %v6450_v22 }
  0x47   : > { %v403_v59 = vrot.slane %v401_v39, 5  ;;  %v409_v0 = vrot.slane %v407_v28, 5  ;;  %v413_v50 = vrot.slane %v411_v62, 4  ;;  %v590_v49 = vshrl.u32 %v6437_v42, 16  ;;  %v6459_v62 = vld [vmem:[%s6174_s25 + $0x54] sm:$0xf] }
  0x48   : > { %5710 = vmatmul.mubr.msk.bf16.gmra.mxu0 %vm687_vm3, %v5012_v3  ;;  %v578_v18 = vsel %vm6218_vm4, %v573_v32, %v577_v37  ;;  %v583_v27 = vrot.slane %v582_v55, 4  ;;  %v419_v61 = vrot.slane %v417_v20, 5  ;;  %v593_v45 = vshll.u32 %v6437_v42, 16  ;;  %v6466_v55 = vld [vmem:[%s6174_s25 + $0x58] sm:$0xf] }
  0x49   : > { %v404_v54 = vor.u32 %v403_v59, %v400_v4  ;;  %v414_v56 = vor.u32 %v413_v50, %v409_v0  ;;  %v592_v39 = vrot.slane %v590_v49, 4  ;;  %v599_v28 = vshll.u32 %v6447_v44, 16  ;;  %v6469_v49 = vld [vmem:[%s6174_s25 + $0x5c] sm:$0x1] }
  0x4a   : > { %v588_v3 = vsel %vm6218_vm4, %v583_v27, %v587_v57  ;;  %v595_v26 = vrot.slane %v593_v45, 5  ;;  %v603_v37 = vshrl.u32 %v6447_v44, 16  ;;  %v609_v32 = vshll.u32 %v6450_v22, 16  ;;  %v1193_v22 = vld [vmem:[%s6174_s25] sm:$0xe] }
  0x4b   : > { %v5020_v4 = vcombine.low %v578_v18, %v588_v3  ;;  %v405_v20 = vrot.slane %v404_v54, 4  ;;  %v415_v59 = vrot.slane %v414_v56, 4  ;;  %v601_v50 = vrot.slane %v599_v28, 5  ;;  %v6480_v54 = vld [vmem:[%s6174_s25 + $0xb4] sm:$0xf] }
  0x4c   : > { %v596_v42 = vor.u32 %v595_v26, %v592_v39  ;;  %v605_v52 = vrot.slane %v603_v37, 4  ;;  %v611_v13 = vrot.slane %v609_v32, 5  ;;  %v422_v57 = vshrl.u32 %v6459_v62, 16  ;;  %8847 = vst [vmem:[#allocation13_spill] sm:$0xff] %v6480_v54  ;;  %v6483_v37 = vld [vmem:[%s6174_s25 + $0xb8] sm:$0xf] }
  0x4d   : > { %5726 = vmatmul.mubr.msk.bf16.gmra.mxu1 %vm687_vm3, %v5020_v4  ;;  %v410_v27 = vsel %vm6218_vm4, %v405_v20, %v409_v0  ;;  %v420_v18 = vsel %vm6218_vm4, %v415_v59, %v419_v61  ;;  %v425_v56 = vshll.u32 %v6459_v62, 16  ;;  %v431_v45 = vshll.u32 %v6466_v55, 16  ;;  %v6488_v61 = vld [vmem:[%s6174_s25 + $0xbc] sm:$0x1] }
  0x4e   : > { %v5013_v26 = vcombine.low %v410_v27, %v420_v18  ;;  %v597_v39 = vrot.slane %v596_v42, 4  ;;  %v606_v28 = vor.u32 %v605_v52, %v601_v50  ;;  %v424_v3 = vrot.slane %v422_v57, 4 }
  0x4f   : > { %v427_v32 = vrot.slane %v425_v56, 5  ;;  %v433_v4 = vrot.slane %v431_v45, 5  ;;  %v435_v0 = vshrl.u32 %v6466_v55, 16  ;;  %v441_v20 = vshll.u32 %v6469_v49, 16 }
  0x50   : > { %5713 = vmatprep.mubr.msk.bf16.mxu0 %vm687_vm3, %v5013_v26  ;;  %v602_v59 = vsel %vm6218_vm4, %v597_v39, %v601_v50  ;;  %v607_v27 = vrot.slane %v606_v28, 4  ;;  %v614_v52 = vshrl.u32 %v6480_v54, 16  ;;  %v617_v42 = vshll.u32 %v6480_v54, 16 }
  0x51   : > { %v428_v57 = vor.u32 %v427_v32, %v424_v3  ;;  %v437_v18 = vrot.slane %v435_v0, 4  ;;  %v443_v56 = vrot.slane %v441_v20, 5  ;;  %v623_v45 = vshll.u32 %v6483_v37, 16 }
  0x52   : > { %v612_v44 = vsel %vm6218_vm4, %v607_v27, %v611_v13  ;;  %v616_v16 = vrot.slane %v614_v52, 4  ;;  %v619_v26 = vrot.slane %v617_v42, 5  ;;  %v627_v38 = vshrl.u32 %v6483_v37, 16 }
  0x53   : > { %v5021_v50 = vcombine.low %v602_v59, %v612_v44  ;;  %v429_v39 = vrot.slane %v428_v57, 4  ;;  %v438_v28 = vor.u32 %v437_v18, %v433_v4  ;;  %v625_v47 = vrot.slane %v623_v45, 5  ;;  %v1195_v57 = vld [vmem:[%s6174_s25 + $0x18] sm:$0xe] }
  0x54   : > { %v620_v54 = vor.u32 %v619_v26, %v616_v16  ;;  %v629_v3 = vrot.slane %v627_v38, 4  ;;  %v633_v32 = vshll.u32 %v6488_v61, 16  ;;  %v5071_v13 = vrot.slane %v1193_v22, 9 }
  0x55   : > { %5729 = vmatprep.mubr.msk.bf16.mxu1 %vm687_vm3, %v5021_v50  ;;  %v434_v44 = vsel %vm6218_vm4, %v429_v39, %v433_v4  ;;  %v439_v20 = vrot.slane %v438_v28, 4  ;;  %v1246_v59 = vrot.slane %v6183_v6, 5  ;;  %v5040_v38 = vcombine.low %v6211_v29, %v6214_v30 }
  0x56   : > { %v621_v16 = vrot.slane %v620_v54, 4  ;;  %v630_v27 = vor.u32 %v629_v3, %v625_v47  ;;  %v635_v52 = vrot.slane %v633_v32, 5  ;;  %v5072_v42 = vrot.slane %v1194_v51, 9 }
  0x57   : > { %v444_v18 = vsel %vm6218_vm4, %v439_v20, %v443_v56  ;;  %v1247_v22 = vsel %vm6504_vm7, %v5071_v13, %v1246_v59  ;;  %v1248_v45 = vrot.slane %v1246_v59, 4  ;;  %v8850_v4 = vrot.slane %v6214_v30, 5 }
  0x58   : > { %v5014_v50 = vcombine.low %v434_v44, %v444_v18  ;;  %v626_v54 = vsel %vm6218_vm4, %v621_v16, %v625_v47  ;;  %v631_v39 = vrot.slane %v630_v27, 4  ;;  %v5039_v51 = vcombine.low %v6180_v5, %v6183_v6  ;;  %v1196_v27 = vld [vmem:[%s6174_s25 + $0x24] sm:$0xe] }
  0x59   : > { %v1255_v26 = vrot.slane %v8850_v4, 4  ;;  %v8851_v28 = vrot.slane %v6186_v7, 5  ;;  %v8852_v3 = vmov %v8850_v4  ;;  %v5041_v13 = vcombine.low %v6253_v8, %v6260_v21  ;;  %v1198_v4 = vld [vmem:[%s6174_s25 + $0x3c] sm:$0xe] }
  0x5a   : > { %v1254_v32 = vsel %vm6504_vm7, %v5072_v42, %v8852_v3  ;;  %v5073_v44 = vrot.slane %v1195_v57, 9  ;;  %5714 = vmatmul.mubr.msk.bf16.gmra.mxu0 %vm687_vm3, %v5014_v50  ;;  %v636_v47 = vsel %vm6218_vm4, %v631_v39, %v635_v52  ;;  %v8853_v6 = vrot.slane %v6224_v41, 5  ;;  %v1197_v42 = vld [vmem:[%s6174_s25 + $0x30] sm:$0xe]  ;;  %v1199_v39 = vld [vmem:[%s6174_s25 + $0x48] sm:$0xe] }
  0x5b   : > { %v1250_v56 = vsel %vm6504_vm7, %v1248_v45, %v8851_v28  ;;  %v1260_v20 = vrot.slane %v6260_v21, 5  ;;  %v5022_v59 = vcombine.low %v626_v54, %v636_v47  ;;  %v1263_v16 = vrot.slane %v6266_v25, 5  ;;  %v1200_v47 = vld [vmem:[%s6174_s25 + $0x54] sm:$0xe]  ;;  %v6799_v21 = vld [vmem:[%s6174_s25 + $0x2c] sm:$0x1] }
  0x5c   : > { %v5088_v5 = vcombine.low %v1247_v22, %v1250_v56  ;;  %v1257_v7 = vsel %vm6504_vm7, %v1255_v26, %v8853_v6  ;;  %v1817_v52 = vsel %vm736_vm0, %v6311_v19, 0  ;;  %v1267_v18 = vrot.slane %v6305_v10, 5 }
  0x5d   : > { %v1261_v41 = vsel %vm6504_vm7, %v5073_v44, %v1260_v20  ;;  %v1262_v57 = vrot.slane %v1260_v20, 4  ;;  %5730 = vmatmul.mubr.msk.bf16.gmra.mxu1 %vm687_vm3, %v5022_v59  ;;  %v5089_v22 = vcombine.low %v1254_v32, %v1257_v7  ;;  %v2543_v25 = vsel %vm736_vm0, %v6279_v40, 0 }
  0x5e   : > { %5769 = vmatprep.mubr.msk.bf16.mxu0 %vm687_vm3, %v5088_v5  ;;  %v1274_v45 = vrot.slane %v6351_v9, 5  ;;  %5735 = vmatprep.mubr.msk.bf16.mxu1 %vm687_vm3, %v5039_v51  ;;  %v5074_v26 = vrot.slane %v1196_v27, 9  ;;  %v1270_v50 = vrot.slane %v6316_v24, 5  ;;  %v5075_v54 = vrot.slane %v1197_v42, 9  ;;  %v6571_v24 = vld [vmem:[%s8798_s1 + $0xc] sm:$0x3] }
  0x5f   : > { %v1264_v19 = vsel %vm6504_vm7, %v1262_v57, %v1263_v16  ;;  %v1269_v56 = vrot.slane %v1267_v18, 4  ;;  %v1277_v32 = vrot.slane %v6359_v33, 5  ;;  %v5076_v44 = vrot.slane %v1198_v4, 9 }
  0x60   : > { %v5090_v28 = vcombine.low %v1261_v41, %v1264_v19  ;;  %v1276_v3 = vrot.slane %v1274_v45, 4  ;;  %v1281_v40 = vrot.slane %v6388_v23, 5  ;;  %v1305_v5 = vrot.slane %v6200_v15, 5 }
  0x61   : > { %v1284_v51 = vrot.slane %v6397_v48, 5  ;;  %v5077_v6 = vrot.slane %v1199_v39, 9  ;;  %v1288_v7 = vrot.slane %v6425_v17, 5  ;;  %v5042_v33 = vcombine.low %v6297_v1, %v6305_v10  ;;  %v1201_v1 = vld [vmem:[%s6174_s25 + $0x60] sm:$0xe] }
  0x62   : > { %5770 = vmatmul.mubr.msk.bf16.vlgmr.msra.gmra.mxu0 %vm687_vm3, %v5089_v22  ;;  %v1268_v20 = vsel %vm6504_vm7, %v5074_v26, %v1267_v18  ;;  %v1283_v59 = vrot.slane %v1281_v40, 4  ;;  %v1291_v16 = vrot.slane %v6431_v2, 5  ;;  %v1271_v48 = vsel %vm6504_vm7, %v1269_v56, %v1270_v50  ;;  %v6599_v22 = vld [vmem:[%s8798_s1 + $0xa] sm:$0x3]  ;;  %v6624_v50 = vld [vmem:[%s6174_s25 + $0x6c] sm:$0xe] }
  0x63   : > { %5836 = vmatpush3.bf16.msra.mxu0 %v2543_v25  ;;  %5773 = vmatprep.mubr.msk.bf16.mxu0 %vm687_vm3, %v5090_v28  ;;  %v1275_v27 = vsel %vm6504_vm7, %v5075_v54, %v1274_v45  ;;  %v1278_v42 = vsel %vm6504_vm7, %v1276_v3, %v1277_v32  ;;  %v1290_v41 = vrot.slane %v1288_v7, 4  ;;  %v6589_v10 = vsel %vm6504_vm7, %v5076_v44, %v1281_v40  ;;  %v1204_v39 = vld [vmem:[%s6174_s25 + $0x84] sm:$0xe]  ;;  %v6653_v44 = vld [vmem:[%s6174_s25 + $0x78] sm:$0xe] }
  0x64   : > { %v6593_v2 = vsel %vm6504_vm7, %v5077_v6, %v1288_v7  ;;  %v5078_v57 = vrot.slane %v1200_v47, 9  ;;  %v1295_v18 = vrot.slane %v6466_v55, 5  ;;  %6014 = vmatprep.subr.msk.bf16.mxu0 %vm736_vm0, %v6571_v24  ;;  %v6609_v25 = vsel %vm6504_vm7, %v1283_v59, %v1284_v51  ;;  %v1205_v40 = vld [vmem:[%s6174_s25 + $0x90] sm:$0xe] }
  0x65   : > { %5736 = vmatmul.mubr.msk.bf16.vlgmr.msra.gmra.mxu1 %vm687_vm3, %v5040_v38  ;;  %v6613_v45 = vsel %vm6504_vm7, %v1290_v41, %v1291_v16  ;;  %v1298_v4 = vrot.slane %v6469_v49, 5  ;;  %v1302_v19 = vrot.slane %v6197_v14, 5  ;;  %v5091_v29 = vcombine.low %v1268_v20, %v1271_v48  ;;  %v8854_v48 = vld [vmem:[#allocation3_spill] sm:$0xff] }
  0x66   : > { %5802 = vmatpush3.bf16.msra.mxu1 %v1817_v52  ;;  %5739 = vmatprep.mubr.msk.bf16.mxu1 %vm687_vm3, %v5041_v13  ;;  %v5043_v30 = vcombine.low %v6346_v60, %v6351_v9  ;;  %v1297_v38 = vrot.slane %v1295_v18, 4  ;;  %v5079_v26 = vrot.slane %v1201_v1, 9  ;;  %v5092_v49 = vcombine.low %v1275_v27, %v1278_v42  ;;  %v1206_v42 = vld [vmem:[%s6174_s25 + $0x9c] sm:$0xe] }
  0x67   : > { %v5044_v52 = vcombine.low %v6383_v11, %v6388_v23  ;;  %v5045_v8 = vcombine.low %v6416_v34, %v6425_v17  ;;  %6013 = vmatprep.subr.msk.bf16.mxu1 %vm736_vm0, %v6599_v22  ;;  %v5093_v60 = vcombine.low %v6589_v10, %v6609_v25  ;;  %v5094_v9 = vcombine.low %v6593_v2, %v6613_v45  ;;  %v8855_v10 = vld [vmem:[#allocation5_spill] sm:$0xff]  ;;  %v8856_v2 = vld [vmem:[#allocation4_spill] sm:$0xff] }
  0x68   : > { %v1304_v54 = vrot.slane %v1302_v19, 4  ;;  %v6643_v28 = vsel %vm6504_vm7, %v5078_v57, %v1295_v18  ;;  %v6647_v56 = vsel %vm6504_vm7, %v1297_v38, %v1298_v4  ;;  %v5080_v32 = vrot.slane %v6624_v50, 9  ;;  %v1207_v18 = vld [vmem:[%s6174_s25 + $0xa8] sm:$0xe]  ;;  %v8858_v38 = vld [vmem:[#allocation8_spill] sm:$0xff] }
  0x69   : > { %v6659_v47 = vsel %vm6504_vm7, %v5079_v26, %v1302_v19  ;;  %v1309_v51 = vrot.slane %v6239_v58, 5  ;;  %v1312_v6 = vrot.slane %v6247_v63, 5  ;;  %v5082_v59 = vrot.slane %v1204_v39, 9  ;;  %v8857_v19 = vld [vmem:[#allocation6_spill] sm:$0xff]  ;;  %v8859_v26 = vld [vmem:[#allocation7_spill] sm:$0xff] }
  0x6a   : > { %5774 = vmatmul.mubr.msk.bf16.gmra.mxu0 %vm687_vm3, %v5091_v29  ;;  %v1323_v16 = vrot.slane %v6330_v43, 5  ;;  %v1326_v27 = vrot.slane %v8854_v48, 5  ;;  %v5095_v41 = vcombine.low %v6643_v28, %v6647_v56  ;;  %v6677_v63 = vsel %vm6504_vm7, %v1304_v54, %v1305_v5  ;;  %v8861_v48 = vld [vmem:[#allocation11_spill] sm:$0xff] }
  0x6b   : > { %5777 = vmatprep.mubr.msk.bf16.mxu0 %vm687_vm3, %v5092_v49  ;;  %v5081_v1 = vrot.slane %v6653_v44, 9  ;;  %v5083_v4 = vrot.slane %v1205_v40, 9  ;;  %v1330_v15 = vrot.slane %v8855_v10, 5  ;;  %v1311_v5 = vrot.slane %v1309_v51, 4  ;;  %v5185_v57 = vld [vmem:[%s6174_s25 + $0xc] sm:$0xf] }
  0x6c   : > { %v6686_v25 = vsel %vm6504_vm7, %v5082_v59, %v1323_v16  ;;  %v1325_v45 = vrot.slane %v1323_v16, 4  ;;  %v1333_v29 = vrot.slane %v8857_v19, 5  ;;  %v5084_v49 = vrot.slane %v1206_v42, 9  ;;  %v8860_v59 = vld [vmem:[#allocation9_spill] sm:$0xff]  ;;  %v8862_v42 = vld [vmem:[#allocation10_spill] sm:$0xff] }
  0x6d   : > { %5740 = vmatmul.mubr.msk.bf16.gmra.mxu1 %vm687_vm3, %v5042_v33  ;;  %v1316_v33 = vrot.slane %v6284_v46, 5  ;;  %v6700_v39 = vsel %vm6504_vm7, %v5083_v4, %v1330_v15  ;;  %v1332_v44 = vrot.slane %v1330_v15, 4  ;;  %v1337_v40 = vrot.slane %v8858_v38, 5  ;;  %v8863_v15 = vld [vmem:[#allocation12_spill] sm:$0xff] }
  0x6e   : > { %5743 = vmatprep.mubr.msk.bf16.mxu1 %vm687_vm3, %v5043_v30  ;;  %v6696_v54 = vsel %vm6504_vm7, %v1325_v45, %v1326_v27  ;;  %v1340_v16 = vrot.slane %v8860_v59, 5  ;;  %v5085_v45 = vrot.slane %v1207_v18, 9  ;;  %v1344_v4 = vrot.slane %v8861_v48, 5 }
  0x6f   : > { %v6710_v27 = vsel %vm6504_vm7, %v1332_v44, %v1333_v29  ;;  %v1347_v50 = vrot.slane %v8863_v15, 5  ;;  %v6720_v19 = vsel %vm6504_vm7, %v5084_v49, %v1337_v40  ;;  %v1339_v7 = vrot.slane %v1337_v40, 4  ;;  %v8864_v29 = vld [vmem:[#allocation13_spill] sm:$0xff]  ;;  %v8865_v15 = vld [vmem:[#allocation2_spill] sm:$0xff]  ;;  %v6735_v49 = vld [vmem:[%s6174_s25 + $0x10] sm:$0xf] }
  0x70   : > { %v6727_v18 = vsel %vm6504_vm7, %v5080_v32, %v1309_v51  ;;  %v6732_v59 = vsel %vm6504_vm7, %v5085_v45, %v1344_v4  ;;  %v1346_v30 = vrot.slane %v1344_v4, 4  ;;  %v5188_v40 = vld [vmem:[%s6174_s25 + $0x18] sm:$0xf]  ;;  %v1318_v20 = vrot.slane %v1316_v33, 4 }
  0x71   : > { %v2061_v44 = vshrl.u32 %v5185_v57, 16  ;;  %v2064_v32 = vshll.u32 %v5185_v57, 16  ;;  %v5096_v51 = vcombine.low %v6659_v47, %v6677_v63  ;;  %v6750_v45 = vsel %vm6504_vm7, %v1311_v5, %v1312_v6  ;;  %v1208_v57 = vld [vmem:[%s6174_s25 + $0xb4] sm:$0xe]  ;;  %v6771_v47 = vld [vmem:[%s6174_s25 + $0x14] sm:$0x1] }
  0x72   : > { %5778 = vmatmul.mubr.msk.bf16.gmra.mxu0 %vm687_vm3, %v5093_v60  ;;  %v1319_v60 = vrot.slane %v8865_v15, 5  ;;  %v6765_v11 = vsel %vm6504_vm7, %v5081_v1, %v1316_v33  ;;  %v2070_v6 = vshll.u32 %v6735_v49, 16  ;;  %v5189_v63 = vld [vmem:[%s6174_s25 + $0x1c] sm:$0xf]  ;;  %v2074_v17 = vshrl.u32 %v6735_v49, 16 }
  0x73   : > { %5781 = vmatprep.mubr.msk.bf16.mxu0 %vm687_vm3, %v5094_v9  ;;  %v6740_v9 = vsel %vm6504_vm7, %v1339_v7, %v1340_v16  ;;  %v6756_v7 = vsel %vm6504_vm7, %v1346_v30, %v1347_v50  ;;  %v2063_v5 = vrot.slane %v2061_v44, 4  ;;  %v2066_v34 = vrot.slane %v2064_v32, 5  ;;  %v5191_v15 = vld [vmem:[%s6174_s25 + $0x24] sm:$0xf]  ;;  %v6784_v44 = vld [vmem:[%s6174_s25 + $0x28] sm:$0xf] }
  0x74   : > { %v2085_v50 = vshrl.u32 %v5188_v40, 16  ;;  %v1320_v1 = vsel %vm6504_vm7, %v1318_v20, %v1319_v60  ;;  %v5086_v33 = vrot.slane %v1208_v57, 9  ;;  %v6779_v30 = vrot.slane %v2070_v6, 5 }
  0x75   : > { %5744 = vmatmul.mubr.msk.bf16.gmra.mxu1 %vm687_vm3, %v5044_v52  ;;  %v1351_v52 = vrot.slane %v6483_v37, 5  ;;  %v2088_v16 = vshll.u32 %v5188_v40, 16  ;;  %v1354_v23 = vrot.slane %v6488_v61, 5  ;;  %v2076_v4 = vrot.slane %v2074_v17, 4 }
  0x76   : > { %5747 = vmatprep.mubr.msk.bf16.mxu1 %vm687_vm3, %v5045_v8  ;;  %v5190_v8 = vld [vmem:[%s6174_s25 + $0x20] sm:$0x1]  ;;  %v2087_v3 = vrot.slane %v2085_v50, 4  ;;  %v2094_v13 = vshll.u32 %v5189_v63, 16  ;;  %v2080_v20 = vshll.u32 %v6771_v47, 16  ;;  %v2098_v57 = vshrl.u32 %v5189_v63, 16 }
  0x77   : > { %v1353_v32 = vrot.slane %v1351_v52, 4  ;;  %v2090_v60 = vrot.slane %v2088_v16, 5  ;;  %v5097_v61 = vcombine.low %v6727_v18, %v6750_v45  ;;  %v5098_v40 = vcombine.low %v6765_v11, %v1320_v1 }
  0x78   : > { %v2067_v6 = vor.u32 %v2066_v34, %v2063_v5  ;;  %v6795_v17 = vrot.slane %v2094_v13, 5  ;;  %v2077_v28 = vor.u32 %v2076_v4, %v6779_v30  ;;  %v2104_v50 = vshll.u32 %v5190_v8, 16  ;;  %v6822_v5 = vld [vmem:[%s6174_s25 + $0x34] sm:$0xf] }
  0x79   : > { %v2091_v56 = vor.u32 %v2090_v60, %v2087_v3  ;;  %v6807_v18 = vsel %vm6504_vm7, %v5086_v33, %v1351_v52  ;;  %v2109_v13 = vshrl.u32 %v5191_v15, 16  ;;  %v2112_v45 = vshll.u32 %v5191_v15, 16  ;;  %v5194_v52 = vld [vmem:[%s6174_s25 + $0x30] sm:$0xf] }
  0x7a   : > { %5782 = vmatmul.mubr.msk.bf16.gmra.mxu0 %vm687_vm3, %v5095_v41  ;;  %v2100_v41 = vrot.slane %v2098_v57, 4  ;;  %v2118_v11 = vshll.u32 %v6784_v44, 16  ;;  %v8867_v3 = vcombine.low %v6193_v12, %v6197_v14  ;;  %v6816_v4 = vsel %vm6504_vm7, %v1353_v32, %v1354_v23 }
  0x7b   : > { %5785 = vmatprep.mubr.msk.bf16.mxu0 %vm687_vm3, %v5096_v51  ;;  %v8866_v51 = vcombine.low %v6459_v62, %v6466_v55  ;;  %v2082_v62 = vrot.slane %v2080_v20, 5  ;;  %v2122_v63 = vshrl.u32 %v6784_v44, 16  ;;  %v2068_v34 = vrot.slane %v2067_v6, 4 }
  0x7c   : > { %v2101_v55 = vor.u32 %v2100_v41, %v6795_v17  ;;  %v2111_v8 = vrot.slane %v2109_v13, 4  ;;  %v2114_v1 = vrot.slane %v2112_v45, 5  ;;  %v6824_v33 = vrot.slane %v2118_v11, 5  ;;  %v6830_v41 = vld [vmem:[%s6174_s25 + $0x38] sm:$0x1] }
  0x7d   : > { %5748 = vmatmul.mubr.msk.bf16.gmra.mxu1 %vm687_vm3, %v8866_v51  ;;  %v2078_v12 = vrot.slane %v2077_v28, 4  ;;  %v2092_v14 = vrot.slane %v2091_v56, 4  ;;  %v2106_v16 = vrot.slane %v2104_v50, 5  ;;  %v2124_v23 = vrot.slane %v2122_v63, 4  ;;  %v5197_v13 = vld [vmem:[%s6174_s25 + $0x3c] sm:$0xf] }
  0x7e   : > { %5751 = vmatprep.mubr.msk.bf16.mxu1 %vm687_vm3, %v8867_v3  ;;  %v2102_v15 = vrot.slane %v2101_v55, 4  ;;  %v2128_v32 = vshll.u32 %v6799_v21, 16  ;;  %v2133_v20 = vshrl.u32 %v5194_v52, 16  ;;  %v2136_v60 = vshll.u32 %v5194_v52, 16 }
  0x7f   : > { %v2115_v57 = vor.u32 %v2114_v1, %v2111_v8  ;;  %v2125_v6 = vor.u32 %v2124_v23, %v6824_v33  ;;  %v2142_v28 = vshll.u32 %v6822_v5, 16  ;;  %v2146_v56 = vshrl.u32 %v6822_v5, 16  ;;  %v5200_v8 = vld [vmem:[%s6174_s25 + $0x48] sm:$0xf]  ;;  %v6857_v1 = vld [vmem:[%s6174_s25 + $0x4c] sm:$0xf] }
  0x80   : > { %v2135_v50 = vrot.slane %v2133_v20, 4  ;;  %v2138_v51 = vrot.slane %v2136_v60, 5  ;;  %v8868_v3 = vcombine.low %v6235_v53, %v6239_v58  ;;  %v5103_v55 = vcombine.low %v6807_v18, %v6816_v4 }
  0x81   : > { %v6836_v45 = vrot.slane %v2142_v28, 5  ;;  %v2148_v11 = vrot.slane %v2146_v56, 4  ;;  %v2083_v63 = vsel %vm6218_vm4, %v2078_v12, %v2082_v62  ;;  %v2097_v52 = vsel %vm6218_vm4, %v2092_v14, %v6795_v17 }
  0x82   : > { %5786 = vmatmul.mubr.msk.bf16.gmra.mxu0 %vm687_vm3, %v5097_v61  ;;  %v6839_v61 = vld [vmem:[%s6174_s25 + $0x40] sm:$0xf]  ;;  %v8869_v53 = vcombine.low %v6273_v35, %v6284_v46  ;;  %v2107_v58 = vsel %vm6218_vm4, %v2102_v15, %v2106_v16  ;;  %v2116_v23 = vrot.slane %v2115_v57, 4  ;;  %v2139_v20 = vor.u32 %v2138_v51, %v2135_v50  ;;  %v6891_v50 = vld [vmem:[%s6174_s25 + $0x44] sm:$0x1] }
  0x83   : > { %5789 = vmatprep.mubr.msk.bf16.mxu0 %vm687_vm3, %v5098_v40  ;;  %v2073_v40 = vsel %vm6218_vm4, %v2068_v34, %v6779_v30  ;;  %v2126_v30 = vrot.slane %v2125_v6, 4  ;;  %v2130_v34 = vrot.slane %v2128_v32, 5  ;;  %v2152_v62 = vshll.u32 %v6830_v41, 16  ;;  %v5203_v51 = vld [vmem:[%s6174_s25 + $0x54] sm:$0xf] }
  0x84   : > { %v2157_v12 = vshrl.u32 %v5197_v13, 16  ;;  %v2160_v17 = vshll.u32 %v5197_v13, 16  ;;  %v6868_v14 = vsel %vm736_vm0, %v6599_v22, 0  ;;  %v2149_v35 = vor.u32 %v2148_v11, %v6836_v45 }
  0x85   : > { %5752 = vmatmul.mubr.msk.bf16.gmra.mxu1 %vm687_vm3, %v8868_v3  ;;  %v2166_v46 = vshll.u32 %v6839_v61, 16  ;;  %v2170_v16 = vshrl.u32 %v6839_v61, 16  ;;  %v6873_v15 = vcombine.low %v2073_v40, %v2083_v63  ;;  %v6877_v32 = vsel %vm736_vm0, %v6571_v24, 0  ;;  %v6900_v40 = vld [vmem:[%s6174_s25 + $0x58] sm:$0xf] }
  0x86   : > { %5755 = vmatprep.mubr.msk.bf16.mxu1 %vm687_vm3, %v8869_v53  ;;  %v2181_v60 = vshrl.u32 %v5200_v8, 16  ;;  %v2184_v57 = vshll.u32 %v5200_v8, 16  ;;  %v8870_v6 = vcombine.low %v6686_v25, %v6696_v54  ;;  %v6883_v22 = vcombine.low %v2097_v52, %v2107_v58  ;;  %v6905_v8 = vld [vmem:[%s6174_s25 + $0x50] sm:$0x1] }
  0x87   : > { %v2121_v28 = vsel %vm6218_vm4, %v2116_v23, %v6824_v33  ;;  %v2131_v56 = vsel %vm6218_vm4, %v2126_v30, %v2130_v34  ;;  %v2190_v24 = vshll.u32 %v6857_v1, 16  ;;  %v8871_v25 = vcombine.low %v6700_v39, %v6710_v27  ;;  %v5206_v34 = vld [vmem:[%s6174_s25 + $0x60] sm:$0xf] }
  0x88   : > { %v2140_v54 = vrot.slane %v2139_v20, 4  ;;  %v2154_v13 = vrot.slane %v2152_v62, 5  ;;  %v2159_v11 = vrot.slane %v2157_v12, 4  ;;  %v2162_v3 = vrot.slane %v2160_v17, 5 }
  0x89   : > { %v2150_v33 = vrot.slane %v2149_v35, 4  ;;  %v6902_v63 = vrot.slane %v2166_v46, 5  ;;  %v2172_v52 = vrot.slane %v2170_v16, 4  ;;  %v2194_v53 = vshrl.u32 %v6857_v1, 16  ;;  %v6922_v35 = vld [vmem:[%s6174_s25 + $0x5c] sm:$0x1] }
  0x8a   : > { %5790 = vmatmul.mubr.msk.bf16.gmra.mxu0 %vm687_vm3, %v8870_v6  ;;  %v8872_v39 = vcombine.low %v6323_v36, %v6330_v43  ;;  %v2183_v27 = vrot.slane %v2181_v60, 4  ;;  %v2186_v58 = vrot.slane %v2184_v57, 5  ;;  %v2205_v23 = vshrl.u32 %v5203_v51, 16 }
  0x8b   : > { %5793 = vmatprep.mubr.msk.bf16.mxu0 %vm687_vm3, %v8871_v25  ;;  %v2208_v30 = vshll.u32 %v5203_v51, 16  ;;  %v8873_v20 = vcombine.low %v8856_v2, %v8855_v10  ;;  %v6917_v62 = vcombine.low %v2121_v28, %v2131_v56  ;;  %v6919_v12 = vrot.slane %v2190_v24, 5  ;;  %v6935_v28 = vld [vmem:[%s6174_s25 + $0x64] sm:$0xf] }
  0x8c   : > { %v2196_v17 = vrot.slane %v2194_v53, 4  ;;  %v2214_v36 = vshll.u32 %v6900_v40, 16  ;;  %v2176_v43 = vshll.u32 %v6891_v50, 16  ;;  %v2207_v46 = vrot.slane %v2205_v23, 4 }
  0x8d   : > { %5756 = vmatmul.mubr.msk.bf16.gmra.mxu1 %vm687_vm3, %v8872_v39  ;;  %v2210_v16 = vrot.slane %v2208_v30, 5  ;;  %v2218_v60 = vshrl.u32 %v6900_v40, 16  ;;  %v2145_v10 = vsel %vm6218_vm4, %v2140_v54, %v6836_v45  ;;  %v2155_v2 = vsel %vm6218_vm4, %v2150_v33, %v2154_v13  ;;  %v6957_v30 = vld [vmem:[%s6174_s25 + $0x68] sm:$0x1] }
  0x8e   : > { %5759 = vmatprep.mubr.msk.bf16.mxu1 %vm687_vm3, %v8873_v20  ;;  %v2163_v57 = vor.u32 %v2162_v3, %v2159_v11  ;;  %v6932_v6 = vrot.slane %v2214_v36, 5  ;;  %v2173_v56 = vor.u32 %v2172_v52, %v6902_v63  ;;  %v2187_v24 = vor.u32 %v2186_v58, %v2183_v27  ;;  %v5209_v3 = vld [vmem:[%s6174_s25 + $0x6c] sm:$0xf]  ;;  %v6954_v27 = vld [vmem:[%s6174_s25 + $0x70] sm:$0xf] }
  0x8f   : > { %v2200_v51 = vshll.u32 %v6905_v8, 16  ;;  %v2220_v25 = vrot.slane %v2218_v60, 4  ;;  %v8874_v53 = vcombine.low %v6720_v19, %v6740_v9  ;;  %v2197_v45 = vor.u32 %v2196_v17, %v6919_v12 }
  0x90   : > { %v2211_v54 = vor.u32 %v2210_v16, %v2207_v46  ;;  %v2229_v13 = vshrl.u32 %v5206_v34, 16  ;;  %v2232_v11 = vshll.u32 %v5206_v34, 16  ;;  %v8875_v33 = vcombine.low %v6732_v59, %v6756_v7  ;;  %v5212_v16 = vld [vmem:[%s6174_s25 + $0x78] sm:$0xf] }
  0x91   : > { %v2221_v52 = vor.u32 %v2220_v25, %v6932_v6  ;;  %v2224_v39 = vshll.u32 %v6922_v35, 16  ;;  %v2238_v19 = vshll.u32 %v6935_v28, 16  ;;  %v2242_v9 = vshrl.u32 %v6935_v28, 16 }
  0x92   : > { %5794 = vmatmul.mubr.msk.bf16.gmra.mxu0 %vm687_vm3, %v8874_v53  ;;  %v2164_v58 = vrot.slane %v2163_v57, 4  ;;  %v2178_v23 = vrot.slane %v2176_v43, 5  ;;  %v2231_v34 = vrot.slane %v2229_v13, 4  ;;  %v2234_v20 = vrot.slane %v2232_v11, 5 }
  0x93   : > { %5797 = vmatprep.mubr.msk.bf16.mxu0 %vm687_vm3, %v8875_v33  ;;  %v8876_v59 = vcombine.low %v8859_v26, %v8858_v38  ;;  %v6963_v7 = vcombine.low %v2145_v10, %v2155_v2  ;;  %v2174_v17 = vrot.slane %v2173_v56, 4  ;;  %v2188_v36 = vrot.slane %v2187_v24, 4  ;;  %v6973_v2 = vld [vmem:[%s6174_s25 + $0x7c] sm:$0xf] }
  0x94   : > { %v6965_v46 = vrot.slane %v2238_v19, 5  ;;  %v8877_v43 = vcombine.low %v8862_v42, %v8861_v48  ;;  %v2198_v60 = vrot.slane %v2197_v45, 4  ;;  %v2202_v57 = vrot.slane %v2200_v51, 5  ;;  %8878 = vst [vmem:[#allocation3_spill] sm:$0xff] %v6973_v2  ;;  %v5215_v19 = vld [vmem:[%s6174_s25 + $0x84] sm:$0xf] }
  0x95   : > { %5760 = vmatmul.mubr.msk.bf16.gmra.mxu1 %vm687_vm3, %v8876_v59  ;;  %v2212_v25 = vrot.slane %v2211_v54, 4  ;;  %v2244_v38 = vrot.slane %v2242_v9, 4  ;;  %v2222_v26 = vrot.slane %v2221_v52, 4  ;;  %v2226_v53 = vrot.slane %v2224_v39, 5 }
  0x96   : > { %5763 = vmatprep.mubr.msk.bf16.mxu1 %vm687_vm3, %v8877_v43  ;;  %v2235_v13 = vor.u32 %v2234_v20, %v2231_v34  ;;  %v2253_v10 = vshrl.u32 %v5209_v3, 16  ;;  %v2169_v56 = vsel %vm6218_vm4, %v2164_v58, %v6902_v63  ;;  %v2256_v24 = vshll.u32 %v5209_v3, 16  ;;  %v6058_v63 = vld [vmem:[%s6174_s25 + $0xc] sm:$0xff]   ;;  %v7007_v34 = vld [vmem:[%s6174_s25 + $0x88] sm:$0xf] }
  0x97   : > { %v2262_v48 = vshll.u32 %v6954_v27, 16  ;;  %v2266_v42 = vshrl.u32 %v6954_v27, 16  ;;  %v2179_v51 = vsel %vm6218_vm4, %v2174_v17, %v2178_v23  ;;  %v2193_v45 = vsel %vm6218_vm4, %v2188_v36, %v6919_v12  ;;  %8879 = vst [vmem:[#allocation5_spill] sm:$0xff] %v7007_v34  ;;  %v7016_v36 = vld [vmem:[%s6174_s25 + $0x74] sm:$0x1] }
  0x98   : > { %v2245_v54 = vor.u32 %v2244_v38, %v6965_v46  ;;  %v2248_v11 = vshll.u32 %v6957_v30, 16  ;;  %v2203_v3 = vsel %vm6218_vm4, %v2198_v60, %v2202_v57  ;;  %v2217_v33 = vsel %vm6218_vm4, %v2212_v25, %v6932_v6  ;;  %8881 = vst [vmem:[#allocation4_spill] sm:$0xff] %v7016_v36  ;;  %v7026_v38 = vld [vmem:[%s6174_s25 + $0x80] sm:$0x1] }
  0x99   : > { %v2277_v52 = vshrl.u32 %v5212_v16, 16  ;;  %v2280_v12 = vshll.u32 %v5212_v16, 16  ;;  %v2227_v18 = vsel %vm6218_vm4, %v2222_v26, %v2226_v53  ;;  %v2236_v4 = vrot.slane %v2235_v13, 4  ;;  %8882 = vst [vmem:[#allocation6_spill] sm:$0xff] %v7026_v38  ;;  %v7029_v26 = vld [vmem:[%s6174_s25 + $0x8c] sm:$0x1] }
  0x9a   : > { %5798 = vmatmul.mubr.msk.bf16.gmra.mxu0 %vm687_vm3, %v5103_v55  ;;  %v2255_v55 = vrot.slane %v2253_v10, 4  ;;  %v2286_v39 = vshll.u32 %v6973_v2, 16  ;;  %v2258_v9 = vrot.slane %v2256_v24, 5  ;;  %v7003_v58 = vrot.slane %v2262_v48, 5  ;;  %8883 = vst [vmem:[#allocation8_spill] sm:$0xff] %v7029_v26  ;;  %v6059_v10 = vld [vmem:[%s6174_s25 + $0x18] sm:$0xff]  }
  0x9b   : > { %5837 = vmatprep.mubr.msk.bf16.mxu0 %vm687_vm3, %v6873_v15  ;;  %v2268_v23 = vrot.slane %v2266_v42, 4  ;;  %v2290_v6 = vshrl.u32 %v6973_v2, 16  ;;  %v8880_v15 = vcombine.low %v8864_v29, %v6483_v37  ;;  %v7013_v20 = vcombine.low %v2169_v56, %v2179_v51  ;;  %v5218_v51 = vld [vmem:[%s6174_s25 + $0x90] sm:$0xf] }
  0x9c   : > { %v2246_v59 = vrot.slane %v2245_v54, 4  ;;  %v2250_v17 = vrot.slane %v2248_v11, 5  ;;  %v2279_v16 = vrot.slane %v2277_v52, 4  ;;  %v2282_v43 = vrot.slane %v2280_v12, 5 }
  0x9d   : > { %5764 = vmatmul.mubr.msk.bf16.gmra.mxu1 %vm687_vm3, %v8880_v15  ;;  %v7019_v60 = vrot.slane %v2286_v39, 5  ;;  %v2292_v57 = vrot.slane %v2290_v6, 4  ;;  %v2301_v25 = vshrl.u32 %v5215_v19, 16  ;;  %v7021_v37 = vcombine.low %v2193_v45, %v2203_v3  ;;  %v7040_v45 = vld [vmem:[%s6174_s25 + $0x94] sm:$0xf] }
  0x9e   : > { %5803 = vmatprep.mubr.msk.bf16.mxu1 %vm687_vm3, %v6058_v63  ;;  %v7023_v29 = vcombine.low %v2217_v33, %v2227_v18  ;;  %v2304_v53 = vshll.u32 %v5215_v19, 16  ;;  %v2310_v13 = vshll.u32 %v7007_v34, 16  ;;  %v2241_v56 = vsel %vm6218_vm4, %v2236_v4, %v6965_v46  ;;  %8884 = vst [vmem:[#allocation7_spill] sm:$0xff] %v7040_v45  ;;  %v7048_v33 = vld [vmem:[%s8798_s1 + $0x10] sm:$0x3]  ;;  %v6060_v46 = vld [vmem:[%s6174_s25 + $0x24] sm:$0xff]  }
  0x9f   : > { %v2259_v24 = vor.u32 %v2258_v9, %v2255_v55  ;;  %v2269_v48 = vor.u32 %v2268_v23, %v7003_v58  ;;  %v2272_v42 = vshll.u32 %v7016_v36, 16  ;;  %v2303_v54 = vrot.slane %v2301_v25, 4  ;;  %8885 = vst [vmem:[#allocation9_spill] sm:$0xff] %v7048_v33 }
  0xa0   : > { %v2306_v11 = vrot.slane %v2304_v53, 5  ;;  %v7042_v63 = vrot.slane %v2310_v13, 5  ;;  %v2314_v3 = vshrl.u32 %v7007_v34, 16  ;;  %v2251_v52 = vsel %vm6218_vm4, %v2246_v59, %v2250_v17 }
  0xa1   : > { %v2283_v12 = vor.u32 %v2282_v43, %v2279_v16  ;;  %v2293_v18 = vor.u32 %v2292_v57, %v7019_v60  ;;  %v2296_v4 = vshll.u32 %v7026_v38, 16  ;;  %v2325_v19 = vshrl.u32 %v5218_v51, 16  ;;  %v7082_v57 = vld [vmem:[%s6174_s25 + $0xa0] sm:$0xf] }
  0xa2   : > { %5838 = vmatmul.mubr.msk.bf16.vlgmr.msra.gmra.mxu0 %vm687_vm3, %v6883_v22  ;;  %v2307_v55 = vor.u32 %v2306_v11, %v2303_v54  ;;  %v2316_v39 = vrot.slane %v2314_v3, 4  ;;  %v2328_v9 = vshll.u32 %v5218_v51, 16  ;;  %v5221_v22 = vld [vmem:[%s6174_s25 + $0x9c] sm:$0xf]  ;;  %v7061_v23 = vrot.slane %v2259_v24, 4  ;;  %8887 = vst [vmem:[#allocation10_spill] sm:$0xff] %v7082_v57 }
  0xa3   : > { %5904 = vmatpush3.bf16.msra.mxu0 %v6877_v32  ;;  %5841 = vmatprep.mubr.msk.bf16.mxu0 %vm687_vm3, %v6917_v62  ;;  %v7063_v6 = vrot.slane %v2272_v42, 5  ;;  %v2320_v15 = vshll.u32 %v7029_v26, 16  ;;  %v2334_v59 = vshll.u32 %v7040_v45, 16  ;;  %v7070_v32 = vld [vmem:[%s8798_s1 + $0xe] sm:$0x3]  ;;  %v7075_v62 = vcombine.low %v2241_v56, %v2251_v52 }
  0xa4   : > { %8886 = vst [vmem:[#allocation11_spill] sm:$0xff] %v7070_v32  ;;  %6016 = vmatprep.subr.msk.bf16.mxu0 %vm736_vm0, %v7048_v33  ;;  %v7077_v17 = vrot.slane %v2269_v48, 4  ;;  %v2317_v16 = vor.u32 %v2316_v39, %v7042_v63  ;;  %v2338_v43 = vshrl.u32 %v7040_v45, 16  ;;  %v7086_v25 = vrot.slane %v2283_v12, 4  ;;  %v7095_v56 = vld [vmem:[%s6174_s25 + $0x98] sm:$0x1] }
  0xa5   : > { %5804 = vmatmul.mubr.msk.bf16.vlgmr.msra.gmra.mxu1 %vm687_vm3, %v6059_v10  ;;  %v7088_v53 = vrot.slane %v2293_v18, 4  ;;  %v7090_v13 = vrot.slane %v2296_v4, 5  ;;  %v7092_v10 = vrot.slane %v2307_v55, 4  ;;  %8888 = vst [vmem:[#allocation12_spill] sm:$0xff] %v7095_v56  ;;  %v2327_v24 = vrot.slane %v2325_v19, 4  ;;  %v6062_v19 = vld [vmem:[%s6174_s25 + $0x3c] sm:$0xff]  }
  0xa6   : > { %5870 = vmatpush3.bf16.msra.mxu1 %v6868_v14  ;;  %5807 = vmatprep.mubr.msk.bf16.mxu1 %vm687_vm3, %v6060_v46  ;;  %v2330_v48 = vrot.slane %v2328_v9, 5  ;;  %v2349_v42 = vshrl.u32 %v5221_v22, 16  ;;  %v2352_v51 = vshll.u32 %v5221_v22, 16  ;;  %v6061_v14 = vld [vmem:[%s6174_s25 + $0x30] sm:$0xff]   ;;  %v7104_v11 = vrot.slane %v2320_v15, 5 }
  0xa7   : > { %6015 = vmatprep.subr.msk.bf16.mxu1 %vm736_vm0, %v7070_v32  ;;  %v7106_v3 = vrot.slane %v2334_v59, 5  ;;  %v2358_v46 = vshll.u32 %v7082_v57, 16  ;;  %v5224_v52 = vld [vmem:[%s6174_s25 + $0xa8] sm:$0xf]  ;;  %v7110_v12 = vrot.slane %v2317_v16, 4  ;;  %v2340_v18 = vrot.slane %v2338_v43, 4 }
  0xa8   : > { %v2344_v4 = vshll.u32 %v7095_v56, 16  ;;  %v2362_v55 = vshrl.u32 %v7082_v57, 16  ;;  %v7115_v39 = vld [vmem:[%s6174_s25 + $0xac] sm:$0xf]  ;;  %v2331_v59 = vor.u32 %v2330_v48, %v2327_v24  ;;  %v7139_v16 = vld [vmem:[%s6174_s25 + $0xa4] sm:$0x1] }
  0xa9   : > { %8889 = vst [vmem:[#allocation13_spill] sm:$0xff] %v7115_v39  ;;  %8890 = vst [vmem:[#allocation2_spill] sm:$0xff] %v7139_v16  ;;  %v2351_v43 = vrot.slane %v2349_v42, 4  ;;  %v2354_v22 = vrot.slane %v2352_v51, 5  ;;  %v2373_v54 = vshrl.u32 %v5224_v52, 16  ;;  %v7141_v9 = vrot.slane %v2358_v46, 5 }
  0xaa   : > { %5842 = vmatmul.mubr.msk.bf16.gmra.mxu0 %vm687_vm3, %v6963_v7  ;;  %v2364_v32 = vrot.slane %v2362_v55, 4  ;;  %v2376_v15 = vshll.u32 %v5224_v52, 16  ;;  %v2382_v33 = vshll.u32 %v7115_v39, 16  ;;  %v5227_v57 = vld [vmem:[%s6174_s25 + $0xb4] sm:$0xf]  ;;  %v2341_v24 = vor.u32 %v2340_v18, %v7106_v3 }
  0xab   : > { %5845 = vmatprep.mubr.msk.bf16.mxu0 %vm687_vm3, %v7013_v20  ;;  %v2323_v20 = vsel %vm6218_vm4, %v7110_v12, %v7104_v11  ;;  %v7151_v48 = vrot.slane %v2344_v4, 5  ;;  %v7154_v42 = vld [vmem:[%s6174_s25 + $0xb0] sm:$0x1]  ;;  %v2375_v51 = vrot.slane %v2373_v54, 4  ;;  %v7157_v46 = vld [vmem:[%s6174_s25 + $0xb8] sm:$0xf]  ;;  %v2355_v18 = vor.u32 %v2354_v22, %v2351_v43 }
  0xac   : > { %8891 = vst [vmem:[#allocation14_spill] sm:$0xff] %v7154_v42  ;;  %8892 = vst [vmem:[#allocation15_spill] sm:$0xff] %v7157_v46  ;;  %v2378_v52 = vrot.slane %v2376_v15, 5  ;;  %v7161_v55 = vrot.slane %v2382_v33, 5  ;;  %v2386_v11 = vshrl.u32 %v7115_v39, 16  ;;  %v7164_v12 = vrot.slane %v2331_v59, 4 }
  0xad   : > { %5808 = vmatmul.mubr.msk.bf16.gmra.mxu1 %vm687_vm3, %v6061_v14  ;;  %v2368_v14 = vshll.u32 %v7139_v16, 16  ;;  %v7167_v4 = vld [vmem:[%s6174_s25 + $0xbc] sm:$0x1]  ;;  %v2397_v54 = vshrl.u32 %v5227_v57, 16  ;;  %v2400_v7 = vshll.u32 %v5227_v57, 16  ;;  %v2365_v56 = vor.u32 %v2364_v32, %v7141_v9  ;;  %v6063_v16 = vld [vmem:[%s6174_s25 + $0x48] sm:$0xff]  }
  0xae   : > { %5811 = vmatprep.mubr.msk.bf16.mxu1 %vm687_vm3, %v6062_v19  ;;  %v2388_v45 = vrot.slane %v2386_v11, 4  ;;  %v2392_v19 = vshll.u32 %v7154_v42, 16  ;;  %v2406_v15 = vshll.u32 %v7157_v46, 16  ;;  %v5230_v33 = vld [vmem:[%s6174_s25 + $0xc0] sm:$0xf]  ;;  %v2379_v26 = vor.u32 %v2378_v52, %v2375_v51  ;;  %v6064_v57 = vld [vmem:[%s6174_s25 + $0x54] sm:$0xff]  }
  0xaf   : > { %v2399_v39 = vrot.slane %v2397_v54, 4  ;;  %v2402_v34 = vrot.slane %v2400_v7, 5  ;;  %v2410_v59 = vshrl.u32 %v7157_v46, 16  ;;  %v7176_v22 = vld [vmem:[%s6174_s25 + $0xc4] sm:$0xf]  ;;  %v2342_v43 = vrot.slane %v2341_v24, 4 }
  0xb0   : > { %v2370_v32 = vrot.slane %v2368_v14, 5  ;;  %v2389_v11 = vor.u32 %v2388_v45, %v7161_v55  ;;  %v2408_v42 = vrot.slane %v2406_v15, 5  ;;  %v2416_v7 = vshll.u32 %v7167_v4, 16  ;;  %v7188_v45 = vld [vmem:[%s6174_s25 + $0xc8] sm:$0x1] }
  0xb1   : > { %v2403_v51 = vor.u32 %v2402_v34, %v2399_v39  ;;  %v2412_v52 = vrot.slane %v2410_v59, 4  ;;  %v2421_v54 = vshrl.u32 %v5230_v33, 16  ;;  %v2356_v46 = vrot.slane %v2355_v18, 4 }
  0xb2   : > { %5846 = vmatmul.mubr.msk.bf16.gmra.mxu0 %vm687_vm3, %v7021_v37  ;;  %v2366_v38 = vrot.slane %v2365_v56, 4  ;;  %v2424_v2 = vshll.u32 %v5230_v33, 16  ;;  %v2430_v37 = vshll.u32 %v7176_v22, 16  ;;  %v2380_v24 = vrot.slane %v2379_v26, 4 }
  0xb3   : > { %5849 = vmatprep.mubr.msk.bf16.mxu0 %vm687_vm3, %v7023_v29  ;;  %v2394_v14 = vrot.slane %v2392_v19, 5  ;;  %v2413_v36 = vor.u32 %v2412_v52, %v2408_v42  ;;  %v2423_v15 = vrot.slane %v2421_v54, 4  ;;  %v2390_v34 = vrot.slane %v2389_v11, 4 }
  0xb4   : > { %v2426_v29 = vrot.slane %v2424_v2, 5  ;;  %v7191_v39 = vrot.slane %v2430_v37, 5  ;;  %v2434_v56 = vshrl.u32 %v7176_v22, 16  ;;  %v8893_v26 = vsel %vm6218_vm4, %v7077_v17, %v7063_v6 }
  0xb5   : > { %5812 = vmatmul.mubr.msk.bf16.gmra.mxu1 %vm687_vm3, %v6063_v16  ;;  %v8894_v16 = vsel %vm6218_vm4, %v7061_v23, %v7003_v58  ;;  %v2404_v19 = vrot.slane %v2403_v51, 4  ;;  %v2414_v33 = vrot.slane %v2413_v36, 4  ;;  %v2418_v2 = vrot.slane %v2416_v7, 5  ;;  %v6065_v23 = vld [vmem:[%s6174_s25 + $0x60] sm:$0xff]  }
  0xb6   : > { %5815 = vmatprep.mubr.msk.bf16.mxu1 %vm687_vm3, %v6064_v57  ;;  %v5242_v18 = vcombine.low %v8894_v16, %v8893_v26  ;;  %v8895_v59 = vsel %vm6218_vm4, %v7088_v53, %v7090_v13  ;;  %v8896_v6 = vsel %vm6218_vm4, %v7086_v25, %v7019_v60  ;;  %v2427_v57 = vor.u32 %v2426_v29, %v2423_v15  ;;  %v5268_v13 = vld [vmem:[%s6174_s25 + $0x24] sm:$0xe]  ;;  %v5271_v26 = vld [vmem:[%s6174_s25 + $0x48] sm:$0xe] }
  0xb7   : > { %v5243_v17 = vcombine.low %v8896_v6, %v8895_v59  ;;  %v2436_v11 = vrot.slane %v2434_v56, 4  ;;  %v2440_v58 = vshll.u32 %v7188_v45, 16  ;;  %v8897_v36 = vsel %vm6218_vm4, %v7092_v10, %v7042_v63  ;;  %v6066_v63 = vld [vmem:[%s6174_s25 + $0x6c] sm:$0xff]   ;;  %v5272_v6 = vld [vmem:[%s6174_s25 + $0x54] sm:$0xe] }
  0xb8   : > { %v5244_v51 = vcombine.low %v8897_v36, %v2323_v20  ;;  %v2337_v53 = vsel %vm6218_vm4, %v7164_v12, %v7106_v3  ;;  %v2347_v60 = vsel %vm6218_vm4, %v2342_v43, %v7151_v48  ;;  %v2361_v25 = vsel %vm6218_vm4, %v2356_v46, %v7141_v9  ;;  %v7244_v12 = vld [vmem:[%s6174_s25 + $0xc] sm:$0xe] }
  0xb9   : > { %v2371_v10 = vsel %vm6218_vm4, %v2366_v38, %v2370_v32  ;;  %v2385_v3 = vsel %vm6218_vm4, %v2380_v24, %v7161_v55  ;;  %v2395_v20 = vsel %vm6218_vm4, %v2390_v34, %v2394_v14  ;;  %v2437_v48 = vor.u32 %v2436_v11, %v7191_v39  ;;  %v5269_v55 = vld [vmem:[%s6174_s25 + $0x30] sm:$0xe]  ;;  %v5270_v14 = vld [vmem:[%s6174_s25 + $0x3c] sm:$0xe] }
  0xba   : > { %5850 = vmatmul.mubr.msk.bf16.gmra.mxu0 %vm687_vm3, %v7075_v62  ;;  %v2409_v62 = vsel %vm6218_vm4, %v2404_v19, %v2408_v42  ;;  %v2419_v38 = vsel %vm6218_vm4, %v2414_v33, %v2418_v2  ;;  %v7251_v9 = vrot.slane %v2427_v57, 4  ;;  %v2804_v46 = vrot.slane %v6735_v49, 5  ;;  %v6067_v57 = vld [vmem:[%s6174_s25 + $0x78] sm:$0xff]  }
  0xbb   : > { %5853 = vmatprep.mubr.msk.bf16.mxu0 %vm687_vm3, %v5242_v18  ;;  %v7255_v43 = vcombine.low %v2337_v53, %v2347_v60  ;;  %v7257_v32 = vrot.slane %v2437_v48, 4  ;;  %v7259_v52 = vrot.slane %v2440_v58, 5  ;;  %v5284_v7 = vrot.slane %v5268_v13, 9  ;;  %v6068_v53 = vld [vmem:[%s6174_s25 + $0x84] sm:$0xff]   ;;  %v5273_v13 = vld [vmem:[%s6174_s25 + $0x60] sm:$0xe] }
  0xbc   : > { %v7262_v54 = vcombine.low %v2361_v25, %v2371_v10  ;;  %v7264_v42 = vcombine.low %v2385_v3, %v2395_v20  ;;  %v5282_v37 = vrot.slane %v7244_v12, 9  ;;  %v2818_v24 = vrot.slane %v6784_v44, 5  ;;  %v6074_v49 = vld [vmem:[%s6174_s25 + $0x18] sm:$0xff]  }
  0xbd   : > { %5816 = vmatmul.mubr.msk.bf16.gmra.mxu1 %vm687_vm3, %v6065_v23  ;;  %v7270_v15 = vcombine.low %v2409_v62, %v2419_v38  ;;  %v2807_v34 = vrot.slane %v6771_v47, 5  ;;  %v2821_v29 = vrot.slane %v6799_v21, 5  ;;  %v5285_v56 = vrot.slane %v5269_v55, 9  ;;  %v5275_v55 = vld [vmem:[%s6174_s25 + $0x78] sm:$0xe] }
  0xbe   : > { %5819 = vmatprep.mubr.msk.bf16.mxu1 %vm687_vm3, %v6066_v63  ;;  %v2433_v16 = vsel %vm6218_vm4, %v7251_v9, %v7191_v39  ;;  %v7281_v44 = vrot.slane %v2804_v46, 4  ;;  %v7285_v18 = vsel %vm6504_vm7, %v5284_v7, %v2818_v24  ;;  %v2820_v19 = vrot.slane %v2818_v24, 4 }
  0xbf   : > { %v2443_v21 = vsel %vm6218_vm4, %v7257_v32, %v7259_v52  ;;  %v2825_v33 = vrot.slane %v6822_v5, 5  ;;  %v2828_v2 = vrot.slane %v6830_v41, 5  ;;  %v5286_v59 = vrot.slane %v5270_v14, 9  ;;  %v6073_v52 = vld [vmem:[%s6174_s25 + $0xc0] sm:$0xff]  }
  0xc0   : > { %v7297_v11 = vsel %vm6504_vm7, %v2820_v19, %v2821_v29  ;;  %v2832_v58 = vrot.slane %v6839_v61, 5  ;;  %v2835_v23 = vrot.slane %v6891_v50, 5  ;;  %v5287_v36 = vrot.slane %v5271_v26, 9  ;;  %v5276_v19 = vld [vmem:[%s6174_s25 + $0x84] sm:$0xe] }
  0xc1   : > { %v5301_v5 = vcombine.low %v7285_v18, %v7297_v11  ;;  %v7307_v41 = vsel %vm6504_vm7, %v5285_v56, %v2825_v33  ;;  %v2827_v60 = vrot.slane %v2825_v33, 4  ;;  %v2839_v25 = vrot.slane %v6857_v1, 5 }
  0xc2   : > { %5854 = vmatmul.mubr.msk.bf16.gmra.mxu0 %vm687_vm3, %v5243_v17  ;;  %v7314_v61 = vsel %vm6504_vm7, %v5286_v59, %v2832_v58  ;;  %v2834_v50 = vrot.slane %v2832_v58, 4  ;;  %v2842_v17 = vrot.slane %v6905_v8, 5  ;;  %v5288_v63 = vrot.slane %v5272_v6, 9  ;;  %v8898_v59 = vld [vmem:[#allocation4_spill] sm:$0xff] }
  0xc3   : > { %5857 = vmatprep.mubr.msk.bf16.mxu0 %vm687_vm3, %v5244_v51  ;;  %v7319_v10 = vsel %vm6504_vm7, %v2827_v60, %v2828_v2  ;;  %v7323_v3 = vsel %vm6504_vm7, %v5287_v36, %v2839_v25  ;;  %v2841_v1 = vrot.slane %v2839_v25, 4  ;;  %v2846_v20 = vrot.slane %v6900_v40, 5  ;;  %v5274_v51 = vld [vmem:[%s6174_s25 + $0x6c] sm:$0xe]  ;;  %v6069_v58 = vld [vmem:[%s6174_s25 + $0x90] sm:$0xff]  }
  0xc4   : > { %v5302_v48 = vcombine.low %v7307_v41, %v7319_v10  ;;  %v7332_v8 = vsel %vm6504_vm7, %v2834_v50, %v2835_v23  ;;  %v2849_v62 = vrot.slane %v6922_v35, 5  ;;  %v5289_v38 = vrot.slane %v5273_v13, 9  ;;  %v8899_v36 = vld [vmem:[#allocation3_spill] sm:$0xff]  ;;  %v5277_v60 = vld [vmem:[%s6174_s25 + $0x90] sm:$0xe]  ;;  %v8900_v50 = vld [vmem:[#allocation6_spill] sm:$0xff] }
  0xc5   : > { %5820 = vmatmul.mubr.msk.bf16.gmra.mxu1 %vm687_vm3, %v6067_v57  ;;  %v5303_v40 = vcombine.low %v7314_v61, %v7332_v8  ;;  %v7341_v7 = vsel %vm6504_vm7, %v2841_v1, %v2842_v17  ;;  %v7345_v24 = vsel %vm6504_vm7, %v5288_v63, %v2846_v20  ;;  %v2848_v14 = vrot.slane %v2846_v20, 4 }
  0xc6   : > { %5823 = vmatprep.mubr.msk.bf16.mxu1 %vm687_vm3, %v6068_v53  ;;  %v5304_v35 = vcombine.low %v7323_v3, %v7341_v7  ;;  %v2853_v29 = vrot.slane %v6935_v28, 5  ;;  %v2856_v56 = vrot.slane %v6957_v30, 5  ;;  %v5290_v26 = vrot.slane %v5274_v51, 9  ;;  %v8901_v51 = vld [vmem:[#allocation5_spill] sm:$0xff]  ;;  %v5408_v3 = vld [vmem:[%s6174_s25 + $0x48] sm:$0xf] }
  0xc7   : > { %v7354_v33 = vsel %vm6504_vm7, %v2848_v14, %v2849_v62  ;;  %v2860_v2 = vrot.slane %v6954_v27, 5  ;;  %v2863_v6 = vrot.slane %v8898_v59, 5  ;;  %v5291_v57 = vrot.slane %v5275_v55, 9  ;;  %v6070_v27 = vld [vmem:[%s6174_s25 + $0x9c] sm:$0xff]   ;;  %v8909_v55 = vld [vmem:[#allocation15_spill] sm:$0xff] }
  0xc8   : > { %v5305_v23 = vcombine.low %v7345_v24, %v7354_v33  ;;  %v7363_v28 = vsel %vm6504_vm7, %v5289_v38, %v2853_v29  ;;  %v2855_v30 = vrot.slane %v2853_v29, 4  ;;  %v2867_v53 = vrot.slane %v8899_v36, 5  ;;  %v5278_v38 = vld [vmem:[%s6174_s25 + $0x9c] sm:$0xe]  ;;  %v8904_v36 = vld [vmem:[#allocation12_spill] sm:$0xff] }
  0xc9   : > { %v7372_v25 = vsel %vm6504_vm7, %v5290_v26, %v2860_v2  ;;  %v2862_v13 = vrot.slane %v2860_v2, 4  ;;  %v2870_v17 = vrot.slane %v8900_v50, 5  ;;  %v5292_v63 = vrot.slane %v5276_v19, 9  ;;  %v5279_v26 = vld [vmem:[%s6174_s25 + $0xa8] sm:$0xe] }
  0xca   : > { %5858 = vmatmul.mubr.msk.bf16.gmra.mxu0 %vm687_vm3, %v7255_v43  ;;  %v7379_v1 = vsel %vm6504_vm7, %v2855_v30, %v2856_v56  ;;  %v7383_v43 = vsel %vm6504_vm7, %v5291_v57, %v2867_v53  ;;  %v2869_v20 = vrot.slane %v2867_v53, 4  ;;  %v2874_v62 = vrot.slane %v8901_v51, 5  ;;  %v5281_v57 = vld [vmem:[%s6174_s25 + $0xc0] sm:$0xe]  ;;  %v6071_v19 = vld [vmem:[%s6174_s25 + $0xa8] sm:$0xff]  }
  0xcb   : > { %5861 = vmatprep.mubr.msk.bf16.mxu0 %vm687_vm3, %v7262_v54  ;;  %v7391_v14 = vsel %vm6504_vm7, %v2862_v13, %v2863_v6  ;;  %v8902_v54 = vld [vmem:[#allocation8_spill] sm:$0xff]  ;;  %v5293_v56 = vrot.slane %v5277_v60, 9  ;;  %v2884_v53 = vrot.slane %v8904_v36, 5  ;;  %v5294_v60 = vrot.slane %v5278_v38, 9  ;;  %v8907_v38 = vld [vmem:[#allocation13_spill] sm:$0xff] }
  0xcc   : > { %v2877_v29 = vrot.slane %v8902_v54, 5  ;;  %v7400_v2 = vsel %vm6504_vm7, %v2869_v20, %v2870_v17  ;;  %v7404_v59 = vsel %vm6504_vm7, %v5292_v63, %v2874_v62  ;;  %v2876_v6 = vrot.slane %v2874_v62, 4  ;;  %v5280_v13 = vld [vmem:[%s6174_s25 + $0xb4] sm:$0xe]  ;;  %v8905_v17 = vld [vmem:[#allocation10_spill] sm:$0xff] }
  0xcd   : > { %5824 = vmatmul.mubr.msk.bf16.gmra.mxu1 %vm687_vm3, %v6069_v58  ;;  %v8903_v58 = vld [vmem:[#allocation7_spill] sm:$0xff]  ;;  %v2888_v63 = vrot.slane %v8905_v17, 5  ;;  %v8906_v20 = vld [vmem:[#allocation2_spill] sm:$0xff]  ;;  %v5295_v62 = vrot.slane %v5279_v26, 9  ;;  %v2895_v36 = vrot.slane %v8907_v38, 5  ;;  %v5296_v26 = vrot.slane %v5280_v13, 9 }
  0xce   : > { %5827 = vmatprep.mubr.msk.bf16.mxu1 %vm687_vm3, %v6070_v27  ;;  %v2881_v30 = vrot.slane %v8903_v58, 5  ;;  %v7414_v50 = vsel %vm6504_vm7, %v2876_v6, %v2877_v29  ;;  %v2891_v51 = vrot.slane %v8906_v20, 5  ;;  %v8908_v17 = vld [vmem:[#allocation14_spill] sm:$0xff]  ;;  %v6072_v27 = vld [vmem:[%s6174_s25 + $0xb4] sm:$0xff]   ;;  %v2808_v39 = vsel %vm6504_vm7, %v7281_v44, %v2807_v34  ;;  %v7631_v7 = vld [vmem:[%s6174_s25 + $0x4c] sm:$0xf] }
  0xcf   : > { %v7429_v29 = vsel %vm6504_vm7, %v5294_v60, %v2888_v63  ;;  %v2890_v6 = vrot.slane %v2888_v63, 4  ;;  %v2898_v20 = vrot.slane %v8908_v17, 5  ;;  %v2897_v38 = vrot.slane %v2895_v36, 4  ;;  %v6091_v44 = vld [vmem:[%s6174_s25 + $0x20] sm:$0x1] }
  0xd0   : > { %v7422_v54 = vsel %vm6504_vm7, %v5293_v56, %v2881_v30  ;;  %v2883_v58 = vrot.slane %v2881_v30, 4  ;;  %v7441_v30 = vsel %vm6504_vm7, %v5295_v62, %v2895_v36  ;;  %v2902_v60 = vrot.slane %v8909_v55, 5 }
  0xd1   : > { %v5297_v63 = vrot.slane %v5281_v57, 9  ;;  %v7457_v55 = vsel %vm6504_vm7, %v2897_v38, %v2898_v20  ;;  %v2909_v57 = vrot.slane %v7176_v22, 5  ;;  %v2805_v22 = vsel %vm6504_vm7, %v5282_v37, %v2804_v46  ;;  %v6076_v38 = vld [vmem:[%s6174_s25 + $0x30] sm:$0xff]  }
  0xd2   : > { %5862 = vmatmul.mubr.msk.bf16.gmra.mxu0 %vm687_vm3, %v7264_v42  ;;  %v7437_v56 = vsel %vm6504_vm7, %v2883_v58, %v2884_v53  ;;  %v7450_v42 = vsel %vm6504_vm7, %v2890_v6, %v2891_v51  ;;  %v2905_v53 = vrot.slane %v7167_v4, 5  ;;  %v2904_v58 = vrot.slane %v2902_v60, 4 }
  0xd3   : > { %5865 = vmatprep.mubr.msk.bf16.mxu0 %vm687_vm3, %v7270_v15  ;;  %v7461_v15 = vsel %vm6504_vm7, %v5296_v26, %v2902_v60  ;;  %v2912_v51 = vrot.slane %v7188_v45, 5  ;;  %v5267_v45 = vld [vmem:[%s6174_s25 + $0x18] sm:$0xe]  ;;  %v7501_v9 = vsel %vm6504_vm7, %v5297_v63, %v2909_v57  ;;  %v2911_v46 = vrot.slane %v2909_v57, 4  ;;  %v6075_v26 = vld [vmem:[%s6174_s25 + $0x24] sm:$0xff]  }
  0xd4   : > { %v7489_v32 = vsel %vm6504_vm7, %v2904_v58, %v2905_v53  ;;  %v5283_v37 = vrot.slane %v5267_v45, 9  ;;  %v5299_v34 = vcombine.low %v2805_v22, %v2808_v39  ;;  %v8910_v60 = vld [vmem:[#allocation9_spill] sm:$0xff] }
  0xd5   : > { %5828 = vmatmul.mubr.msk.bf16.gmra.mxu1 %vm687_vm3, %v6071_v19  ;;  %v5249_v19 = vcombine.low %v2433_v16, %v2443_v21  ;;  %v7506_v47 = vsel %vm6504_vm7, %v2911_v46, %v2912_v51  ;;  %v2814_v21 = vrot.slane %v6091_v44, 5  ;;  %v4571_v53 = vsel %vm736_vm0, %v8910_v60, 0  ;;  %v5396_v63 = vld [vmem:[%s6174_s25 + $0x18] sm:$0xf]  ;;  %v5397_v57 = vld [vmem:[%s6174_s25 + $0x1c] sm:$0xf] }
  0xd6   : > { %5831 = vmatprep.mubr.msk.bf16.mxu1 %vm687_vm3, %v6072_v27  ;;  %v6090_v27 = vld [vmem:[%s6174_s25 + $0x1c] sm:$0xf]  ;;  %v5399_v51 = vld [vmem:[%s6174_s25 + $0x24] sm:$0xf]  ;;  %v3619_v45 = vshrl.u32 %v5396_v63, 16  ;;  %v3628_v39 = vshll.u32 %v5397_v57, 16 }
  0xd7   : > { %v2811_v36 = vrot.slane %v6090_v27, 5  ;;  %v3622_v27 = vshll.u32 %v5396_v63, 16  ;;  %v3643_v46 = vshrl.u32 %v5399_v51, 16  ;;  %v6078_v44 = vld [vmem:[%s6174_s25 + $0x48] sm:$0xff]   ;;  %v5477_v60 = vld [vmem:[%s6174_s25 + $0x18] sm:$0xe] }
  0xd8   : > { %v7547_v63 = vld [vmem:[%s6174_s25 + $0x2c] sm:$0x1] }
  0xd9   : > { %v2813_v16 = vrot.slane %v2811_v36, 4  ;;  %v2812_v17 = vsel %vm6504_vm7, %v5283_v37, %v2811_v36  ;;  %v7531_v36 = vld [vmem:[%s6174_s25 + $0x28] sm:$0xf]  ;;  %v6077_v37 = vld [vmem:[%s6174_s25 + $0x3c] sm:$0xff]   ;;  %v3645_v18 = vrot.slane %v3643_v46, 4 }
  0xda   : > { %5866 = vmatmul.mubr.msk.bf16.gmra.mxu0 %vm687_vm3, %v5249_v19  ;;  %v8911_v19 = vld [vmem:[#allocation11_spill] sm:$0xff] }
  0xdb   : > { %5905 = vmatprep.mubr.msk.bf16.mxu0 %vm687_vm3, %v6074_v49  ;;  %v2815_v20 = vsel %vm6504_vm7, %v2813_v16, %v2814_v21  ;;  %v4101_v22 = vsel %vm736_vm0, %v8911_v19, 0  ;;  %v3632_v49 = vshrl.u32 %v5397_v57, 16  ;;  %v3656_v16 = vshrl.u32 %v7531_v36, 16  ;;  %v5398_v21 = vld [vmem:[%s6174_s25 + $0x20] sm:$0x1] }
  0xdc   : > { %v5300_v58 = vcombine.low %v2812_v17, %v2815_v20  ;;  %v3621_v17 = vrot.slane %v3619_v45, 4  ;;  %v3624_v20 = vrot.slane %v3622_v27, 5  ;;  %v5402_v19 = vld [vmem:[%s6174_s25 + $0x30] sm:$0xf]  ;;  %v3638_v45 = vshll.u32 %v5398_v21, 16 }
  0xdd   : > { %5832 = vmatmul.mubr.msk.bf16.gmra.mxu1 %vm687_vm3, %v6073_v52  ;;  %v3646_v52 = vshll.u32 %v5399_v51, 16  ;;  %v3658_v51 = vrot.slane %v3656_v16, 4  ;;  %v5493_v27 = vrot.slane %v5477_v60, 9  ;;  %v4365_v46 = vrot.slane %v5398_v21, 5  ;;  %v5478_v16 = vld [vmem:[%s6174_s25 + $0x24] sm:$0xe] }
  0xde   : > { %5871 = vmatprep.mubr.msk.bf16.mxu1 %vm687_vm3, %v5299_v34  ;;  %v3652_v34 = vshll.u32 %v7531_v36, 16  ;;  %v6079_v21 = vld [vmem:[%s6174_s25 + $0x54] sm:$0xff]   ;;  %v3670_v10 = vshll.u32 %v5402_v19, 16  ;;  %v6080_v60 = vld [vmem:[%s6174_s25 + $0x60] sm:$0xff]  }
  0xdf   : > { %v3648_v11 = vrot.slane %v3646_v52, 5  ;;  %v3662_v52 = vshll.u32 %v7547_v63, 16 }
  0xe2   : > { %5906 = vmatmul.mubr.msk.bf16.vlgmr.msra.gmra.mxu0 %vm687_vm3, %v6075_v26  ;;  %v7543_v26 = vrot.slane %v3628_v39, 5 }
  0xe3   : > { %5972 = vmatpush3.bf16.msra.mxu0 %v4571_v53  ;;  %5909 = vmatprep.mubr.msk.bf16.mxu0 %vm687_vm3, %v6076_v38  ;;  %v3634_v38 = vrot.slane %v3632_v49, 4  ;;  %v4362_v53 = vrot.slane %v5397_v57, 5  ;;  %v7557_v57 = vld [vmem:[%s6174_s25 + $0x34] sm:$0xf] }
  0xe5   : > { %5872 = vmatmul.mubr.msk.bf16.vlgmr.msra.gmra.mxu1 %vm687_vm3, %v5300_v58  ;;  %v7552_v58 = vrot.slane %v3652_v34, 5  ;;  %v3635_v39 = vor.u32 %v3634_v38, %v7543_v26  ;;  %v4364_v49 = vrot.slane %v4362_v53, 4  ;;  %v3649_v34 = vor.u32 %v3648_v11, %v3645_v18 }
  0xe6   : > { %5938 = vmatpush3.bf16.msra.mxu1 %v4101_v22  ;;  %5875 = vmatprep.mubr.msk.bf16.mxu1 %vm687_vm3, %v5301_v5  ;;  %v7550_v5 = vpop.f32.mrf.mxu0  ;;  %v3625_v22 = vor.u32 %v3624_v20, %v3621_v17  ;;  %v3667_v17 = vshrl.u32 %v5402_v19, 16  ;;  %v3680_v38 = vshrl.u32 %v7557_v57, 16  ;;  %v7582_v61 = vsel %vm6504_vm7, %v5493_v27, %v4362_v53  ;;  %v5405_v19 = vld [vmem:[%s6174_s25 + $0x3c] sm:$0xf] }
  0xe7   : > { %v3659_v41 = vor.u32 %v3658_v51, %v7552_v58  ;;  %v3636_v8 = vrot.slane %v3635_v39, 4  ;;  %v3664_v11 = vrot.slane %v3662_v52, 5  ;;  %v5494_v51 = vrot.slane %v5478_v16, 9  ;;  %v7596_v39 = vld [vmem:[%s6174_s25 + $0x38] sm:$0x1] }
  0xe8   : > { %v7574_v20 = vpop.f32.mrf.mxu0  ;;  %v3626_v18 = vrot.slane %v3625_v22, 4  ;;  %v3650_v12 = vrot.slane %v3649_v34, 4  ;;  %v4372_v22 = vrot.slane %v7547_v63, 5  ;;  %v3682_v52 = vrot.slane %v3680_v38, 4 }
  0xe9   : > { %v3660_v27 = vrot.slane %v3659_v41, 4  ;;  %v3691_v34 = vshrl.u32 %v5405_v19, 16  ;;  %v3694_v16 = vshll.u32 %v5405_v19, 16  ;;  %v7609_v41 = vld [vmem:[%s6174_s25 + $0x40] sm:$0xf] }
  0xea   : > { %5910 = vmatmul.mubr.msk.bf16.gmra.mxu0 %vm687_vm3, %v6077_v37  ;;  %v7593_v53 = vpop.f32.mrf.mxu0  ;;  %v3631_v63 = vsel %vm6218_vm4, %v3626_v18, %v7543_v26  ;;  %v3655_v26 = vsel %vm6218_vm4, %v3650_v12, %v7552_v58  ;;  %v5479_v18 = vld [vmem:[%s6174_s25 + $0x30] sm:$0xe]  ;;  %v3700_v24 = vshll.u32 %v7609_v41, 16  ;;  %v3704_v33 = vshrl.u32 %v7609_v41, 16 }
  0xeb   : > { %5913 = vmatprep.mubr.msk.bf16.mxu0 %vm687_vm3, %v6078_v44  ;;  %v7565_v37 = vpop.f32.mrf.mxu1  ;;  %v4369_v44 = vrot.slane %v7531_v36, 5  ;;  %v3640_v36 = vrot.slane %v3638_v45, 5  ;;  %v3669_v45 = vrot.slane %v3667_v17, 4  ;;  %v3665_v58 = vsel %vm6218_vm4, %v3660_v27, %v3664_v11 }
  0xec   : > { %8912 = vst [vmem:[#allocation4_spill] sm:$0xff] %v7565_v37  ;;  %v7638_v12 = vpop.f32.mrf.mxu0  ;;  %v3696_v19 = vrot.slane %v3694_v16, 5  ;;  %v3728_v11 = vshrl.u32 %v7631_v7, 16 }
  0xed   : > { %5876 = vmatmul.mubr.msk.bf16.gmra.mxu1 %vm687_vm3, %v5302_v48  ;;  %v3676_v48 = vshll.u32 %v7557_v57, 16  ;;  %v7589_v6 = vpop.f32.mrf.mxu1  ;;  %v4371_v4 = vrot.slane %v4369_v44, 4  ;;  %v3641_v17 = vsel %vm6218_vm4, %v3636_v8, %v3640_v36  ;;  %v4376_v36 = vrot.slane %v7557_v57, 5  ;;  %v6082_v8 = vld [vmem:[%s6174_s25 + $0x78] sm:$0xff]  }
  0xee   : > { %5879 = vmatprep.mubr.msk.bf16.mxu1 %vm687_vm3, %v5303_v40  ;;  %v7586_v40 = vsel %vm6504_vm7, %v4364_v49, %v4365_v46  ;;  %8913 = vst [vmem:[#allocation3_spill] sm:$0xff] %v7589_v6  ;;  %v3672_v49 = vrot.slane %v3670_v10, 5  ;;  %v7652_v27 = vcombine.low %v3631_v63, %v3641_v17  ;;  %v7654_v57 = vcombine.low %v3655_v26, %v3665_v58  ;;  %v7668_v17 = vld [vmem:[%s6174_s25 + $0x58] sm:$0xf]  ;;  %v7674_v58 = vld [vmem:[%s6174_s25 + $0x44] sm:$0x1] }
  0xef   : > { %v7598_v46 = vrot.slane %v3676_v48, 5  ;;  %v7615_v10 = vpop.f32.mrf.mxu1  ;;  %v7622_v48 = vsel %vm6504_vm7, %v5494_v51, %v4369_v44  ;;  %v7626_v38 = vsel %vm6504_vm7, %v4371_v4, %v4372_v22  ;;  %v3693_v51 = vrot.slane %v3691_v34, 4  ;;  %v5411_v34 = vld [vmem:[%s6174_s25 + $0x54] sm:$0xf] }
  0xf0   : > { %8914 = vst [vmem:[#allocation6_spill] sm:$0xff] %v7615_v10  ;;  %v3673_v44 = vor.u32 %v3672_v49, %v3669_v45  ;;  %v3718_v22 = vshll.u32 %v5408_v3, 16  ;;  %v4378_v13 = vrot.slane %v4376_v36, 4  ;;  %v4379_v63 = vrot.slane %v7596_v39, 5  ;;  %v5480_v49 = vld [vmem:[%s6174_s25 + $0x3c] sm:$0xe] }
  0xf1   : > { %v3683_v4 = vor.u32 %v3682_v52, %v7598_v46  ;;  %v7650_v45 = vpop.f32.mrf.mxu1  ;;  %v5495_v52 = vrot.slane %v5479_v18, 9  ;;  %v3697_v18 = vor.u32 %v3696_v19, %v3693_v51  ;;  %v8917_v6 = vcombine.low %v7363_v28, %v7379_v1 }
  0xf2   : > { %5914 = vmatmul.mubr.msk.bf16.gmra.mxu0 %vm687_vm3, %v6079_v21  ;;  %v3724_v21 = vshll.u32 %v7631_v7, 16  ;;  %8915 = vst [vmem:[#allocation5_spill] sm:$0xff] %v7650_v45  ;;  %v3720_v45 = vrot.slane %v3718_v22, 5  ;;  %v3739_v51 = vshrl.u32 %v5411_v34, 16  ;;  %v3742_v19 = vshll.u32 %v5411_v34, 16 }
  0xf3   : > { %5917 = vmatprep.mubr.msk.bf16.mxu0 %vm687_vm3, %v6080_v60  ;;  %v3686_v60 = vshll.u32 %v7596_v39, 16  ;;  %v7671_v26 = vrot.slane %v3683_v4, 4  ;;  %v3730_v39 = vrot.slane %v3728_v11, 4  ;;  %v7709_v22 = vsel %vm6504_vm7, %v4378_v13, %v4379_v63 }
  0xf4   : > { %v7679_v10 = vrot.slane %v3724_v21, 5  ;;  %v8919_v21 = vcombine.low %v7372_v25, %v7391_v14  ;;  %v4383_v25 = vrot.slane %v7609_v41, 5  ;;  %v6084_v14 = vld [vmem:[%s6174_s25 + $0x90] sm:$0xff]   ;;  %v5496_v1 = vrot.slane %v5480_v49, 9  ;;  %v5414_v41 = vld [vmem:[%s6174_s25 + $0x60] sm:$0xf] }
  0xf5   : > { %5880 = vmatmul.mubr.msk.bf16.gmra.mxu1 %vm687_vm3, %v5304_v35  ;;  %v6081_v35 = vld [vmem:[%s6174_s25 + $0x6c] sm:$0xff]   ;;  %v7664_v62 = vrot.slane %v3686_v60, 5  ;;  %v3741_v37 = vrot.slane %v3739_v51, 4 }
  0xf6   : > { %5883 = vmatprep.mubr.msk.bf16.mxu1 %vm687_vm3, %v5305_v23  ;;  %v3715_v23 = vshrl.u32 %v5408_v3, 16  ;;  %v7662_v3 = vrot.slane %v3673_v44, 4  ;;  %v3706_v44 = vrot.slane %v3704_v33, 4  ;;  %v3752_v33 = vshrl.u32 %v7668_v17, 16 }
  0xf7   : > { %v7660_v16 = vpop.f32.mrf.mxu0  ;;  %v3731_v13 = vor.u32 %v3730_v39, %v7679_v10  ;;  %v4390_v39 = vrot.slane %v7631_v7, 5  ;;  %v8923_v7 = vcombine.low %v7383_v43, %v7400_v2  ;;  %v8925_v43 = vcombine.low %v7404_v59, %v7414_v50  ;;  %v6085_v2 = vld [vmem:[%s6174_s25 + $0x9c] sm:$0xff]  }
  0xf8   : > { %8916 = vst [vmem:[#allocation8_spill] sm:$0xff] %v7660_v16  ;;  %v3717_v60 = vrot.slane %v3715_v23, 4  ;;  %v6083_v23 = vld [vmem:[%s6174_s25 + $0x84] sm:$0xff]   ;;  %v7736_v16 = vld [vmem:[%s6174_s25 + $0x5c] sm:$0x1]  ;;  %v4397_v59 = vrot.slane %v7668_v17, 5 }
  0xf9   : > { %v7697_v28 = vpop.f32.mrf.mxu0 }
  0xfa   : > { %5918 = vmatmul.mubr.msk.bf16.gmra.mxu0 %vm687_vm3, %v6081_v35  ;;  %v7676_v35 = vrot.slane %v3700_v24, 5  ;;  %v3748_v24 = vshll.u32 %v7668_v17, 16  ;;  %8920 = vst [vmem:[#allocation12_spill] sm:$0xff] %v7697_v28  ;;  %v3744_v28 = vrot.slane %v3742_v19, 5 }
  0xfb   : > { %5921 = vmatprep.mubr.msk.bf16.mxu0 %vm687_vm3, %v6082_v8  ;;  %v7685_v4 = vpop.f32.mrf.mxu1  ;;  %v7688_v8 = vld [vmem:[%s6174_s25 + $0x50] sm:$0x1]  ;;  %v7729_v49 = vpop.f32.mrf.mxu0 }
  0xfc   : > { %8918 = vst [vmem:[#allocation7_spill] sm:$0xff] %v7685_v4  ;;  %v3707_v34 = vor.u32 %v3706_v44, %v7676_v35  ;;  %v7719_v4 = vrot.slane %v3697_v18, 4  ;;  %v7726_v11 = vrot.slane %v3748_v24, 5  ;;  %v3754_v44 = vrot.slane %v3752_v33, 4  ;;  %8922 = vst [vmem:[#allocation2_spill] sm:$0xff] %v7729_v49 }
  0xfd   : > { %5884 = vmatmul.mubr.msk.bf16.gmra.mxu1 %vm687_vm3, %v8917_v6  ;;  %v7705_v6 = vsel %vm6504_vm7, %v5495_v52, %v4376_v36  ;;  %v3721_v36 = vor.u32 %v3720_v45, %v3717_v60  ;;  %v3734_v52 = vshll.u32 %v7688_v8, 16  ;;  %v7724_v63 = vpop.f32.mrf.mxu1  ;;  %v4385_v18 = vrot.slane %v4383_v25, 4  ;;  %v5481_v24 = vld [vmem:[%s6174_s25 + $0x48] sm:$0xe] }
  0xfe   : > { %5887 = vmatprep.mubr.msk.bf16.mxu1 %vm687_vm3, %v8919_v21  ;;  %v3710_v21 = vshll.u32 %v7674_v58, 16  ;;  %8921 = vst [vmem:[#allocation10_spill] sm:$0xff] %v7724_v63  ;;  %v4386_v60 = vrot.slane %v7674_v58, 5  ;;  %v3708_v51 = vrot.slane %v3707_v34, 4  ;;  %v3763_v33 = vshrl.u32 %v5414_v41, 16 }
  0xff   : > { %v7742_v63 = vsel %vm6504_vm7, %v5496_v1, %v4383_v25  ;;  %v3722_v45 = vrot.slane %v3721_v36, 4  ;;  %v3732_v49 = vrot.slane %v3731_v13, 4  ;;  %v3736_v58 = vrot.slane %v3734_v52, 5  ;;  %v7757_v36 = vld [vmem:[%s6174_s25 + $0x64] sm:$0xf]  ;;  %v7764_v13 = vpop.f32.mrf.mxu0 }
 0x100   : > { %v3712_v19 = vrot.slane %v3710_v21, 5  ;;  %v3703_v34 = vsel %vm6218_vm4, %v7719_v4, %v7676_v35  ;;  %v3745_v21 = vor.u32 %v3744_v28, %v3741_v37  ;;  %v3755_v1 = vor.u32 %v3754_v44, %v7726_v11  ;;  %8926 = vst [vmem:[#allocation14_spill] sm:$0xff] %v7764_v13  ;;  %v5482_v28 = vld [vmem:[%s6174_s25 + $0x54] sm:$0xe]  ;;  %v6089_v13 = vld [vmem:[%s6174_s25 + $0xcc] sm:$0xff]  }
 0x101   : > { %v3758_v25 = vshll.u32 %v7736_v16, 16  ;;  %v7768_v52 = vsel %vm6504_vm7, %v4385_v18, %v4386_v60  ;;  %v5497_v35 = vrot.slane %v5481_v24, 9  ;;  %v4392_v37 = vrot.slane %v4390_v39, 4 }
 0x102   : > { %5922 = vmatmul.mubr.msk.bf16.gmra.mxu0 %vm687_vm3, %v6083_v23  ;;  %v3766_v23 = vshll.u32 %v5414_v41, 16  ;;  %v4393_v4 = vrot.slane %v7688_v8, 5  ;;  %v6086_v41 = vld [vmem:[%s6174_s25 + $0xa8] sm:$0xff]   ;;  %v3713_v44 = vsel %vm6218_vm4, %v3708_v51, %v3712_v19  ;;  %v3765_v50 = vrot.slane %v3763_v33, 4 }
 0x103   : > { %5925 = vmatprep.mubr.msk.bf16.mxu0 %vm687_vm3, %v6084_v14  ;;  %v7748_v14 = vpop.f32.mrf.mxu1  ;;  %v3737_v18 = vsel %vm6218_vm4, %v3732_v49, %v3736_v58  ;;  %v3772_v60 = vshll.u32 %v7757_v36, 16  ;;  %v3776_v8 = vshrl.u32 %v7757_v36, 16  ;;  %v3756_v51 = vrot.slane %v3755_v1, 4  ;;  %v7786_v33 = vld [vmem:[%s6174_s25 + $0x68] sm:$0x1] }
 0x104   : > { %8924 = vst [vmem:[#allocation13_spill] sm:$0xff] %v7748_v14  ;;  %v3746_v14 = vrot.slane %v3745_v21, 4  ;;  %v3760_v17 = vrot.slane %v3758_v25, 5  ;;  %v5498_v19 = vrot.slane %v5482_v28, 9  ;;  %v8929_v49 = vsel %vm6218_vm4, %v7671_v26, %v7664_v62  ;;  %v5417_v25 = vld [vmem:[%s6174_s25 + $0x6c] sm:$0xf] }
 0x105   : > { %5888 = vmatmul.mubr.msk.bf16.gmra.mxu1 %vm687_vm3, %v8923_v7  ;;  %v3768_v7 = vrot.slane %v3766_v23, 5  ;;  %v7783_v24 = vpop.f32.mrf.mxu1  ;;  %v7807_v21 = vsel %vm6504_vm7, %v5497_v35, %v4390_v39  ;;  %v7811_v1 = vsel %vm6504_vm7, %v4392_v37, %v4393_v4  ;;  %v7814_v62 = vcombine.low %v3703_v34, %v3713_v44  ;;  %v5483_v4 = vld [vmem:[%s6174_s25 + $0x60] sm:$0xe]  ;;  %v5423_v44 = vld [vmem:[%s6174_s25 + $0x84] sm:$0xf] }
 0x106   : > { %5891 = vmatprep.mubr.msk.bf16.mxu1 %vm687_vm3, %v8925_v43  ;;  %v3727_v43 = vsel %vm6218_vm4, %v3722_v45, %v7679_v10  ;;  %8927 = vst [vmem:[#allocation15_spill] sm:$0xff] %v7783_v24  ;;  %v8930_v45 = vsel %vm6218_vm4, %v7662_v3, %v7598_v46  ;;  %v4399_v46 = vrot.slane %v4397_v59, 4  ;;  %v4400_v3 = vrot.slane %v7736_v16, 5 }
 0x107   : > { %v7801_v23 = vcombine.low %v8930_v45, %v8929_v49  ;;  %8931 = vst [vmem:[#allocation11_spill] sm:$0xff] %v7814_v62  ;;  %v3769_v26 = vor.u32 %v3768_v7, %v3765_v50  ;;  %v7821_v28 = vcombine.low %v3727_v43, %v3737_v18  ;;  %v7823_v39 = vrot.slane %v3772_v60, 5 }
 0x108   : > { %v7789_v10 = vpop.f32.mrf.mxu0  ;;  %v7825_v35 = vrot.slane %v3776_v8, 4  ;;  %v3782_v37 = vshll.u32 %v7786_v33, 16  ;;  %v8933_v34 = vcombine.low %v7422_v54, %v7437_v56  ;;  %v3751_v50 = vsel %vm6218_vm4, %v3746_v14, %v7726_v11  ;;  %v5420_v54 = vld [vmem:[%s6174_s25 + $0x78] sm:$0xf] }
 0x109   : > { %8928 = vst [vmem:[#allocation9_spill] sm:$0xff] %v7789_v10  ;;  %8932 = vst [vmem:[#allocation16_spill] sm:$0xff] %v7821_v28  ;;  %v3761_v7 = vsel %vm6218_vm4, %v3756_v51, %v3760_v17  ;;  %v7845_v43 = vsel %vm6504_vm7, %v5498_v19, %v4397_v59  ;;  %v8935_v56 = vcombine.low %v7429_v29, %v7450_v42  ;;  %v3787_v60 = vshrl.u32 %v5417_v25, 16  ;;  %v7857_v51 = vld [vmem:[%s6174_s25 + $0x7c] sm:$0xf]  ;;  %v6088_v59 = vld [vmem:[%s6174_s25 + $0xc0] sm:$0xff]  }
 0x10a   : > { %5926 = vmatmul.mubr.msk.bf16.gmra.mxu0 %vm687_vm3, %v6085_v2  ;;  %v7819_v2 = vld [vmem:[%s6174_s25 + $0x70] sm:$0xf]  ;;  %v7852_v18 = vpop.f32.mrf.mxu0  ;;  %v3790_v8 = vshll.u32 %v5417_v25, 16  ;;  %v7862_v17 = vsel %vm6504_vm7, %v4399_v46, %v4400_v3  ;;  %v7864_v29 = vrot.slane %v3769_v26, 4  ;;  %v5499_v42 = vrot.slane %v5483_v4, 9 }
 0x10b   : > { %5929 = vmatprep.mubr.msk.bf16.mxu0 %vm687_vm3, %v6086_v41  ;;  %v6087_v41 = vld [vmem:[%s6174_s25 + $0xb4] sm:$0xff]   ;;  %8936 = vst [vmem:[#allocation18_spill] sm:$0xff] %v7852_v18  ;;  %v3796_v11 = vshll.u32 %v7819_v2, 16  ;;  %v3800_v14 = vshrl.u32 %v7819_v2, 16  ;;  %v4404_v19 = vrot.slane %v7757_v36, 5  ;;  %v7867_v49 = vcombine.low %v3751_v50, %v3761_v7 }
 0x10c   : > { %v3779_v45 = vor.u32 %v7825_v35, %v7823_v39  ;;  %v7871_v25 = vrot.slane %v3782_v37, 5  ;;  %v3811_v46 = vshrl.u32 %v5420_v54, 16  ;;  %v3814_v3 = vshll.u32 %v5420_v54, 16  ;;  %v7883_v4 = vld [vmem:[%s6174_s25 + $0x88] sm:$0xf]  ;;  %v7886_v35 = vpop.f32.mrf.mxu0 }
 0x10d   : > { %5892 = vmatmul.mubr.msk.bf16.gmra.mxu1 %vm687_vm3, %v8933_v34  ;;  %v7833_v16 = vpop.f32.mrf.mxu1  ;;  %8937 = vst [vmem:[#allocation19_spill] sm:$0xff] %v7867_v49  ;;  %v4407_v34 = vrot.slane %v7786_v33, 5  ;;  %v3820_v36 = vshll.u32 %v7857_v51, 16  ;;  %v3824_v26 = vshrl.u32 %v7857_v51, 16  ;;  %8939 = vst [vmem:[#allocation21_spill] sm:$0xff] %v7886_v35  ;;  %v3789_v33 = vrot.slane %v3787_v60, 4 }
 0x10e   : > { %8934 = vst [vmem:[#allocation17_spill] sm:$0xff] %v7833_v16  ;;  %5895 = vmatprep.mubr.msk.bf16.mxu1 %vm687_vm3, %v8935_v56  ;;  %v7875_v56 = vld [vmem:[%s6174_s25 + $0x74] sm:$0x1]  ;;  %v3792_v37 = vrot.slane %v3790_v8, 5  ;;  %v7888_v50 = vrot.slane %v3796_v11, 5  ;;  %v3802_v7 = vrot.slane %v3800_v14, 4  ;;  %v8940_v54 = vcombine.low %v7441_v30, %v7457_v55  ;;  %v7916_v49 = vpop.f32.mrf.mxu0 }
 0x10f   : > { %v7878_v58 = vpop.f32.mrf.mxu1  ;;  %v4406_v16 = vrot.slane %v4404_v19, 4  ;;  %v7901_v60 = vld [vmem:[%s6174_s25 + $0x80] sm:$0x1]  ;;  %v7904_v8 = vld [vmem:[%s6174_s25 + $0x6c] sm:$0xe]  ;;  %v3835_v11 = vshrl.u32 %v5423_v44, 16 }
 0x110   : > { %8938 = vst [vmem:[#allocation20_spill] sm:$0xff] %v7878_v58  ;;  %v7897_v58 = vsel %vm6504_vm7, %v5499_v42, %v4404_v19  ;;  %v3838_v14 = vshll.u32 %v5423_v44, 16  ;;  %v3848_v24 = vshrl.u32 %v7883_v4, 16  ;;  %v3813_v19 = vrot.slane %v3811_v46, 4  ;;  %8942 = vst [vmem:[#allocation23_spill] sm:$0xff] %v7916_v49 }
 0x111   : > { %v7912_v42 = vpop.f32.mrf.mxu1  ;;  %v3816_v35 = vrot.slane %v3814_v3, 5  ;;  %v7914_v18 = vrot.slane %v3820_v36, 5  ;;  %v3826_v10 = vrot.slane %v3824_v26, 4  ;;  %v8943_v44 = vcombine.low %v7461_v15, %v7489_v32  ;;  %v7935_v32 = vld [vmem:[%s6174_s25 + $0x8c] sm:$0x1] }
 0x112   : > { %5930 = vmatmul.mubr.msk.bf16.gmra.mxu0 %vm687_vm3, %v6087_v41  ;;  %v3806_v41 = vshll.u32 %v7875_v56, 16  ;;  %8941 = vst [vmem:[#allocation22_spill] sm:$0xff] %v7912_v42  ;;  %v3793_v30 = vor.u32 %v3792_v37, %v3789_v33  ;;  %v3803_v55 = vor.u32 %v3802_v7, %v7888_v50  ;;  %v3830_v46 = vshll.u32 %v7901_v60, 16  ;;  %v5485_v33 = vld [vmem:[%s6174_s25 + $0x78] sm:$0xe] }
 0x113   : > { %5933 = vmatprep.mubr.msk.bf16.mxu0 %vm687_vm3, %v6088_v59  ;;  %v3844_v59 = vshll.u32 %v7883_v4, 16  ;;  %v7926_v3 = vrot.slane %v3779_v45, 4  ;;  %v7930_v36 = vsel %vm6504_vm7, %v4406_v16, %v4407_v34  ;;  %v5500_v26 = vrot.slane %v7904_v8, 9  ;;  %v7940_v42 = vpop.f32.mrf.mxu1  ;;  %v5426_v8 = vld [vmem:[%s6174_s25 + $0x90] sm:$0xf] }
 0x114   : > { %v4418_v15 = vrot.slane %v7857_v51, 5  ;;  %v3837_v37 = vrot.slane %v3835_v11, 4  ;;  %v3840_v7 = vrot.slane %v3838_v14, 5  ;;  %8944 = vst [vmem:[#allocation24_spill] sm:$0xff] %v7940_v42  ;;  %v3808_v45 = vrot.slane %v3806_v41, 5 }
 0x115   : > { %5896 = vmatmul.mubr.msk.bf16.gmra.mxu1 %vm687_vm3, %v8940_v54  ;;  %v4411_v54 = vrot.slane %v7819_v2, 5  ;;  %v7938_v2 = vrot.slane %v3844_v59, 5  ;;  %v4414_v49 = vrot.slane %v7875_v56, 5  ;;  %v3817_v16 = vor.u32 %v3816_v35, %v3813_v19  ;;  %v7949_v59 = vld [vmem:[%s6174_s25 + $0x94] sm:$0xf] }
 0x116   : > { %5899 = vmatprep.mubr.msk.bf16.mxu1 %vm687_vm3, %v8943_v44  ;;  %v3850_v44 = vrot.slane %v3848_v24, 4  ;;  %v3827_v34 = vor.u32 %v3826_v10, %v7914_v18  ;;  %v3794_v51 = vrot.slane %v3793_v30, 4  ;;  %v3804_v11 = vrot.slane %v3803_v55, 4 }
 0x117   : > { %v4413_v62 = vrot.slane %v4411_v54, 4  ;;  %v3832_v14 = vrot.slane %v3830_v46, 5  ;;  %v8945_v24 = vcombine.low %v7582_v61, %v7586_v40  ;;  %v5501_v56 = vrot.slane %v5485_v33, 9 }
 0x118   : > { %v4420_v35 = vrot.slane %v4418_v15, 4  ;;  %v4421_v10 = vrot.slane %v7901_v60, 5  ;;  %v3854_v41 = vshll.u32 %v7935_v32, 16  ;;  %v3851_v30 = vor.u32 %v3850_v44, %v7938_v2 }
 0x119   : > { %v3859_v55 = vshrl.u32 %v5426_v8, 16  ;;  %v3862_v46 = vshll.u32 %v5426_v8, 16  ;;  %v8947_v61 = vcombine.low %v7501_v9, %v7506_v47  ;;  %v3818_v40 = vrot.slane %v3817_v16, 4 }
 0x11a   : > { %v7945_v28 = vpop.f32.mrf.mxu0  ;;  %5934 = vmatmul.mubr.msk.bf16.gmra.mxu0 %vm687_vm3, %v6089_v13  ;;  %v3841_v13 = vor.u32 %v3840_v7, %v3837_v37  ;;  %v3828_v33 = vrot.slane %v3827_v34, 4  ;;  %v3868_v60 = vshll.u32 %v7949_v59, 16  ;;  %v3785_v37 = vsel %vm6218_vm4, %v7926_v3, %v7871_v25 }
 0x11b   : > { %5973 = vmatprep.mubr.msk.bf16.mxu0 %vm687_vm3, %v8945_v24  ;;  %v3872_v24 = vshrl.u32 %v7949_v59, 16  ;;  %v3799_v9 = vsel %vm6218_vm4, %v3794_v51, %v7888_v50  ;;  %v7981_v47 = vsel %vm6504_vm7, %v5500_v26, %v4411_v54  ;;  %v7985_v7 = vsel %vm6504_vm7, %v4413_v62, %v4414_v49  ;;  %v5486_v54 = vld [vmem:[%s6174_s25 + $0x84] sm:$0xe]  ;;  %v8986_v31 = vld [vmem:[#allocation24_spill] sm:$0xff] }
 0x11c   : > { %v7957_v19 = vpop.f32.mrf.mxu0  ;;  %v7993_v25 = vsel %vm6504_vm7, %v5501_v56, %v4418_v15  ;;  %v7997_v50 = vsel %vm6504_vm7, %v4420_v35, %v4421_v10  ;;  %v3856_v3 = vrot.slane %v3854_v41, 5  ;;  %v3842_v62 = vrot.slane %v3841_v13, 4  ;;  %v8021_v13 = vld [vmem:[%s6174_s25 + $0x98] sm:$0x1] }
 0x11d   : > { %8946 = vst [vmem:[#allocation25_spill] sm:$0xff] %v7957_v19  ;;  %v7960_v42 = vpop.f32.mrf.mxu1  ;;  %5900 = vmatmul.mubr.msk.bf16.gmra.mxu1 %vm687_vm3, %v8947_v61  ;;  %v3852_v49 = vrot.slane %v3851_v30, 4  ;;  %v3861_v16 = vrot.slane %v3859_v55, 4  ;;  %v3864_v34 = vrot.slane %v3862_v46, 5  ;;  %v3823_v15 = vsel %vm6218_vm4, %v3818_v40, %v7914_v18  ;;  %v5429_v30 = vld [vmem:[%s6174_s25 + $0x9c] sm:$0xf] }
 0x11e   : > { %v7968_v19 = vpop.f32.mrf.mxu0  ;;  %5939 = vmatprep.mubr.msk.bf16.mxu1 %vm687_vm3, %v7652_v27  ;;  %v3809_v27 = vsel %vm6218_vm4, %v3804_v11, %v3808_v45  ;;  %v3833_v45 = vsel %vm6218_vm4, %v3828_v33, %v3832_v14  ;;  %v8009_v51 = vrot.slane %v3868_v60, 5  ;;  %v3874_v11 = vrot.slane %v3872_v24, 4  ;;  %v8052_v24 = vld [vmem:[%s6174_s25 + $0xa0] sm:$0xf] }
 0x11f   : > { %v7987_v44 = vpop.f32.mrf.mxu1  ;;  %v8948_v35 = vcombine.low %v7622_v48, %v7626_v38  ;;  %v5515_v10 = vcombine.low %v7845_v43, %v7862_v17  ;;  %v5516_v41 = vcombine.low %v7897_v58, %v7930_v36  ;;  %v5502_v18 = vrot.slane %v5486_v54, 9 }
 0x120   : > { %v8000_v26 = vpop.f32.mrf.mxu0  ;;  %v4425_v14 = vrot.slane %v7883_v4, 5  ;;  %v8949_v48 = vcombine.low %v7705_v6, %v7709_v22  ;;  %v8950_v38 = vsel %vm6218_vm4, %v7864_v29, %v7823_v39  ;;  %v8037_v61 = vcombine.low %v3799_v9, %v3809_v27  ;;  %v5487_v29 = vld [vmem:[%s6174_s25 + $0x90] sm:$0xe]  ;;  %v8957_v4 = vld [vmem:[#allocation2_spill] sm:$0xff] }
 0x121   : > { %v8002_v8 = vpop.f32.mrf.mxu1  ;;  %v8035_v46 = vcombine.low %v8950_v38, %v3785_v37  ;;  %v8043_v60 = vcombine.low %v3823_v15, %v3833_v45  ;;  %v3847_v6 = vsel %vm6218_vm4, %v3842_v62, %v7938_v2  ;;  %v3857_v22 = vsel %vm6218_vm4, %v3852_v49, %v3856_v3 }
 0x122   : > { %v5771_v56 = vpop.f32.mrf.mxu0  ;;  %5974 = vmatmul.mubr.msk.bf16.vlgmr.msra.gmra.mxu0 %vm687_vm3, %v8948_v35  ;;  %v3865_v39 = vor.u32 %v3864_v34, %v3861_v16  ;;  %v3875_v9 = vor.u32 %v3874_v11, %v8009_v51  ;;  %v3878_v27 = vshll.u32 %v8021_v13, 16  ;;  %v3883_v54 = vshrl.u32 %v5429_v30, 16 }
 0x123   : > { %v8024_v55 = vpop.f32.mrf.mxu1  ;;  %5977 = vmatprep.mubr.msk.bf16.mxu0 %vm687_vm3, %v8949_v48  ;;  %v3886_v15 = vshll.u32 %v5429_v30, 16  ;;  %v8063_v3 = vsel %vm6504_vm7, %v5502_v18, %v4425_v14  ;;  %v4427_v62 = vrot.slane %v4425_v14, 4  ;;  %v4428_v49 = vrot.slane %v7935_v32, 5 }
 0x124   : > { %v1491_v33 = vpop.f32.mrf.mxu0  ;;  %v5503_v16 = vrot.slane %v5487_v29, 9  ;;  %v4432_v34 = vrot.slane %v7949_v59, 5  ;;  %v3892_v11 = vshll.u32 %v8052_v24, 16  ;;  %v3896_v35 = vshrl.u32 %v8052_v24, 16 }
 0x125   : > { %v5737_v37 = vpop.f32.mrf.mxu1  ;;  %5940 = vmatmul.mubr.msk.bf16.vlgmr.msra.gmra.mxu1 %vm687_vm3, %v7654_v57  ;;  %v8072_v48 = vcombine.low %v3847_v6, %v3857_v22  ;;  %v8074_v18 = vrot.slane %v3865_v39, 4  ;;  %v3876_v32 = vrot.slane %v3875_v9, 4  ;;  %v3880_v38 = vrot.slane %v3878_v27, 5  ;;  %v5432_v22 = vld [vmem:[%s6174_s25 + $0xa8] sm:$0xf] }
 0x126   : > { %v1075_v45 = vadd.f32 %v5737_v37, %v7550_v5  ;;  %v5772_v2 = vpop.f32.mrf.mxu0  ;;  %5943 = vmatprep.mubr.msk.bf16.mxu1 %vm687_vm3, %v7801_v23  ;;  %v3885_v29 = vrot.slane %v3883_v54, 4  ;;  %v3888_v59 = vrot.slane %v3886_v15, 5  ;;  %v4435_v6 = vrot.slane %v8021_v13, 5  ;;  %v8100_v27 = vld [vmem:[%s6174_s25 + $0xac] sm:$0xf] }
 0x127   : > { %v1066_v57 = vpop.f32.mrf.mxu1  ;;  %v3898_v9 = vrot.slane %v3896_v35, 4  ;;  %v8954_v35 = vld [vmem:[#allocation8_spill] sm:$0xff] }
 0x128   : > { %v8069_v5 = vadd.f32 %v5771_v56, %v1075_v45  ;;  %v1067_v23 = vadd.f32 %v1066_v57, %v7574_v20  ;;  %v1494_v30 = vpop.f32.mrf.mxu0  ;;  %v8951_v45 = vcombine.low %v7742_v63, %v7768_v52  ;;  %v8085_v20 = vsel %vm6504_vm7, %v4427_v62, %v4428_v49  ;;  %v5488_v62 = vld [vmem:[%s6174_s25 + $0x9c] sm:$0xe] }
 0x129   : > { %v5738_v14 = vpop.f32.mrf.mxu1  ;;  %v4434_v63 = vrot.slane %v4432_v34, 4  ;;  %v8097_v52 = vrot.slane %v3892_v11, 5  ;;  %v4439_v49 = vrot.slane %v8052_v24, 5  ;;  %v3916_v24 = vshll.u32 %v8100_v27, 16 }
 0x12a   : > { %v8076_v37 = vadd.f32 %v1491_v33, %v1067_v23  ;;  %v1078_v40 = vadd.f32 %v5738_v14, %v7593_v53  ;;  %v5775_v56 = vpop.f32.mrf.mxu0  ;;  %5978 = vmatmul.mubr.msk.bf16.gmra.mxu0 %vm687_vm3, %v8951_v45  ;;  %v8952_v33 = vcombine.low %v7807_v21, %v7811_v1  ;;  %v8095_v53 = vsel %vm6504_vm7, %v5503_v16, %v4432_v34  ;;  %v5431_v1 = vld [vmem:[%s6174_s25 + $0xa4] sm:$0x1]  ;;  %v8953_v16 = vld [vmem:[#allocation11_spill] sm:$0xff] }
 0x12b   : > { %v1069_v39 = vpop.f32.mrf.mxu1  ;;  %v3871_v21 = vsel %vm6218_vm4, %v8074_v18, %v8009_v51  ;;  %v3907_v34 = vshrl.u32 %v5432_v22, 16  ;;  %v8955_v51 = vld [vmem:[#allocation16_spill] sm:$0xff]  ;;  %v3920_v18 = vshrl.u32 %v8100_v27, 16 }
 0x12c   : > { %5981 = vmatprep.mubr.msk.bf16.mxu0 %vm687_vm3, %v8952_v33  ;;  %v8102_v54 = vadd.f32 %v5772_v2, %v1078_v40  ;;  %v1070_v13 = vadd.f32 %v1069_v39, %v7638_v12  ;;  %v1507_v15 = vpop.f32.mrf.mxu0  ;;  %v3881_v40 = vsel %vm6218_vm4, %v3876_v32, %v3880_v38  ;;  %v3889_v2 = vor.u32 %v3888_v59, %v3885_v29  ;;  %v8956_v59 = vld [vmem:[#allocation12_spill] sm:$0xff] }
 0x12d   : > { %v5741_v57 = vpop.f32.mrf.mxu1  ;;  %5944 = vmatmul.mubr.msk.bf16.gmra.mxu1 %vm687_vm3, %v8953_v16  ;;  %v3910_v12 = vshll.u32 %v5432_v22, 16  ;;  %v8125_v39 = vsel %vm6504_vm7, %v4434_v63, %v4435_v6  ;;  %v3899_v32 = vor.u32 %v3898_v9, %v8097_v52  ;;  %v3902_v38 = vshll.u32 %v5431_v1, 16 }
 0x12e   : > { %v8116_v11 = vadd.f32 %v1494_v30, %v1070_v13  ;;  %v1091_v23 = vadd.f32 %v5741_v57, %v8954_v35  ;;  %v5776_v14 = vpop.f32.mrf.mxu0  ;;  %5947 = vmatprep.mubr.msk.bf16.mxu1 %vm687_vm3, %v8955_v51  ;;  %v5504_v30 = vrot.slane %v5488_v62, 9  ;;  %v4441_v13 = vrot.slane %v4439_v49, 4 }
 0x12f   : > { %v1082_v45 = vpop.f32.mrf.mxu1  ;;  %v4442_v57 = vrot.slane %v5431_v1, 5  ;;  %v8133_v51 = vrot.slane %v3889_v2, 4  ;;  %v3909_v6 = vrot.slane %v3907_v34, 4  ;;  %v3912_v63 = vrot.slane %v3910_v12, 5  ;;  %v8143_v1 = vld [vmem:[%s6174_s25 + $0xb0] sm:$0x1] }
 0x130   : > { %v8128_v29 = vadd.f32 %v5775_v56, %v1091_v23  ;;  %v1083_v22 = vadd.f32 %v1082_v45, %v8956_v59  ;;  %v1510_v33 = vpop.f32.mrf.mxu0  ;;  %v8145_v23 = vrot.slane %v3916_v24, 5  ;;  %v3922_v2 = vrot.slane %v3920_v18, 4  ;;  %v8958_v12 = vld [vmem:[#allocation14_spill] sm:$0xff] }
 0x131   : > { %v5742_v16 = vpop.f32.mrf.mxu1  ;;  %v8155_v43 = vrot.slane %v3899_v32, 4  ;;  %v8157_v17 = vrot.slane %v3902_v38, 5  ;;  %v8165_v58 = vsel %vm6504_vm7, %v5504_v30, %v4439_v49  ;;  %v8169_v36 = vsel %vm6504_vm7, %v4441_v13, %v4442_v57  ;;  %v8181_v30 = vld [vmem:[%s6174_s25 + $0xb8] sm:$0xf] }
 0x132   : > { %v8135_v9 = vadd.f32 %v1507_v15, %v1083_v22  ;;  %v1094_v62 = vadd.f32 %v5742_v16, %v8957_v4  ;;  %v5779_v56 = vpop.f32.mrf.mxu0  ;;  %5982 = vmatmul.mubr.msk.bf16.gmra.mxu0 %vm687_vm3, %v5515_v10  ;;  %v8151_v15 = vcombine.low %v3871_v21, %v3881_v40  ;;  %v5489_v10 = vld [vmem:[%s6174_s25 + $0xa8] sm:$0xe]  ;;  %v3913_v32 = vor.u32 %v3912_v63, %v3909_v6  ;;  %v8960_v22 = vld [vmem:[#allocation9_spill] sm:$0xff] }
 0x133   : > { %v1085_v45 = vpop.f32.mrf.mxu1  ;;  %5985 = vmatprep.mubr.msk.bf16.mxu0 %vm687_vm3, %v5516_v41  ;;  %v5435_v41 = vld [vmem:[%s6174_s25 + $0xb4] sm:$0xf]  ;;  %v8959_v40 = vld [vmem:[#allocation19_spill] sm:$0xff]  ;;  %v3926_v38 = vshll.u32 %v8143_v1, 16  ;;  %v4446_v49 = vrot.slane %v8100_v27, 5  ;;  %v3923_v16 = vor.u32 %v3922_v2, %v8145_v23  ;;  %v3905_v27 = vsel %vm6218_vm4, %v8155_v43, %v8157_v17 }
 0x134   : > { %v8160_v34 = vadd.f32 %v5776_v14, %v1094_v62  ;;  %v1086_v24 = vadd.f32 %v1085_v45, %v8958_v12  ;;  %v1523_v18 = vpop.f32.mrf.mxu0  ;;  %v5505_v62 = vrot.slane %v5489_v10, 9  ;;  %v3931_v6 = vshrl.u32 %v5435_v41, 16 }
 0x135   : > { %v5745_v21 = vpop.f32.mrf.mxu1  ;;  %5948 = vmatmul.mubr.msk.bf16.gmra.mxu1 %vm687_vm3, %v8959_v40  ;;  %v3934_v63 = vshll.u32 %v5435_v41, 16  ;;  %v3940_v2 = vshll.u32 %v8181_v30, 16  ;;  %v3944_v10 = vshrl.u32 %v8181_v30, 16  ;;  %v5438_v40 = vld [vmem:[%s6174_s25 + $0xc0] sm:$0xf]  ;;  %v3914_v4 = vrot.slane %v3913_v32, 4 }
 0x136   : > { %v8183_v59 = vadd.f32 %v1510_v33, %v1086_v24  ;;  %v1107_v13 = vadd.f32 %v5745_v21, %v8960_v22  ;;  %v5780_v57 = vpop.f32.mrf.mxu0  ;;  %5951 = vmatprep.mubr.msk.bf16.mxu1 %vm687_vm3, %v8035_v46  ;;  %v8962_v24 = vld [vmem:[#allocation18_spill] sm:$0xff]  ;;  %v3928_v43 = vrot.slane %v3926_v38, 5  ;;  %v4448_v17 = vrot.slane %v4446_v49, 4 }
 0x137   : > { %v1098_v45 = vpop.f32.mrf.mxu1  ;;  %v4449_v33 = vrot.slane %v8143_v1, 5  ;;  %v8211_v14 = vsel %vm6504_vm7, %v5505_v62, %v4446_v49  ;;  %v8214_v32 = vld [vmem:[%s6174_s25 + $0xc4] sm:$0xf]  ;;  %v8966_v1 = vcombine.low %v7993_v25, %v7997_v50  ;;  %v8226_v62 = vrot.slane %v3940_v2, 5 }
 0x138   : > { %v8195_v12 = vadd.f32 %v5779_v56, %v1107_v13  ;;  %v1099_v21 = vadd.f32 %v1098_v45, %v8962_v24  ;;  %v1526_v46 = vpop.f32.mrf.mxu0  ;;  %v8964_v56 = vld [vmem:[#allocation21_spill] sm:$0xff]  ;;  %v8965_v45 = vcombine.low %v7981_v47, %v7985_v7  ;;  %v3924_v24 = vrot.slane %v3923_v16, 4  ;;  %v8967_v16 = vld [vmem:[#allocation23_spill] sm:$0xff] }
 0x139   : > { %v5746_v22 = vpop.f32.mrf.mxu1  ;;  %v3955_v47 = vshrl.u32 %v5438_v40, 16  ;;  %v3958_v7 = vshll.u32 %v5438_v40, 16  ;;  %v3919_v25 = vsel %vm6218_vm4, %v3914_v4, %v8145_v23  ;;  %v8235_v50 = vsel %vm6504_vm7, %v4448_v17, %v4449_v33  ;;  %v5490_v40 = vld [vmem:[%s6174_s25 + $0xb4] sm:$0xe] }
 0x13a   : > { %8961 = vst [vmem:[#allocation11_spill] sm:$0xff] %v8195_v12  ;;  %v8202_v35 = vadd.f32 %v1523_v18, %v1099_v21  ;;  %v1110_v41 = vadd.f32 %v5746_v22, %v8964_v56  ;;  %v5783_v13 = vpop.f32.mrf.mxu0  ;;  %5986 = vmatmul.mubr.msk.bf16.gmra.mxu0 %vm687_vm3, %v8965_v45  ;;  %v8221_v18 = vld [vmem:[%s6174_s25 + $0xbc] sm:$0x1]  ;;  %v3933_v21 = vrot.slane %v3931_v6, 4  ;;  %v3936_v22 = vrot.slane %v3934_v63, 5 }
 0x13b   : > { %v1101_v38 = vpop.f32.mrf.mxu1  ;;  %5989 = vmatprep.mubr.msk.bf16.mxu0 %vm687_vm3, %v8966_v1  ;;  %v3968_v6 = vshrl.u32 %v8214_v32, 16  ;;  %v3950_v23 = vshll.u32 %v8221_v18, 16  ;;  %v4453_v17 = vrot.slane %v8181_v30, 5  ;;  %v8968_v1 = vld [vmem:[#allocation25_spill] sm:$0xff] }
 0x13c   : > { %8963 = vst [vmem:[#allocation8_spill] sm:$0xff] %v8202_v35  ;;  %v8223_v56 = vadd.f32 %v5780_v57, %v1110_v41  ;;  %v1102_v45 = vadd.f32 %v1101_v38, %v8967_v16  ;;  %v1539_v49 = vpop.f32.mrf.mxu0  ;;  %v3946_v35 = vrot.slane %v3944_v10, 4  ;;  %v3964_v57 = vshll.u32 %v8214_v32, 16 }
 0x13d   : > { %v5749_v12 = vpop.f32.mrf.mxu1  ;;  %5952 = vmatmul.mubr.msk.bf16.gmra.mxu1 %vm687_vm3, %v8037_v61  ;;  %v3929_v61 = vsel %vm6218_vm4, %v3924_v24, %v3928_v43  ;;  %v3937_v33 = vor.u32 %v3936_v22, %v3933_v21  ;;  %v3957_v41 = vrot.slane %v3955_v47, 4  ;;  %v3960_v38 = vrot.slane %v3958_v7, 5 }
 0x13e   : > { %v8239_v63 = vadd.f32 %v1526_v46, %v1102_v45  ;;  %v1123_v2 = vadd.f32 %v5749_v12, %v7945_v28  ;;  %v5784_v10 = vpop.f32.mrf.mxu0  ;;  %5955 = vmatprep.mubr.msk.bf16.mxu1 %vm687_vm3, %v8043_v60  ;;  %v8969_v60 = vsel %vm6218_vm4, %v8133_v51, %v8097_v52  ;;  %v3947_v24 = vor.u32 %v3946_v35, %v8226_v62 }
 0x13f   : > { %v1114_v4 = vpop.f32.mrf.mxu1  ;;  %v8257_v43 = vcombine.low %v8969_v60, %v3905_v27  ;;  %v8260_v30 = vcombine.low %v3919_v25, %v3929_v61  ;;  %v8264_v22 = vrot.slane %v3964_v57, 5  ;;  %v3970_v47 = vrot.slane %v3968_v6, 4  ;;  %v5440_v27 = vld [vmem:[%s6174_s25 + $0xc8] sm:$0x1] }
 0x140   : > { %v8249_v46 = vadd.f32 %v5783_v13, %v1123_v2  ;;  %v1115_v28 = vadd.f32 %v1114_v4, %v8968_v1  ;;  %v1542_v12 = vpop.f32.mrf.mxu0  ;;  %v5522_v13 = vcombine.low %v8211_v14, %v8235_v50  ;;  %v8970_v52 = vcombine.low %v8063_v3, %v8085_v20  ;;  %v5441_v14 = vld [vmem:[%s6174_s25 + $0xcc] sm:$0xf]  ;;  %v8285_v20 = vld [vmem:[%s6174_s25 + $0xd0] sm:$0xf]  ;;  %v5491_v4 = vld [vmem:[%s6174_s25 + $0xc0] sm:$0xe] }
 0x141   : > { %v5750_v21 = vpop.f32.mrf.mxu1  ;;  %v8273_v35 = vrot.slane %v3950_v23, 5  ;;  %v5506_v51 = vrot.slane %v5490_v40, 9  ;;  %v8971_v50 = vcombine.low %v8095_v53, %v8125_v39  ;;  %v4456_v57 = vrot.slane %v8221_v18, 5 }
 0x142   : > { %v8266_v7 = vadd.f32 %v1539_v49, %v1115_v28  ;;  %v1126_v16 = vadd.f32 %v5750_v21, %v7968_v19  ;;  %v5787_v45 = vpop.f32.mrf.mxu0  ;;  %5990 = vmatmul.mubr.msk.bf16.gmra.mxu0 %vm687_vm3, %v8970_v52  ;;  %v8281_v49 = vrot.slane %v3937_v33, 4  ;;  %v4455_v19 = vrot.slane %v4453_v17, 4 }
 0x143   : > { %v1117_v25 = vpop.f32.mrf.mxu1  ;;  %5993 = vmatprep.mubr.msk.bf16.mxu0 %vm687_vm3, %v8971_v50  ;;  %v3961_v3 = vor.u32 %v3960_v38, %v3957_v41  ;;  %v8290_v23 = vrot.slane %v3947_v24, 4  ;;  %v4460_v53 = vrot.slane %v8214_v32, 5  ;;  %v3971_v33 = vor.u32 %v3970_v47, %v8264_v22 }
 0x144   : > { %v8287_v6 = vadd.f32 %v5784_v10, %v1126_v16  ;;  %v1118_v2 = vadd.f32 %v1117_v25, %v8000_v26  ;;  %v1555_v61 = vpop.f32.mrf.mxu0  ;;  %v3974_v18 = vshll.u32 %v5440_v27, 16  ;;  %v3979_v40 = vshrl.u32 %v5441_v14, 16  ;;  %v8974_v10 = vld [vmem:[#allocation4_spill] sm:$0xff]  ;;  %v8975_v16 = vld [vmem:[#allocation3_spill] sm:$0xff] }
 0x145   : > { %v5753_v39 = vpop.f32.mrf.mxu1  ;;  %5956 = vmatmul.mubr.msk.bf16.gmra.mxu1 %vm687_vm3, %v8072_v48  ;;  %v3982_v41 = vshll.u32 %v5441_v14, 16  ;;  %v3988_v28 = vshll.u32 %v8285_v20, 16  ;;  %v3992_v32 = vshrl.u32 %v8285_v20, 16  ;;  %v4454_v48 = vsel %vm6504_vm7, %v5506_v51, %v4453_v17  ;;  %v8976_v17 = vld [vmem:[#allocation6_spill] sm:$0xff] }
 0x146   : > { %8972 = vst [vmem:[#allocation16_spill] sm:$0xff] %v8287_v6  ;;  %v8297_v38 = vadd.f32 %v1542_v12, %v1118_v2  ;;  %v1139_v1 = vadd.f32 %v5753_v39, %v8974_v10  ;;  %v5788_v26 = vpop.f32.mrf.mxu0  ;;  %5959 = vmatprep.mubr.msk.bf16.mxu1 %vm687_vm3, %v8151_v15  ;;  %v4457_v24 = vsel %vm6504_vm7, %v4455_v19, %v4456_v57  ;;  %v3962_v21 = vrot.slane %v3961_v3, 4 }
 0x147   : > { %v1130_v60 = vpop.f32.mrf.mxu1  ;;  %v5507_v12 = vrot.slane %v5491_v4, 9  ;;  %v4462_v25 = vrot.slane %v4460_v53, 4  ;;  %v4463_v15 = vrot.slane %v5440_v27, 5  ;;  %v3972_v2 = vrot.slane %v3971_v33, 4  ;;  %v5443_v33 = vld [vmem:[%s6174_s25 + $0xd4] sm:$0x1] }
 0x148   : > { %8973 = vst [vmem:[#allocation12_spill] sm:$0xff] %v8297_v38  ;;  %v8308_v47 = vadd.f32 %v5787_v45, %v1139_v1  ;;  %v1131_v52 = vadd.f32 %v1130_v60, %v8975_v16  ;;  %v1558_v14 = vpop.f32.mrf.mxu0  ;;  %v3976_v39 = vrot.slane %v3974_v18, 5  ;;  %v3981_v10 = vrot.slane %v3979_v40, 4  ;;  %v8978_v18 = vld [vmem:[#allocation5_spill] sm:$0xff] }
 0x149   : > { %v5754_v50 = vpop.f32.mrf.mxu1  ;;  %v3984_v38 = vrot.slane %v3982_v41, 5  ;;  %v8977_v45 = vcombine.low %v8165_v58, %v8169_v36  ;;  %v8318_v57 = vrot.slane %v3988_v28, 5  ;;  %v3994_v27 = vrot.slane %v3992_v32, 4 }
 0x14a   : > { %v8311_v6 = vadd.f32 %v1555_v61, %v1131_v52  ;;  %v1142_v51 = vadd.f32 %v5754_v50, %v8976_v17  ;;  %v5791_v19 = vpop.f32.mrf.mxu0  ;;  %v3943_v61 = vsel %vm6218_vm4, %v8281_v49, %v8226_v62  ;;  %v3953_v4 = vsel %vm6218_vm4, %v8290_v23, %v8273_v35  ;;  %v5492_v62 = vld [vmem:[%s6174_s25 + $0xcc] sm:$0xe] }
 0x14b   : > { %5994 = vmatmul.mubr.msk.bf16.gmra.mxu0 %vm687_vm3, %v8977_v45  ;;  %v1133_v3 = vpop.f32.mrf.mxu1  ;;  %v4467_v58 = vrot.slane %v8285_v20, 5  ;;  %v4464_v1 = vsel %vm6504_vm7, %v4462_v25, %v4463_v15  ;;  %v5523_v35 = vcombine.low %v4454_v48, %v4457_v24  ;;  %v3967_v20 = vsel %vm6218_vm4, %v3962_v21, %v8264_v22  ;;  %v8980_v25 = vld [vmem:[#allocation10_spill] sm:$0xff] }
 0x14c   : > { %5997 = vmatprep.mubr.msk.bf16.mxu0 %vm687_vm3, %v5522_v13  ;;  %v8331_v36 = vadd.f32 %v5788_v26, %v1142_v51  ;;  %v1134_v40 = vadd.f32 %v1133_v3, %v8978_v18  ;;  %v1571_v41 = vpop.f32.mrf.mxu0  ;;  %v4461_v13 = vsel %vm6504_vm7, %v5507_v12, %v4460_v53  ;;  %v3977_v23 = vsel %vm6218_vm4, %v3972_v2, %v3976_v39  ;;  %v8979_v53 = vld [vmem:[#allocation7_spill] sm:$0xff] }
 0x14d   : > { %v5757_v49 = vpop.f32.mrf.mxu1  ;;  %5960 = vmatmul.mubr.msk.bf16.gmra.mxu1 %vm687_vm3, %v8257_v43  ;;  %v3985_v26 = vor.u32 %v3984_v38, %v3981_v10  ;;  %v3995_v12 = vor.u32 %v3994_v27, %v8318_v57  ;;  %v3998_v43 = vshll.u32 %v5443_v33, 16  ;;  %v5524_v24 = vcombine.low %v4461_v13, %v4464_v1 }
 0x14e   : > { %v8346_v28 = vadd.f32 %v1558_v14, %v1134_v40  ;;  %v1155_v32 = vadd.f32 %v5757_v49, %v8979_v53  ;;  %v5792_v60 = vpop.f32.mrf.mxu0  ;;  %5963 = vmatprep.mubr.msk.bf16.mxu1 %vm687_vm3, %v8260_v30  ;;  %v5508_v16 = vrot.slane %v5492_v62, 9  ;;  %v4469_v52 = vrot.slane %v4467_v58, 4  ;;  %v8981_v30 = vld [vmem:[#allocation13_spill] sm:$0xff] }
 0x14f   : > { %v1146_v48 = vpop.f32.mrf.mxu1  ;;  %v4470_v22 = vrot.slane %v5443_v33, 5  ;;  %v5458_v50 = vcombine.low %v3943_v61, %v3953_v4  ;;  %v5459_v2 = vcombine.low %v3967_v20, %v3977_v23  ;;  %v3986_v39 = vrot.slane %v3985_v26, 4  ;;  %v8982_v33 = vld [vmem:[#allocation15_spill] sm:$0xff]  ;;  %v8983_v62 = vld [vmem:[#allocation17_spill] sm:$0xff]  ;;  %v8984_v26 = vld [vmem:[#allocation20_spill] sm:$0xff] }
 0x150   : > { %v8352_v21 = vadd.f32 %v5791_v19, %v1155_v32  ;;  %v1147_v38 = vadd.f32 %v1146_v48, %v8980_v25  ;;  %v1574_v14 = vpop.f32.mrf.mxu0  ;;  %v3996_v45 = vrot.slane %v3995_v12, 4  ;;  %v4000_v27 = vrot.slane %v3998_v43, 5  ;;  %v8985_v43 = vld [vmem:[#allocation22_spill] sm:$0xff] }
 0x151   : > { %v5758_v15 = vpop.f32.mrf.mxu1  ;;  %v4468_v19 = vsel %vm6504_vm7, %v5508_v16, %v4467_v58  ;;  %v4471_v61 = vsel %vm6504_vm7, %v4469_v52, %v4470_v22  ;;  %v3991_v13 = vsel %vm6218_vm4, %v3986_v39, %v8318_v57 }
 0x152   : > { %v8355_v10 = vadd.f32 %v1571_v41, %v1147_v38  ;;  %v1158_v17 = vadd.f32 %v5758_v15, %v8981_v30  ;;  %v5795_v51 = vpop.f32.mrf.mxu0  ;;  %v4001_v0 = vsel %vm6218_vm4, %v3996_v45, %v4000_v27 }
 0x153   : > { %5998 = vmatmul.mubr.msk.bf16.gmra.mxu0 %vm687_vm3, %v5523_v35  ;;  %v1149_v3 = vpop.f32.mrf.mxu1  ;;  %v5525_v35 = vcombine.low %v4468_v19, %v4471_v61  ;;  %v5460_v12 = vcombine.low %v3991_v13, %v4001_v0 }
 0x154   : > { %6001 = vmatprep.mubr.msk.bf16.mxu0 %vm687_vm3, %v5524_v24  ;;  %v8364_v4 = vadd.f32 %v5792_v60, %v1158_v17  ;;  %v1150_v18 = vadd.f32 %v1149_v3, %v8982_v33  ;;  %v1587_v40 = vpop.f32.mrf.mxu0 }
 0x155   : > { %v5761_v41 = vpop.f32.mrf.mxu1  ;;  %5964 = vmatmul.mubr.msk.bf16.gmra.mxu1 %vm687_vm3, %v5458_v50 }
 0x156   : > { %v8371_v1 = vadd.f32 %v1574_v14, %v1150_v18  ;;  %v1171_v49 = vadd.f32 %v5761_v41, %v8983_v62  ;;  %v5796_v58 = vpop.f32.mrf.mxu0  ;;  %5967 = vmatprep.mubr.msk.bf16.mxu1 %vm687_vm3, %v5459_v2 }
 0x157   : > { %v1162_v20 = vpop.f32.mrf.mxu1 }
 0x158   : > { %v8377_v23 = vadd.f32 %v5795_v51, %v1171_v49  ;;  %v1163_v53 = vadd.f32 %v1162_v20, %v8984_v26  ;;  %v1590_v32 = vpop.f32.mrf.mxu0 }
 0x159   : > { %v5762_v60 = vpop.f32.mrf.mxu1 }
 0x15a   : > { %v8380_v57 = vadd.f32 %v1587_v40, %v1163_v53  ;;  %v1174_v48 = vadd.f32 %v5762_v60, %v8985_v43  ;;  %v5799_v24 = vpop.f32.mrf.mxu0 }
 0x15b   : > { %6002 = vmatmul.mubr.msk.bf16.gmra.mxu0 %vm687_vm3, %v5525_v35  ;;  %v1165_v16 = vpop.f32.mrf.mxu1 }
 0x15c   : > { %v8384_v52 = vadd.f32 %v5796_v58, %v1174_v48  ;;  %v1166_v22 = vadd.f32 %v1165_v16, %v8986_v31  ;;  %v1603_v25 = vpop.f32.mrf.mxu0 }
 0x15d   : > { %v5765_v38 = vpop.f32.mrf.mxu1  ;;  %5968 = vmatmul.mubr.msk.bf16.gmra.mxu1 %vm687_vm3, %v5460_v12 }
 0x15e   : > { %v8388_v14 = vadd.f32 %v1590_v32, %v1166_v22  ;;  %v1187_v15 = vadd.f32 %v5765_v38, %v7960_v42  ;;  %v5800_v50 = vpop.f32.mrf.mxu0 }
 0x15f   : > { %v1178_v2 = vpop.f32.mrf.mxu1 }
 0x160   : > { %v8391_v39 = vadd.f32 %v5799_v24, %v1187_v15  ;;  %v1179_v30 = vadd.f32 %v1178_v2, %v7987_v44  ;;  %v1606_v17 = vpop.f32.mrf.mxu0 }
 0x161   : > { %v5766_v51 = vpop.f32.mrf.mxu1 }
 0x162   : > { %v8394_v45 = vadd.f32 %v1603_v25, %v1179_v30  ;;  %v1190_v27 = vadd.f32 %v5766_v51, %v8002_v8  ;;  %v5839_v3 = vpop.f32.mrf.mxu0  ;;  %v8987_v30 = vld [vmem:[#allocation11_spill] sm:$0xff] }
 0x163   : > { %v1181_v19 = vpop.f32.mrf.mxu1 }
 0x164   : > { %v8397_v61 = vadd.f32 %v5800_v50, %v1190_v27  ;;  %v1182_v33 = vadd.f32 %v1181_v19, %v8024_v55  ;;  %v2579_v18 = vpop.f32.mrf.mxu0 }
 0x165   : > { %v5805_v42 = vpop.f32.mrf.mxu1 }
 0x166   : > { %v8400_v40 = vadd.f32 %v1606_v17, %v1182_v33  ;;  %v1982_v41 = vadd.f32 %v5805_v42, %v8069_v5  ;;  %v5840_v13 = vpop.f32.mrf.mxu0 }
 0x167   : > { %v1853_v44 = vpop.f32.mrf.mxu1 }
 0x168   : > { %v8403_v62 = vadd.f32 %v5839_v3, %v1982_v41  ;;  %v1980_v49 = vadd.f32 %v1853_v44, %v8076_v37  ;;  %v2582_v58 = vpop.f32.mrf.mxu0  ;;  %v8988_v3 = vld [vmem:[#allocation8_spill] sm:$0xff] }
 0x169   : > { %v5806_v8 = vpop.f32.mrf.mxu1 }
 0x16a   : > { %v8406_v0 = vadd.f32 %v2579_v18, %v1980_v49  ;;  %v1983_v35 = vadd.f32 %v5806_v8, %v8102_v54  ;;  %v5843_v20 = vpop.f32.mrf.mxu0 }
 0x16b   : > { %v1856_v55 = vpop.f32.mrf.mxu1 }
 0x16c   : > { %v8409_v26 = vadd.f32 %v5840_v13, %v1983_v35  ;;  %v1981_v53 = vadd.f32 %v1856_v55, %v8116_v11  ;;  %v2595_v32 = vpop.f32.mrf.mxu0 }
 0x16d   : > { %v5809_v5 = vpop.f32.mrf.mxu1 }
 0x16e   : > { %v8412_v60 = vadd.f32 %v2582_v58, %v1981_v53  ;;  %v1986_v12 = vadd.f32 %v5809_v5, %v8128_v29  ;;  %v5844_v43 = vpop.f32.mrf.mxu0 }
 0x16f   : > { %v1869_v37 = vpop.f32.mrf.mxu1 }
 0x170   : > { %v8415_v48 = vadd.f32 %v5843_v20, %v1986_v12  ;;  %v1984_v24 = vadd.f32 %v1869_v37, %v8135_v9  ;;  %v2598_v16 = vpop.f32.mrf.mxu0 }
 0x171   : > { %v5810_v54 = vpop.f32.mrf.mxu1 }
 0x172   : > { %v8418_v31 = vadd.f32 %v2595_v32, %v1984_v24  ;;  %v1987_v22 = vadd.f32 %v5810_v54, %v8160_v34  ;;  %v5847_v25 = vpop.f32.mrf.mxu0  ;;  %v8990_v54 = vld [vmem:[#allocation12_spill] sm:$0xff] }
 0x173   : > { %v1872_v11 = vpop.f32.mrf.mxu1 }
 0x174   : > { %v8421_v38 = vadd.f32 %v5844_v43, %v1987_v22  ;;  %v1985_v15 = vadd.f32 %v1872_v11, %v8183_v59  ;;  %v2611_v50 = vpop.f32.mrf.mxu0  ;;  %v8989_v43 = vld [vmem:[#allocation16_spill] sm:$0xff] }
 0x175   : > { %v5813_v29 = vpop.f32.mrf.mxu1 }
 0x176   : > { %v8424_v2 = vadd.f32 %v2598_v16, %v1985_v15  ;;  %v1990_v17 = vadd.f32 %v5813_v29, %v8987_v30  ;;  %v5848_v51 = vpop.f32.mrf.mxu0 }
 0x177   : > { %v1885_v9 = vpop.f32.mrf.mxu1 }
 0x178   : > { %v8427_v27 = vadd.f32 %v5847_v25, %v1990_v17  ;;  %v1988_v19 = vadd.f32 %v1885_v9, %v8988_v3  ;;  %v2614_v33 = vpop.f32.mrf.mxu0 }
 0x179   : > { %v5814_v34 = vpop.f32.mrf.mxu1 }
 0x17a   : > { %v8430_v18 = vadd.f32 %v2611_v50, %v1988_v19  ;;  %v1991_v42 = vadd.f32 %v5814_v34, %v8223_v56  ;;  %v5851_v41 = vpop.f32.mrf.mxu0 }
 0x17b   : > { %v1888_v59 = vpop.f32.mrf.mxu1 }
 0x17c   : > { %v8433_v13 = vadd.f32 %v5848_v51, %v1991_v42  ;;  %v1989_v44 = vadd.f32 %v1888_v59, %v8239_v63  ;;  %v2627_v49 = vpop.f32.mrf.mxu0 }
 0x17d   : > { %v5817_v58 = vpop.f32.mrf.mxu1 }
 0x17e   : > { %v8436_v8 = vadd.f32 %v2614_v33, %v1989_v44  ;;  %v1994_v35 = vadd.f32 %v5817_v58, %v8249_v46  ;;  %v5852_v20 = vpop.f32.mrf.mxu0 }
 0x17f   : > { %v1901_v55 = vpop.f32.mrf.mxu1 }
 0x180   : > { %v8439_v53 = vadd.f32 %v5851_v41, %v1994_v35  ;;  %v1992_v32 = vadd.f32 %v1901_v55, %v8266_v7  ;;  %v2630_v5 = vpop.f32.mrf.mxu0 }
 0x181   : > { %v5818_v56 = vpop.f32.mrf.mxu1 }
 0x182   : > { %v8442_v12 = vadd.f32 %v2627_v49, %v1992_v32  ;;  %v1995_v37 = vadd.f32 %v5818_v56, %v8989_v43  ;;  %v5855_v24 = vpop.f32.mrf.mxu0 }
 0x183   : > { %v1904_v63 = vpop.f32.mrf.mxu1 }
 0x184   : > { %v8445_v16 = vadd.f32 %v5852_v20, %v1995_v37  ;;  %v1993_v22 = vadd.f32 %v1904_v63, %v8990_v54  ;;  %v2643_v25 = vpop.f32.mrf.mxu0 }
 0x185   : > { %v5821_v46 = vpop.f32.mrf.mxu1 }
 0x186   : > { %v8448_v11 = vadd.f32 %v2630_v5, %v1993_v22  ;;  %v1998_v15 = vadd.f32 %v5821_v46, %v8308_v47  ;;  %v5856_v50 = vpop.f32.mrf.mxu0 }
 0x187   : > { %v1917_v7 = vpop.f32.mrf.mxu1 }
 0x188   : > { %v8451_v29 = vadd.f32 %v5855_v24, %v1998_v15  ;;  %v1996_v30 = vadd.f32 %v1917_v7, %v8311_v6  ;;  %v2646_v17 = vpop.f32.mrf.mxu0 }
 0x189   : > { %v5822_v51 = vpop.f32.mrf.mxu1 }
 0x18a   : > { %v8454_v9 = vadd.f32 %v2643_v25, %v1996_v30  ;;  %v1999_v3 = vadd.f32 %v5822_v51, %v8331_v36  ;;  %v5859_v19 = vpop.f32.mrf.mxu0 }
 0x18b   : > { %v1920_v33 = vpop.f32.mrf.mxu1 }
 0x18c   : > { %v8457_v34 = vadd.f32 %v5856_v50, %v1999_v3  ;;  %v1997_v42 = vadd.f32 %v1920_v33, %v8346_v28  ;;  %v2659_v41 = vpop.f32.mrf.mxu0 }
 0x18d   : > { %v5825_v47 = vpop.f32.mrf.mxu1 }
 0x18e   : > { %8991 = vst [vmem:[#allocation2_spill] sm:$0xff] %v8457_v34  ;;  %v8460_v59 = vadd.f32 %v2646_v17, %v1997_v42  ;;  %v2002_v44 = vadd.f32 %v5825_v47, %v8352_v21  ;;  %v5860_v49 = vpop.f32.mrf.mxu0 }
 0x18f   : > { %v1933_v6 = vpop.f32.mrf.mxu1 }
 0x190   : > { %8992 = vst [vmem:[#allocation14_spill] sm:$0xff] %v8460_v59  ;;  %v8463_v58 = vadd.f32 %v5859_v19, %v2002_v44  ;;  %v2000_v35 = vadd.f32 %v1933_v6, %v8355_v10  ;;  %v2662_v20 = vpop.f32.mrf.mxu0 }
 0x191   : > { %v5826_v36 = vpop.f32.mrf.mxu1 }
 0x192   : > { %8993 = vst [vmem:[#allocation19_spill] sm:$0xff] %v8463_v58  ;;  %v8466_v55 = vadd.f32 %v2659_v41, %v2000_v35  ;;  %v2003_v32 = vadd.f32 %v5826_v36, %v8364_v4  ;;  %v5863_v5 = vpop.f32.mrf.mxu0 }
 0x193   : > { %v1936_v28 = vpop.f32.mrf.mxu1 }
 0x194   : > { %8994 = vst [vmem:[#allocation9_spill] sm:$0xff] %v8466_v55  ;;  %v8469_v56 = vadd.f32 %v5860_v49, %v2003_v32  ;;  %v2001_v43 = vadd.f32 %v1936_v28, %v8371_v1  ;;  %v2675_v37 = vpop.f32.mrf.mxu0 }
 0x195   : > { %v5829_v21 = vpop.f32.mrf.mxu1 }
 0x196   : > { %8995 = vst [vmem:[#allocation18_spill] sm:$0xff] %v8469_v56  ;;  %v8472_v24 = vadd.f32 %v2662_v20, %v2001_v43  ;;  %v2006_v63 = vadd.f32 %v5829_v21, %v8377_v23  ;;  %v5864_v54 = vpop.f32.mrf.mxu0 }
 0x197   : > { %v1949_v10 = vpop.f32.mrf.mxu1 }
 0x198   : > { %8996 = vst [vmem:[#allocation21_spill] sm:$0xff] %v8472_v24  ;;  %v8475_v22 = vadd.f32 %v5863_v5, %v2006_v63  ;;  %v2004_v25 = vadd.f32 %v1949_v10, %v8380_v57  ;;  %v2678_v46 = vpop.f32.mrf.mxu0 }
 0x199   : > { %v5830_v4 = vpop.f32.mrf.mxu1 }
 0x19a   : > { %8997 = vst [vmem:[#allocation23_spill] sm:$0xff] %v8475_v22  ;;  %v8478_v15 = vadd.f32 %v2675_v37, %v2004_v25  ;;  %v2007_v50 = vadd.f32 %v5830_v4, %v8384_v52  ;;  %v5867_v7 = vpop.f32.mrf.mxu0 }
 0x19b   : > { %v1952_v1 = vpop.f32.mrf.mxu1 }
 0x19c   : > { %8998 = vst [vmem:[#allocation25_spill] sm:$0xff] %v8478_v15  ;;  %v8481_v30 = vadd.f32 %v5864_v54, %v2007_v50  ;;  %v2005_v17 = vadd.f32 %v1952_v1, %v8388_v14  ;;  %v2691_v51 = vpop.f32.mrf.mxu0 }
 0x19d   : > { %v5833_v23 = vpop.f32.mrf.mxu1 }
 0x19e   : > { %8999 = vst [vmem:[#allocation4_spill] sm:$0xff] %v8481_v30  ;;  %v8484_v3 = vadd.f32 %v2678_v46, %v2005_v17  ;;  %v2010_v19 = vadd.f32 %v5833_v23, %v8391_v39  ;;  %v5868_v33 = vpop.f32.mrf.mxu0 }
 0x19f   : > { %v1965_v57 = vpop.f32.mrf.mxu1 }
 0x1a0   : > { %9000 = vst [vmem:[#allocation3_spill] sm:$0xff] %v8484_v3  ;;  %v8487_v42 = vadd.f32 %v5867_v7, %v2010_v19  ;;  %v2008_v41 = vadd.f32 %v1965_v57, %v8394_v45  ;;  %v2694_v47 = vpop.f32.mrf.mxu0 }
 0x1a1   : > { %v5834_v52 = vpop.f32.mrf.mxu1 }
 0x1a2   : > { %9001 = vst [vmem:[#allocation6_spill] sm:$0xff] %v8487_v42  ;;  %v8490_v44 = vadd.f32 %v2691_v51, %v2008_v41  ;;  %v2011_v49 = vadd.f32 %v5834_v52, %v8397_v61  ;;  %v8493_v6 = vpop.f32.mrf.mxu0 }
 0x1a3   : > { %v1968_v14 = vpop.f32.mrf.mxu1 }
 0x1a4   : > { %9002 = vst [vmem:[#allocation5_spill] sm:$0xff] %v8490_v44  ;;  %v8495_v35 = vadd.f32 %v5868_v33, %v2011_v49  ;;  %v2009_v20 = vadd.f32 %v1968_v14, %v8400_v40  ;;  %v8498_v39 = vpop.f32.mrf.mxu0 }
 0x1a5   : > { %v5873_v36 = vpop.f32.mrf.mxu1 }
 0x1a6   : > { %9003 = vst [vmem:[#allocation7_spill] sm:$0xff] %v8495_v35  ;;  %v8500_v32 = vadd.f32 %v2694_v47, %v2009_v20  ;;  %v8502_v5 = vpop.f32.mrf.mxu0 }
 0x1a7   : > { %v3049_v45 = vpop.f32.mrf.mxu1 }
 0x1a8   : > { %9004 = vst [vmem:[#allocation10_spill] sm:$0xff] %v8500_v32  ;;  %v8504_v28 = vpop.f32.mrf.mxu0 }
 0x1a9   : > { %v5874_v43 = vpop.f32.mrf.mxu1 }
 0x1aa   : > { %v8506_v37 = vpop.f32.mrf.mxu0 }
 0x1ab   : > { %v8508_v61 = vpop.f32.mrf.mxu1 }
 0x1ac   : > { %v8510_v21 = vpop.f32.mrf.mxu0 }
 0x1ad   : > { %v8512_v63 = vpop.f32.mrf.mxu1 }
 0x1ae   : > { %v8514_v40 = vpop.f32.mrf.mxu0 }
 0x1af   : > { %v8516_v54 = vpop.f32.mrf.mxu1 }
 0x1b0   : > { %v8518_v10 = vpop.f32.mrf.mxu0 }
 0x1b1   : > { %v8520_v25 = vpop.f32.mrf.mxu1 }
 0x1b2   : > { %v8522_v46 = vpop.f32.mrf.mxu0 }
 0x1b3   : > { %v8524_v4 = vpop.f32.mrf.mxu1 }
 0x1b4   : > { %v8526_v50 = vpop.f32.mrf.mxu0 }
 0x1b5   : > { %v8528_v7 = vpop.f32.mrf.mxu1 }
 0x1b6   : > { %v8530_v1 = vpop.f32.mrf.mxu0 }
 0x1b7   : > { %v8532_v17 = vpop.f32.mrf.mxu1 }
 0x1b8   : > { %v8534_v51 = vpop.f32.mrf.mxu0 }
 0x1b9   : > { %v8536_v23 = vpop.f32.mrf.mxu1 }
 0x1ba   : > { %v8538_v19 = vpop.f32.mrf.mxu0 }
 0x1bb   : > { %v8540_v33 = vpop.f32.mrf.mxu1 }
 0x1bc   : > { %v8542_v57 = vpop.f32.mrf.mxu0 }
 0x1bd   : > { %v8544_v41 = vpop.f32.mrf.mxu1 }
 0x1be   : > { %v8546_v47 = vpop.f32.mrf.mxu0 }
 0x1bf   : > { %v8548_v52 = vpop.f32.mrf.mxu1 }
 0x1c0   : > { %v8550_v49 = vpop.f32.mrf.mxu0 }
 0x1c1   : > { %v8552_v14 = vpop.f32.mrf.mxu1 }
 0x1c2   : > { %v8554_v20 = vpop.f32.mrf.mxu0 }
 0x1c3   : > { %v8556_v32 = vpop.f32.mrf.mxu1 }
 0x1c4   : > { %v8558_v35 = vpop.f32.mrf.mxu0 }
 0x1c5   : > { %9005 = vst [vmem:[#allocation13_spill] sm:$0xff] %v8558_v35  ;;  %v8560_v44 = vpop.f32.mrf.mxu1 }
 0x1c6   : > { %v8562_v42 = vpop.f32.mrf.mxu0 }
 0x1c7   : > { %9006 = vst [vmem:[#allocation15_spill] sm:$0xff] %v8562_v42  ;;  %v8564_v3 = vpop.f32.mrf.mxu1 }
 0x1c8   : > { %v8566_v30 = vpop.f32.mrf.mxu0 }
 0x1c9   : > { %9007 = vst [vmem:[#allocation17_spill] sm:$0xff] %v8566_v30  ;;  %v8568_v15 = vpop.f32.mrf.mxu1 }
 0x1ca   : > { %9008 = vst [vmem:[#allocation20_spill] sm:$0xff] %v8568_v15  ;;  %v8570_v22 = vpop.f32.mrf.mxu0 }
 0x1cb   : > { %9009 = vst [vmem:[#allocation22_spill] sm:$0xff] %v8570_v22  ;;  %v8572_v24 = vpop.f32.mrf.mxu1 }
 0x1cc   : > { %9010 = vst [vmem:[#allocation24_spill] sm:$0xff] %v8572_v24  ;;  %v8574_v56 = vpop.f32.mrf.mxu0 }
 0x1cd   : > { %9011 = vst [vmem:[#allocation11_spill] sm:$0xff] %v8574_v56  ;;  %v8576_v55 = vpop.f32.mrf.mxu1 }
 0x1ce   : > { %9012 = vst [vmem:[#allocation8_spill] sm:$0xff] %v8576_v55  ;;  %v8578_v58 = vpop.f32.mrf.mxu0 }
 0x1cf   : > { %9013 = vst [vmem:[#allocation16_spill] sm:$0xff] %v8578_v58  ;;  %v8580_v59 = vpop.f32.mrf.mxu1 }
 0x1d0   : > { %9014 = vst [vmem:[#allocation12_spill] sm:$0xff] %v8580_v59  ;;  %v8582_v35 = vpop.f32.mrf.mxu0 }
 0x1d1   : > { %9015 = vst [vmem:[#allocation26_spill] sm:$0xff] %v8582_v35  ;;  %v8584_v42 = vpop.f32.mrf.mxu1 }
 0x1d2   : > { %9016 = vst [vmem:[#allocation27_spill] sm:$0xff] %v8584_v42  ;;  %v8586_v34 = vpop.f32.mrf.mxu0 }
 0x1d3   : > { %9017 = vst [vmem:[#allocation28_spill] sm:$0xff] %v8586_v34  ;;  %v8588_v30 = vpop.f32.mrf.mxu1 }
 0x1d4   : > { %9018 = vst [vmem:[#allocation29_spill] sm:$0xff] %v8588_v30  ;;  %v8590_v15 = vpop.f32.mrf.mxu0 }
 0x1d5   : > { %9019 = vst [vmem:[#allocation30_spill] sm:$0xff] %v8590_v15  ;;  %v8592_v22 = vpop.f32.mrf.mxu1 }
 0x1d6   : > { %9020 = vst [vmem:[#allocation31_spill] sm:$0xff] %v8592_v22  ;;  %v8594_v24 = vpop.f32.mrf.mxu0 }
 0x1d7   : > { %9021 = vst [vmem:[#allocation32_spill] sm:$0xff] %v8594_v24  ;;  %v8596_v56 = vpop.f32.mrf.mxu1  ;;  %v3178_v24 = vadd.f32 %v5873_v36, %v8403_v62  ;;  %v3177_v62 = vadd.f32 %v8508_v61, %v8412_v60 }
 0x1d8   : > { %9022 = vst [vmem:[#allocation33_spill] sm:$0xff] %v8596_v56  ;;  %v8598_v55 = vpop.f32.mrf.mxu0 }
 0x1d9   : > { %9023 = vst [vmem:[#allocation34_spill] sm:$0xff] %v8598_v55  ;;  %v8600_v58 = vpop.f32.mrf.mxu1  ;;  %v3176_v55 = vadd.f32 %v3049_v45, %v8406_v0  ;;  %v8630_v0 = vld [vmem:[%s8799_s2] ss:$0 sm:$0xff] }
 0x1da   : > { %9024 = vst [vmem:[#allocation35_spill] sm:$0xff] %v8600_v58  ;;  %v8602_v59 = vpop.f32.mrf.mxu0 }
 0x1db   : > { %9025 = vst [vmem:[#allocation36_spill] sm:$0xff] %v8602_v59  ;;  %v8604_v35 = vpop.f32.mrf.mxu1 }
 0x1dc   : > { %9026 = vst [vmem:[#allocation37_spill] sm:$0xff] %v8604_v35  ;;  %v8606_v42 = vpop.f32.mrf.mxu0  ;;  %v3540_v35 = vadd.f32 %v8493_v6, %v3178_v24 }
 0x1dd   : > { %9027 = vst [vmem:[#allocation38_spill] sm:$0xff] %v8606_v42  ;;  %v8608_v34 = vpop.f32.mrf.mxu1  ;;  %v3179_v42 = vadd.f32 %v5874_v43, %v8409_v26 }
 0x1de   : > { %9028 = vst [vmem:[#allocation39_spill] sm:$0xff] %v8608_v34  ;;  %v8610_v30 = vpop.f32.mrf.mxu0 }
 0x1df   : > { %9029 = vst [vmem:[#allocation40_spill] sm:$0xff] %v8610_v30  ;;  %v8612_v15 = vpop.f32.mrf.mxu1  ;;  %v3541_v24 = vadd.f32 %v8502_v5, %v3179_v42 }
 0x1e0   : > { %9030 = vst [vmem:[#allocation41_spill] sm:$0xff] %v8612_v15  ;;  %v8615_v22 = vpop.f32.mrf.mxu0  ;;  %v3538_v15 = vadd.f32 %v8498_v39, %v3176_v55  ;;  %v3180_v55 = vadd.f32 %v8516_v54, %v8418_v31  ;;  %v3181_v54 = vadd.f32 %v8524_v4, %v8424_v2 }
 0x1e1   : > { %9031 = vst [vmem:[#allocation42_spill] sm:$0xff] %v8615_v22  ;;  %v8617_v56 = vpop.f32.mrf.mxu1 }
 0x1e2   : > { %9032 = vst [vmem:[#allocation43_spill] sm:$0xff] %v8617_v56  ;;  %v5975_v58 = vpop.f32.mrf.mxu0 }
 0x1e3   : > { %v8620_v59 = vpop.f32.mrf.mxu1 }
 0x1e4   : > { %9033 = vst [vmem:[#allocation44_spill] sm:$0xff] %v8620_v59  ;;  %v4607_v34 = vpop.f32.mrf.mxu0  ;;  %v3182_v59 = vadd.f32 %v8512_v63, %v8415_v48 }
 0x1e5   : > { %v5941_v30 = vpop.f32.mrf.mxu1 }
 0x1e6   : > { %v4266_v36 = vadd.f32 %v5941_v30, %v3540_v35  ;;  %v5976_v22 = vpop.f32.mrf.mxu0  ;;  %v3539_v30 = vadd.f32 %v8504_v28, %v3177_v62  ;;  %v3544_v31 = vadd.f32 %v8506_v37, %v3182_v59  ;;  %v3542_v28 = vadd.f32 %v8510_v21, %v3180_v55 }
 0x1e7   : > { %v4137_v45 = vpop.f32.mrf.mxu1  ;;  %v3186_v37 = vadd.f32 %v8528_v7, %v8427_v27 }
 0x1e8   : > { %v4736_v6 = vadd.f32 %v5975_v58, %v4266_v36  ;;  %v4264_v26 = vadd.f32 %v4137_v45, %v3538_v15  ;;  %v4610_v43 = vpop.f32.mrf.mxu0  ;;  %v3183_v58 = vadd.f32 %v8520_v25, %v8421_v38 }
 0x1e9   : > { %v5942_v60 = vpop.f32.mrf.mxu1  ;;  %v3548_v7 = vadd.f32 %v8522_v46, %v3186_v37 }
 0x1ea   : > { %v4775_v35 = vadd.f32 %v8630_v0, %v4736_v6  ;;  %v4734_v39 = vadd.f32 %v4607_v34, %v4264_v26  ;;  %v4267_v61 = vadd.f32 %v5942_v60, %v3541_v24  ;;  %v5979_v56 = vpop.f32.mrf.mxu0  ;;  %v3545_v59 = vadd.f32 %v8514_v40, %v3183_v58 }
 0x1eb   : > { %v4140_v15 = vpop.f32.mrf.mxu1  ;;  %v3543_v60 = vadd.f32 %v8518_v10, %v3181_v54  ;;  %v3184_v58 = vadd.f32 %v8532_v17, %v8430_v18 }
 0x1ec   : > { %v4807_v42 = vmax.f32 %v4775_v35, 0.0  ;;  %v4773_v5 = vadd.f32 %v8630_v0, %v4734_v39  ;;  %v4737_v48 = vadd.f32 %v5976_v22, %v4267_v61  ;;  %v4265_v63 = vadd.f32 %v4140_v15, %v3539_v30  ;;  %v4623_v36 = vpop.f32.mrf.mxu0 }
 0x1ed   : > { %v5945_v38 = vpop.f32.mrf.mxu1  ;;  %v3187_v15 = vadd.f32 %v8536_v23, %v8433_v13 }
 0x1ee   : > { %v4839_v34 = vmin.f32 %v4807_v42, 6.0  ;;  %v4805_v25 = vmax.f32 %v4773_v5, 0.0  ;;  %v4776_v22 = vadd.f32 %v8630_v0, %v4737_v48  ;;  %v4735_v62 = vadd.f32 %v4610_v43, %v4265_v63  ;;  %v5980_v45 = vpop.f32.mrf.mxu0 }
 0x1ef   : > { %v4270_v2 = vadd.f32 %v5945_v38, %v3544_v31  ;;  %v4153_v21 = vpop.f32.mrf.mxu1  ;;  %v3185_v31 = vadd.f32 %v8540_v33, %v8436_v8  ;;  %v3546_v38 = vadd.f32 %v8526_v50, %v3184_v58 }
 0x1f0   : > { %4871 = vst [vmem:[%s8650_s19 + $0x10] sm:$0xff] %v4839_v34  ;;  %v4837_v4 = vmin.f32 %v4805_v25, 6.0  ;;  %v4808_v24 = vmax.f32 %v4776_v22, 0.0  ;;  %v4774_v6 = vadd.f32 %v8630_v0, %v4735_v62  ;;  %v4268_v26 = vadd.f32 %v4153_v21, %v3542_v28  ;;  %v4626_v55 = vpop.f32.mrf.mxu0 }
 0x1f1   : > { %v4740_v30 = vadd.f32 %v5979_v56, %v4270_v2  ;;  %v5946_v43 = vpop.f32.mrf.mxu1  ;;  %v3549_v34 = vadd.f32 %v8530_v1, %v3187_v15  ;;  %v3190_v25 = vadd.f32 %v8544_v41, %v8439_v53  ;;  %v3547_v2 = vadd.f32 %v8534_v51, %v3185_v31 }
 0x1f2   : > { %4869 = vst [vmem:[%s8650_s19] sm:$0xff] %v4837_v4  ;;  %v4840_v35 = vmin.f32 %v4808_v24, 6.0  ;;  %v4806_v40 = vmax.f32 %v4774_v6, 0.0  ;;  %v4738_v39 = vadd.f32 %v4623_v36, %v4268_v26  ;;  %v4271_v61 = vadd.f32 %v5946_v43, %v3545_v59  ;;  %v5983_v27 = vpop.f32.mrf.mxu0 }
 0x1f3   : > { %v4779_v42 = vadd.f32 %v8630_v0, %v4740_v30  ;;  %v4156_v10 = vpop.f32.mrf.mxu1  ;;  %v3188_v21 = vadd.f32 %v8548_v52, %v8442_v12  ;;  %v3552_v26 = vadd.f32 %v8538_v19, %v3190_v25 }
 0x1f4   : > { %4872 = vst [vmem:[%s8650_s19 + $0x18] sm:$0xff] %v4840_v35  ;;  %v4838_v56 = vmin.f32 %v4806_v40, 6.0  ;;  %v4777_v5 = vadd.f32 %v8630_v0, %v4738_v39  ;;  %v4741_v48 = vadd.f32 %v5980_v45, %v4271_v61  ;;  %v4269_v63 = vadd.f32 %v4156_v10, %v3543_v60  ;;  %v4639_v36 = vpop.f32.mrf.mxu0 }
 0x1f5   : > { %v4811_v46 = vmax.f32 %v4779_v42, 0.0  ;;  %v5949_v28 = vpop.f32.mrf.mxu1  ;;  %v3550_v35 = vadd.f32 %v8542_v57, %v3188_v21  ;;  %v3191_v40 = vadd.f32 %v8552_v14, %v8445_v16  ;;  %v3189_v39 = vadd.f32 %v8556_v32, %v8448_v11 }
 0x1f6   : > { %4870 = vst [vmem:[%s8650_s19 + $0x8] sm:$0xff] %v4838_v56  ;;  %v4809_v18 = vmax.f32 %v4777_v5, 0.0  ;;  %v4780_v17 = vadd.f32 %v8630_v0, %v4741_v48  ;;  %v4739_v13 = vadd.f32 %v4626_v55, %v4269_v63  ;;  %v4274_v23 = vadd.f32 %v5949_v28, %v3548_v7  ;;  %v5984_v54 = vpop.f32.mrf.mxu0 }
 0x1f7   : > { %v4843_v22 = vmin.f32 %v4811_v46, 6.0  ;;  %v4169_v8 = vpop.f32.mrf.mxu1  ;;  %v3194_v10 = vadd.f32 %v8560_v44, %v8451_v29  ;;  %v3553_v48 = vadd.f32 %v8546_v47, %v3191_v40  ;;  %v3551_v63 = vadd.f32 %v8550_v49, %v3189_v39  ;;  %v9043_v40 = vld [vmem:[#allocation12_spill] sm:$0xff] }
 0x1f8   : > { %v4841_v33 = vmin.f32 %v4809_v18, 6.0  ;;  %v4812_v62 = vmax.f32 %v4780_v17, 0.0  ;;  %v4778_v45 = vadd.f32 %v8630_v0, %v4739_v13  ;;  %v4744_v59 = vadd.f32 %v5983_v27, %v4274_v23  ;;  %v4642_v37 = vpop.f32.mrf.mxu0  ;;  %v9034_v23 = vld [vmem:[#allocation2_spill] sm:$0xff] }
 0x1f9   : > { %4875 = vst [vmem:[%s8650_s19 + $0x30] sm:$0xff] %v4843_v22  ;;  %v4272_v50 = vadd.f32 %v4169_v8, %v3546_v38  ;;  %v5950_v1 = vpop.f32.mrf.mxu1  ;;  %v3556_v13 = vadd.f32 %v8554_v20, %v3194_v10  ;;  %v9036_v8 = vld [vmem:[#allocation13_spill] sm:$0xff] }
 0x1fa   : > { %4873 = vst [vmem:[%s8650_s19 + $0x20] sm:$0xff] %v4841_v33  ;;  %v4844_v4 = vmin.f32 %v4812_v62, 6.0  ;;  %v4810_v53 = vmax.f32 %v4778_v45, 0.0  ;;  %v4783_v41 = vadd.f32 %v8630_v0, %v4744_v59  ;;  %v4275_v24 = vadd.f32 %v5950_v1, %v3549_v34  ;;  %v5987_v6 = vpop.f32.mrf.mxu0  ;;  %v9044_v10 = vld [vmem:[#allocation17_spill] sm:$0xff] }
 0x1fb   : > { %v4742_v55 = vadd.f32 %v4639_v36, %v4272_v50  ;;  %v4172_v60 = vpop.f32.mrf.mxu1  ;;  %v3192_v36 = vadd.f32 %v8564_v3, %v8454_v9  ;;  %v9037_v50 = vld [vmem:[#allocation15_spill] sm:$0xff] }
 0x1fc   : > { %4876 = vst [vmem:[%s8650_s19 + $0x38] sm:$0xff] %v4844_v4  ;;  %v4842_v51 = vmin.f32 %v4810_v53, 6.0  ;;  %v4815_v30 = vmax.f32 %v4783_v41, 0.0  ;;  %v4745_v43 = vadd.f32 %v5984_v54, %v4275_v24  ;;  %v4273_v12 = vadd.f32 %v4172_v60, %v3547_v2  ;;  %v4655_v52 = vpop.f32.mrf.mxu0  ;;  %v9035_v54 = vld [vmem:[#allocation20_spill] sm:$0xff]  ;;  %v9038_v4 = vld [vmem:[#allocation14_spill] sm:$0xff]  ;;  %v9040_v24 = vld [vmem:[#allocation19_spill] sm:$0xff] }
 0x1fd   : > { %v4781_v61 = vadd.f32 %v8630_v0, %v4742_v55  ;;  %v5953_v19 = vpop.f32.mrf.mxu1  ;;  %v3195_v38 = vadd.f32 %v9035_v54, %v9034_v23  ;;  %v3554_v33 = vadd.f32 %v9036_v8, %v3192_v36  ;;  %v9039_v53 = vld [vmem:[#allocation24_spill] sm:$0xff] }
 0x1fe   : > { %4874 = vst [vmem:[%s8650_s19 + $0x28] sm:$0xff] %v4842_v51  ;;  %v4847_v27 = vmin.f32 %v4815_v30, 6.0  ;;  %v4784_v7 = vadd.f32 %v8630_v0, %v4745_v43  ;;  %v4743_v58 = vadd.f32 %v4642_v37, %v4273_v12  ;;  %v4278_v15 = vadd.f32 %v5953_v19, %v3552_v26  ;;  %v5988_v42 = vpop.f32.mrf.mxu0 }
 0x1ff   : > { %v4813_v57 = vmax.f32 %v4781_v61, 0.0  ;;  %v4185_v56 = vpop.f32.mrf.mxu1  ;;  %v3557_v1 = vadd.f32 %v9037_v50, %v3195_v38  ;;  %v3193_v41 = vadd.f32 %v9039_v53, %v9038_v4  ;;  %v9054_v50 = vld [vmem:[#allocation31_spill] sm:$0xff]  ;;  %v9055_v4 = vld [vmem:[#allocation25_spill] sm:$0xff] }
 0x200   : > { %4879 = vst [vmem:[%s8650_s19 + $0x50] sm:$0xff] %v4847_v27  ;;  %v4816_v16 = vmax.f32 %v4784_v7, 0.0  ;;  %v4782_v14 = vadd.f32 %v8630_v0, %v4743_v58  ;;  %v4748_v11 = vadd.f32 %v5987_v6, %v4278_v15  ;;  %v4276_v32 = vadd.f32 %v4185_v56, %v3550_v35  ;;  %v4658_v5 = vpop.f32.mrf.mxu0  ;;  %v9041_v6 = vld [vmem:[#allocation8_spill] sm:$0xff]  ;;  %v9042_v35 = vld [vmem:[#allocation9_spill] sm:$0xff]  ;;  %v9045_v56 = vld [vmem:[#allocation22_spill] sm:$0xff] }
 0x201   : > { %v4845_v31 = vmin.f32 %v4813_v57, 6.0  ;;  %v5954_v29 = vpop.f32.mrf.mxu1  ;;  %v3198_v26 = vadd.f32 %v9041_v6, %v9040_v24  ;;  %v3196_v39 = vadd.f32 %v9043_v40, %v9042_v35  ;;  %v3555_v57 = vadd.f32 %v9044_v10, %v3193_v41  ;;  %v9056_v53 = vld [vmem:[#allocation33_spill] sm:$0xff] }
 0x202   : > { %v4848_v44 = vmin.f32 %v4816_v16, 6.0  ;;  %v4814_v46 = vmax.f32 %v4782_v14, 0.0  ;;  %v4787_v28 = vadd.f32 %v8630_v0, %v4748_v11  ;;  %v4746_v18 = vadd.f32 %v4655_v52, %v4276_v32  ;;  %v5991_v17 = vpop.f32.mrf.mxu0  ;;  %v9046_v14 = vld [vmem:[#allocation18_spill] sm:$0xff]  ;;  %v9047_v11 = vld [vmem:[#allocation27_spill] sm:$0xff] }
 0x203   : > { %4877 = vst [vmem:[%s8650_s19 + $0x40] sm:$0xff] %v4845_v31  ;;  %v4279_v47 = vadd.f32 %v5954_v29, %v3553_v48  ;;  %v4188_v49 = vpop.f32.mrf.mxu1  ;;  %v3560_v16 = vadd.f32 %v9045_v56, %v3198_v26  ;;  %v3199_v32 = vadd.f32 %v9047_v11, %v9046_v14  ;;  %v3200_v41 = vadd.f32 %v9056_v53, %v9055_v4  ;;  %v9062_v56 = vld [vmem:[#allocation37_spill] sm:$0xff] }
 0x204   : > { %4880 = vst [vmem:[%s8650_s19 + $0x58] sm:$0xff] %v4848_v44  ;;  %v4846_v34 = vmin.f32 %v4814_v46, 6.0  ;;  %v4819_v9 = vmax.f32 %v4787_v28, 0.0  ;;  %v4785_v3 = vadd.f32 %v8630_v0, %v4746_v18  ;;  %v4277_v25 = vadd.f32 %v4188_v49, %v3551_v63  ;;  %v4671_v22 = vpop.f32.mrf.mxu0  ;;  %v9048_v46 = vld [vmem:[#allocation11_spill] sm:$0xff]  ;;  %v9049_v18 = vld [vmem:[#allocation21_spill] sm:$0xff] }
 0x205   : > { %v4749_v62 = vadd.f32 %v5988_v42, %v4279_v47  ;;  %v5957_v45 = vpop.f32.mrf.mxu1  ;;  %v3558_v28 = vadd.f32 %v9048_v46, %v3196_v39  ;;  %v9065_v46 = vld [vmem:[#allocation39_spill] sm:$0xff] }
 0x206   : > { %4878 = vst [vmem:[%s8650_s19 + $0x48] sm:$0xff] %v4846_v34  ;;  %v4851_v20 = vmin.f32 %v4819_v9, 6.0  ;;  %v4817_v59 = vmax.f32 %v4785_v3, 0.0  ;;  %v4747_v37 = vadd.f32 %v4658_v5, %v4277_v25  ;;  %v4282_v2 = vadd.f32 %v5957_v45, %v3556_v13  ;;  %v5992_v21 = vpop.f32.mrf.mxu0  ;;  %v9051_v3 = vld [vmem:[#allocation16_spill] sm:$0xff] }
 0x207   : > { %v4788_v55 = vadd.f32 %v8630_v0, %v4749_v62  ;;  %v4201_v60 = vpop.f32.mrf.mxu1  ;;  %v3561_v25 = vadd.f32 %v9051_v3, %v3199_v32 }
 0x208   : > { %4883 = vst [vmem:[%s8650_s19 + $0x70] sm:$0xff] %v4851_v20  ;;  %v4849_v51 = vmin.f32 %v4817_v59, 6.0  ;;  %v4786_v30 = vadd.f32 %v8630_v0, %v4747_v37  ;;  %v4752_v43 = vadd.f32 %v5991_v17, %v4282_v2  ;;  %v4280_v12 = vadd.f32 %v4201_v60, %v3554_v33  ;;  %v4674_v52 = vpop.f32.mrf.mxu0  ;;  %v9050_v17 = vld [vmem:[#allocation29_spill] sm:$0xff]  ;;  %v9052_v37 = vld [vmem:[#allocation26_spill] sm:$0xff] }
 0x209   : > { %v4820_v61 = vmax.f32 %v4788_v55, 0.0  ;;  %v5958_v19 = vpop.f32.mrf.mxu1  ;;  %v3197_v13 = vadd.f32 %v9050_v17, %v9049_v18 }
 0x20a   : > { %4881 = vst [vmem:[%s8650_s19 + $0x60] sm:$0xff] %v4849_v51  ;;  %v4818_v27 = vmax.f32 %v4786_v30, 0.0  ;;  %v4791_v7 = vadd.f32 %v8630_v0, %v4752_v43  ;;  %v4750_v58 = vadd.f32 %v4671_v22, %v4280_v12  ;;  %v4283_v15 = vadd.f32 %v5958_v19, %v3557_v1  ;;  %v9057_v43 = vld [vmem:[#allocation4_spill] sm:$0xff]  ;;  %v9058_v12 = vld [vmem:[#allocation35_spill] sm:$0xff] }
 0x20b   : > { %v5995_v42 = vpop.f32.mrf.mxu0  ;;  %v4852_v5 = vmin.f32 %v4820_v61, 6.0  ;;  %v4204_v48 = vpop.f32.mrf.mxu1  ;;  %v3559_v2 = vadd.f32 %v9052_v37, %v3197_v13  ;;  %v9069_v37 = vld [vmem:[#allocation41_spill] sm:$0xff] }
 0x20c   : > { %v4850_v63 = vmin.f32 %v4818_v27, 6.0  ;;  %v4823_v36 = vmax.f32 %v4791_v7, 0.0  ;;  %v4789_v31 = vadd.f32 %v8630_v0, %v4750_v58  ;;  %v4753_v29 = vadd.f32 %v5992_v21, %v4283_v15  ;;  %v9053_v21 = vld [vmem:[#allocation23_spill] sm:$0xff]  ;;  %v9059_v58 = vld [vmem:[#allocation28_spill] sm:$0xff] }
 0x20d   : > { %v4687_v44 = vpop.f32.mrf.mxu0  ;;  %4884 = vst [vmem:[%s8650_s19 + $0x78] sm:$0xff] %v4852_v5  ;;  %v4281_v23 = vadd.f32 %v4204_v48, %v3555_v57  ;;  %v5961_v54 = vpop.f32.mrf.mxu1  ;;  %v3202_v1 = vadd.f32 %v9054_v50, %v9053_v21  ;;  %v9061_v57 = vld [vmem:[#allocation3_spill] sm:$0xff] }
 0x20e   : > { %4882 = vst [vmem:[%s8650_s19 + $0x68] sm:$0xff] %v4850_v63  ;;  %v4855_v38 = vmin.f32 %v4823_v36, 6.0  ;;  %v4821_v47 = vmax.f32 %v4789_v31, 0.0  ;;  %v4792_v49 = vadd.f32 %v8630_v0, %v4753_v29  ;;  %v4286_v34 = vadd.f32 %v5961_v54, %v3560_v16  ;;  %v9063_v31 = vld [vmem:[#allocation32_spill] sm:$0xff]  ;;  %v9070_v21 = vld [vmem:[#allocation7_spill] sm:$0xff] }
 0x20f   : > { %v5996_v9 = vpop.f32.mrf.mxu0  ;;  %v4751_v22 = vadd.f32 %v4674_v52, %v4281_v23  ;;  %v4217_v8 = vpop.f32.mrf.mxu1  ;;  %v3203_v52 = vadd.f32 %v9058_v12, %v9057_v43  ;;  %v3564_v15 = vadd.f32 %v9059_v58, %v3202_v1  ;;  %v3201_v16 = vadd.f32 %v9062_v56, %v9061_v57  ;;  %v9071_v50 = vld [vmem:[#allocation43_spill] sm:$0xff] }
 0x210   : > { %4887 = vst [vmem:[%s8650_s19 + $0x90] sm:$0xff] %v4855_v38  ;;  %v4853_v33 = vmin.f32 %v4821_v47, 6.0  ;;  %v4824_v62 = vmax.f32 %v4792_v49, 0.0  ;;  %v4756_v45 = vadd.f32 %v5995_v42, %v4286_v34  ;;  %v4284_v20 = vadd.f32 %v4217_v8, %v3558_v28  ;;  %v9060_v42 = vld [vmem:[#allocation30_spill] sm:$0xff] }
 0x211   : > { %v4690_v59 = vpop.f32.mrf.mxu0  ;;  %v4790_v24 = vadd.f32 %v8630_v0, %v4751_v22  ;;  %v5962_v6 = vpop.f32.mrf.mxu1  ;;  %v3562_v10 = vadd.f32 %v9060_v42, %v3200_v41  ;;  %v3565_v29 = vadd.f32 %v9063_v31, %v3203_v52  ;;  %v9066_v49 = vld [vmem:[#allocation34_spill] sm:$0xff]  ;;  %v3207_v1 = vadd.f32 %v9071_v50, %v9070_v21 }
 0x212   : > { %4885 = vst [vmem:[%s8650_s19 + $0x80] sm:$0xff] %v4853_v33  ;;  %v4856_v26 = vmin.f32 %v4824_v62, 6.0  ;;  %v4795_v55 = vadd.f32 %v8630_v0, %v4756_v45  ;;  %v4754_v60 = vadd.f32 %v4687_v44, %v4284_v20  ;;  %v4287_v51 = vadd.f32 %v5962_v6, %v3561_v25  ;;  %v9064_v44 = vld [vmem:[#allocation6_spill] sm:$0xff]  ;;  %v9067_v45 = vld [vmem:[#allocation36_spill] sm:$0xff] }
 0x213   : > { %v5999_v30 = vpop.f32.mrf.mxu0  ;;  %v4822_v35 = vmax.f32 %v4790_v24, 0.0  ;;  %v4220_v40 = vpop.f32.mrf.mxu1  ;;  %v3206_v28 = vadd.f32 %v9065_v46, %v9064_v44  ;;  %v3563_v34 = vadd.f32 %v9066_v49, %v3201_v16  ;;  %v9076_v16 = vld [vmem:[#allocation42_spill] sm:$0xff] }
 0x214   : > { %4888 = vst [vmem:[%s8650_s19 + $0x98] sm:$0xff] %v4856_v26  ;;  %v4827_v39 = vmax.f32 %v4795_v55, 0.0  ;;  %v4793_v61 = vadd.f32 %v8630_v0, %v4754_v60  ;;  %v4757_v19 = vadd.f32 %v5996_v9, %v4287_v51  ;;  %v4285_v27 = vadd.f32 %v4220_v40, %v3559_v2  ;;  %v9072_v55 = vld [vmem:[#allocation10_spill] sm:$0xff]  ;;  %v9073_v60 = vld [vmem:[#allocation44_spill] sm:$0xff] }
 0x215   : > { %v4703_v7 = vpop.f32.mrf.mxu0  ;;  %v4854_v14 = vmin.f32 %v4822_v35, 6.0  ;;  %v5965_v11 = vpop.f32.mrf.mxu1  ;;  %v3568_v20 = vadd.f32 %v9067_v45, %v3206_v28  ;;  %v3205_v51 = vadd.f32 %v9073_v60, %v9072_v55 }
 0x216   : > { %v4859_v32 = vmin.f32 %v4827_v39, 6.0  ;;  %v4825_v5 = vmax.f32 %v4793_v61, 0.0  ;;  %v4796_v48 = vadd.f32 %v8630_v0, %v4757_v19  ;;  %v4755_v63 = vadd.f32 %v4690_v59, %v4285_v27  ;;  %v9068_v59 = vld [vmem:[#allocation5_spill] sm:$0xff]  ;;  %v9074_v61 = vld [vmem:[#allocation38_spill] sm:$0xff]  ;;  %v9075_v27 = vld [vmem:[#allocation40_spill] sm:$0xff] }
 0x217   : > { %v6000_v36 = vpop.f32.mrf.mxu0  ;;  %4886 = vst [vmem:[%s8650_s19 + $0x88] sm:$0xff] %v4854_v14  ;;  %v4290_v18 = vadd.f32 %v5965_v11, %v3564_v15  ;;  %v4233_v17 = vpop.f32.mrf.mxu1  ;;  %v3204_v2 = vadd.f32 %v9069_v37, %v9068_v59  ;;  %v3567_v14 = vadd.f32 %v9076_v16, %v3205_v51 }
 0x218   : > { %4891 = vst [vmem:[%s8650_s19 + $0xb0] sm:$0xff] %v4859_v32  ;;  %v4857_v13 = vmin.f32 %v4825_v5, 6.0  ;;  %v4828_v23 = vmax.f32 %v4796_v48, 0.0  ;;  %v4794_v54 = vadd.f32 %v8630_v0, %v4755_v63  ;;  %v4288_v38 = vadd.f32 %v4233_v17, %v3562_v10 }
 0x219   : > { %v4706_v47 = vpop.f32.mrf.mxu0  ;;  %v4760_v9 = vadd.f32 %v5999_v30, %v4290_v18  ;;  %v5966_v3 = vpop.f32.mrf.mxu1  ;;  %v3566_v19 = vadd.f32 %v9074_v61, %v3204_v2 }
 0x21a   : > { %4889 = vst [vmem:[%s8650_s19 + $0xa0] sm:$0xff] %v4857_v13  ;;  %v4860_v25 = vmin.f32 %v4828_v23, 6.0  ;;  %v4826_v22 = vmax.f32 %v4794_v54, 0.0  ;;  %v4758_v8 = vadd.f32 %v4703_v7, %v4288_v38  ;;  %v4291_v33 = vadd.f32 %v5966_v3, %v3565_v29 }
 0x21b   : > { %v6003_v62 = vpop.f32.mrf.mxu0  ;;  %v4799_v4 = vadd.f32 %v8630_v0, %v4760_v9  ;;  %v4236_v53 = vpop.f32.mrf.mxu1  ;;  %v3569_v7 = vadd.f32 %v9075_v27, %v3207_v1 }
 0x21c   : > { %4892 = vst [vmem:[%s8650_s19 + $0xb8] sm:$0xff] %v4860_v25  ;;  %v4858_v41 = vmin.f32 %v4826_v22, 6.0  ;;  %v4797_v24 = vadd.f32 %v8630_v0, %v4758_v8  ;;  %v4761_v6 = vadd.f32 %v6000_v36, %v4291_v33  ;;  %v4289_v26 = vadd.f32 %v4236_v53, %v3563_v34 }
 0x21d   : > { %v4831_v30 = vmax.f32 %v4799_v4, 0.0  ;;  %v5969_v43 = vpop.f32.mrf.mxu1  ;;  %v4719_v12 = vpop.f32.mrf.mxu0 }
 0x21e   : > { %4890 = vst [vmem:[%s8650_s19 + $0xa8] sm:$0xff] %v4858_v41  ;;  %v4829_v52 = vmax.f32 %v4797_v24, 0.0  ;;  %v4800_v35 = vadd.f32 %v8630_v0, %v4761_v6  ;;  %v4759_v40 = vadd.f32 %v4706_v47, %v4289_v26  ;;  %v4294_v39 = vadd.f32 %v5969_v43, %v3568_v20 }
 0x21f   : > { %v4863_v58 = vmin.f32 %v4831_v30, 6.0  ;;  %v4249_v15 = vpop.f32.mrf.mxu1  ;;  %v6004_v5 = vpop.f32.mrf.mxu0 }
 0x220   : > { %v4861_v42 = vmin.f32 %v4829_v52, 6.0  ;;  %v4832_v10 = vmax.f32 %v4800_v35, 0.0  ;;  %v4798_v57 = vadd.f32 %v8630_v0, %v4759_v40  ;;  %v4764_v56 = vadd.f32 %v6003_v62, %v4294_v39 }
 0x221   : > { %4895 = vst [vmem:[%s8650_s19 + $0xd0] sm:$0xff] %v4863_v58  ;;  %v4292_v11 = vadd.f32 %v4249_v15, %v3566_v19  ;;  %v5970_v32 = vpop.f32.mrf.mxu1  ;;  %v4722_v23 = vpop.f32.mrf.mxu0 }
 0x222   : > { %4893 = vst [vmem:[%s8650_s19 + $0xc0] sm:$0xff] %v4861_v42  ;;  %v4864_v48 = vmin.f32 %v4832_v10, 6.0  ;;  %v4830_v63 = vmax.f32 %v4798_v57, 0.0  ;;  %v4803_v36 = vadd.f32 %v8630_v0, %v4764_v56  ;;  %v4295_v31 = vadd.f32 %v5970_v32, %v3569_v7 }
 0x223   : > { %v4762_v29 = vadd.f32 %v4719_v12, %v4292_v11  ;;  %v4252_v44 = vpop.f32.mrf.mxu1 }
 0x224   : > { %4896 = vst [vmem:[%s8650_s19 + $0xd8] sm:$0xff] %v4864_v48  ;;  %v4862_v46 = vmin.f32 %v4830_v63, 6.0  ;;  %v4835_v28 = vmax.f32 %v4803_v36, 0.0  ;;  %v4765_v18 = vadd.f32 %v6004_v5, %v4295_v31  ;;  %v4293_v17 = vadd.f32 %v4252_v44, %v3567_v14 }
 0x225   : > { %v4801_v13 = vadd.f32 %v8630_v0, %v4762_v29 }
 0x226   : > { %4894 = vst [vmem:[%s8650_s19 + $0xc8] sm:$0xff] %v4862_v46  ;;  %v4867_v54 = vmin.f32 %v4835_v28, 6.0  ;;  %v4804_v38 = vadd.f32 %v8630_v0, %v4765_v18  ;;  %v4763_v47 = vadd.f32 %v4722_v23, %v4293_v17 }
 0x227   : > { %v4833_v49 = vmax.f32 %v4801_v13, 0.0 }
 0x228   : > { %4899 = vst [vmem:[%s8650_s19 + $0xf0] sm:$0xff] %v4867_v54  ;;  %v4836_v34 = vmax.f32 %v4804_v38, 0.0  ;;  %v4802_v9 = vadd.f32 %v8630_v0, %v4763_v47 }
 0x229   : > { %v4865_v3 = vmin.f32 %v4833_v49, 6.0 }
 0x22a   : > { %v4868_v25 = vmin.f32 %v4836_v34, 6.0  ;;  %v4834_v22 = vmax.f32 %v4802_v9, 0.0 }
 0x22b   : > { %4897 = vst [vmem:[%s8650_s19 + $0xe0] sm:$0xff] %v4865_v3 }
 0x22c   : > { %4900 = vst [vmem:[%s8650_s19 + $0xf8] sm:$0xff] %v4868_v25  ;;  %v4866_v8 = vmin.f32 %v4834_v22, 6.0 }
 0x22e   : > { %4898 = vst [vmem:[%s8650_s19 + $0xe8] sm:$0xff] %v4866_v8 }
 0x22f PF: > { %s13_s14 = sadd.s32 1, %s6114_s14   ;;  %s9077_s12 = smov %s6110_s13 }
 0x230   : > { %p10_p5 = scmp.ge.s32.totalorder %s13_s14, 4   ;;  %s9078_s13 = smov %s9080_s15 }
 0x232   :  { %12 = sbr.rel (!%p10_p5) target bundleno = 2 (0x2), region = 73 }

</bundles_post_ra>
